<compile_context>
chip_gen: v6e
topology: v6e:2x2x1
jax: 0.10.0
libtpu: 0.0.40
codegen_flags: <defaults>
</compile_context>

<pallas_src>
import functools

import numpy as np
import jax
import jax.numpy as jnp
from jax import lax
from jax.experimental import pallas as pl
from jax.experimental.pallas import tpu as pltpu


# ----------------------------- host-side (numpy) constant builders -----------------------------

def _pool_crop_np(n_out, start, n_in, pool):
  """(n_out, n_in) selector. Row r averages input rows {2*(start+r), 2*(start+r)+1}
  (pool=True) or selects input row start+r (pool=False)."""
  r = np.arange(n_out)[:, None]
  c = np.arange(n_in)[None, :]
  if pool:
    m = (c == 2 * (start + r)) | (c == 2 * (start + r) + 1)
    return np.where(m, 0.5, 0.0).astype(np.float32)
  return (c == start + r).astype(np.float32)


def _shift_stack_np(kh, n):
  """(kh, n, n): (Shift[i] @ x)[a, :] == x[a + i - (kh-1)//2, :] with zero fill."""
  pad = (kh - 1) // 2
  i = np.arange(kh)[:, None, None]
  hq = np.arange(n)[None, :, None]
  hp = np.arange(n)[None, None, :]
  return (hp == hq + i - pad).astype(np.float32)


def _band_stack_np(psf2d, n):
  """(kh, n, n): x @ Band[i] == 'same' cross-correlation of x's rows with PSF row i
  (zero padding folded into the band matrix)."""
  kh, kw = psf2d.shape
  pad = (kw - 1) // 2
  wp = np.arange(n)[:, None]
  wq = np.arange(n)[None, :]
  j = wp - wq + pad
  valid = (j >= 0) & (j < kw)
  vals = psf2d[:, np.clip(j, 0, kw - 1)]
  return np.where(valid[None], vals, 0.0).astype(np.float32)


def _bilinear_half_np(k2d):
  """F.interpolate(k, scale_factor=0.5, bilinear, align_corners=False): exact 2x2
  averaging of the leading even block (exact for any size >= 2 at this scale)."""
  kh, kw = k2d.shape
  oh, ow = kh // 2, kw // 2
  assert oh >= 1 and ow >= 1
  s = k2d[: 2 * oh, : 2 * ow]
  return s.reshape(oh, 2, ow, 2).mean(axis=(1, 3)).astype(np.float32)


def _crop_start(conv_h, conv_w, tgt_h, tgt_w, insert_xy):
  if insert_xy > 0:
    c0 = max(0, (conv_h - tgt_h) // 2)
    c1 = max(0, (conv_w - tgt_w) // 2)
    # TODO(synk): bilinear resize fallback when the centered crop is not exact.
    assert c0 + tgt_h <= conv_h and c1 + tgt_w <= conv_w
    return c0, c1
  assert (conv_h, conv_w) == (tgt_h, tgt_w)
  return 0, 0


@functools.lru_cache(maxsize=8)
def _build_constants(psf_bytes, psf_shape, H, W, th, tw, Bt, insert_xy):
  """Dense per-scale operators (vec(x) @ A == crop(pool(conv(x)))) + pooling matrices."""
  psf2d = np.frombuffer(psf_bytes, dtype=np.float32).reshape(psf_shape)
  kh, kw = psf2d.shape
  H2, W2, th2, tw2 = H // 2, W // 2, th // 2, tw // 2

  # scale 1.0: y = crop(pool2(conv_same(x, psf)))        == vec(x) @ A1
  ch0, cw0 = _crop_start(H2, W2, th, tw, insert_xy)
  pr = _pool_crop_np(th, ch0, H, True)                   # (th, H)  row pool+crop
  pc = _pool_crop_np(tw, cw0, W, True)                   # (tw, W)  col pool+crop
  S1 = _shift_stack_np(kh, H)                            # (kh, H, H)
  B1 = _band_stack_np(psf2d, W)                          # (kh, W, W)
  L1 = np.einsum('rh,ihk->irk', pr, S1)                  # (kh, th, H)
  R1 = np.einsum('iwk,ck->iwc', B1, pc)                  # (kh, W, tw)
  A1 = np.einsum('irh,iwc->hwrc', L1, R1).reshape(H * W, th * tw)

  # scale 0.5: y = crop(conv_same(pool2(x), psf_half))   == vec(x) @ A2
  psf_h = _bilinear_half_np(psf2d)
  psf_h = psf_h / psf_h.sum()                            # renormalized scaled PSF
  kh2, kw2 = psf_h.shape
  ch1, cw1 = _crop_start(H2, W2, th2, tw2, insert_xy)
  cr2 = _pool_crop_np(th2, ch1, H2, False)               # (th2, H2) crop rows
  cc2 = _pool_crop_np(tw2, cw1, W2, False)               # (tw2, W2) crop cols
  S2 = _shift_stack_np(kh2, H2)                          # (kh2, H2, H2)
  B2 = _band_stack_np(psf_h, W2)                         # (kh2, W2, W2)
  ph = _pool_crop_np(H2, 0, H, True)                     # (H2, H) row 2x pool
  pw = _pool_crop_np(W2, 0, W, True)                     # (W2, W) col 2x pool
  L2 = np.einsum('rh,ihk,km->irm', cr2, S2, ph)          # (kh2, th2, H)
  R2 = np.einsum('mw,iwk,ck->imc', pw.T, B2, cc2)        # (kh2, W, tw2)
  A2 = np.einsum('irh,iwc->hwrc', L2, R2).reshape(H * W, th2 * tw2)

  # Pooled prediction (for the 0.5-scale regularizers) on the stacked (Bt*H, W) block:
  # global pairwise row pooling never crosses image boundaries because H is even.
  prow = _pool_crop_np(Bt * H2, 0, Bt * H, True)         # (Bt*H2, Bt*H)
  pcol = _pool_crop_np(W2, 0, W, True).T                 # (W, W2)

  bf = jnp.bfloat16
  return (jnp.asarray(A1, bf), jnp.asarray(A2, bf),
          jnp.asarray(prow, bf), jnp.asarray(pcol, bf))


# ----------------------------- in-kernel regularizers -----------------------------

def _reg_sum(p, hh, b_real, tv_w, hess_w, l1_w):
  """TV / Hessian / L1 regularizers of a stack of images p (Bt*hh, ww), with weights and
  torch-mean divisors folded into one f32 accumulator map -> ONE cross-lane reduction.
  Rows with (row % hh) at the image boundary are masked out of all row-direction diffs,
  so the stacked formulation is exact."""
  rcnt, ww = p.shape
  f32 = jnp.float32
  rows = lax.broadcasted_iota(jnp.int32, (rcnt, ww), 0) % hh
  cols = lax.broadcasted_iota(jnp.int32, (rcnt, ww), 1)
  zrow = jnp.zeros((1, ww), f32)
  zcol = jnp.zeros((rcnt, 1), f32)

  def down(a):   # a[r+1, c] (garbage at masked rows)
    return jnp.concatenate([a[1:, :], zrow], axis=0)

  def right(a):  # a[r, c+1] (garbage at masked cols)
    return jnp.concatenate([a[:, 1:], zcol], axis=1)

  acc = jnp.zeros((rcnt, ww), f32)
  if l1_w > 0.0:
    acc = acc + (l1_w / (b_real * hh * ww)) * jnp.abs(p)
  if tv_w > 0.0 or hess_w > 0.0:
    yd = p - down(p)     # valid: rows < hh-1
    xd = p - right(p)    # valid: cols < ww-1
    if tv_w > 0.0:
      acc = acc + (tv_w / (b_real * (hh - 1) * ww)) * jnp.where(rows < hh - 1, yd * yd, 0.0)
      acc = acc + (tv_w / (b_real * hh * (ww - 1))) * jnp.where(cols < ww - 1, xd * xd, 0.0)
    if hess_w > 0.0:
      xx = xd - right(xd)   # valid: cols < ww-2
      yy = yd - down(yd)    # valid: rows < hh-2
      xy = yd - right(yd)   # valid: rows < hh-1 & cols < ww-1
      yx = xd - down(xd)    # valid: rows < hh-1 & cols < ww-1
      acc = acc + (hess_w / (b_real * hh * (ww - 2))) * jnp.where(cols < ww - 2, xx * xx, 0.0)
      acc = acc + (hess_w / (b_real * (hh - 2) * ww)) * jnp.where(rows < hh - 2, yy * yy, 0.0)
      acc = acc + (hess_w / (b_real * (hh - 1) * (ww - 1))) * jnp.where(
          (rows < hh - 1) & (cols < ww - 1), xy * xy + yx * yx, 0.0)
  return jnp.sum(acc)


# ----------------------------- Pallas kernel -----------------------------

def _multiscale_kernel(xflat_ref, x2d_ref, t1_ref, t2_ref,
                       a1_ref, a2_ref, prow_ref, pcol_ref, out_ref, *,
                       b_real, img_h, th, tw, th2, tw2,
                       tv_w, hess_w, l1_w, use_mse, w1, w2):
  f32, bf16 = jnp.float32, jnp.bfloat16
  loss = jnp.float32(0.0)

  # ---- data terms: each scale's conv + 0.5x bilinear + centered crop is one resident
  # matrix, so the data path is a single lane-dense MXU matmul per scale. ----
  if w1 != 0.0 or w2 != 0.0:
    xb = xflat_ref[...].astype(bf16)                              # (Bt, H*W)
    if w1 != 0.0:
      y1 = jnp.dot(xb, a1_ref[...], preferred_element_type=f32)   # (Bt, th*tw)
      d1 = y1 - t1_ref[...].astype(f32)
      data1 = jnp.sum(d1 * d1) if use_mse else jnp.sum(jnp.abs(d1))
      loss = loss + w1 * data1 / (b_real * th * tw)
    if w2 != 0.0:
      y2 = jnp.dot(xb, a2_ref[...], preferred_element_type=f32)   # (Bt, th2*tw2)
      d2 = y2 - t2_ref[...].astype(f32)
      data2 = jnp.sum(d2 * d2) if use_mse else jnp.sum(jnp.abs(d2))
      loss = loss + w2 * data2 / (b_real * th2 * tw2)

  # ---- regularizers (f32 VPU math; one fused reduction per scale) ----
  if tv_w > 0.0 or hess_w > 0.0 or l1_w > 0.0:
    x2 = x2d_ref[...]                                             # (Bt*H, W)
    if w1 != 0.0:
      loss = loss + w1 * _reg_sum(x2.astype(f32), img_h, b_real, tv_w, hess_w, l1_w)
    if w2 != 0.0:
      # pooled prediction == bilinear 0.5x of y_pred (what the 0.5-scale loss regularizes)
      xh = jnp.dot(jnp.dot(prow_ref[...], x2.astype(bf16),
                           preferred_element_type=f32).astype(bf16),
                   pcol_ref[...], preferred_element_type=f32)     # (Bt*H/2, W/2)
      loss = loss + w2 * _reg_sum(xh, img_h // 2, b_real, tv_w, hess_w, l1_w)

  out_ref[0, 0] = loss


# ----------------------------- wrapper -----------------------------

def multiscale_loss_pallas(y_pred, y_true, psf, scales=(1.0, 0.5), weights=(1.0, 0.5),
                           tv_weight=0.0, hessian_weight=0.02, l1_weight=0.0,
                           use_mse=False, insert_xy=16, images_per_step=8):
  """MultiScaleLoss(psf, scales, weights, config).forward(y_pred, y_true) -- C == 1."""
  assert y_pred.ndim == 4 and y_true.ndim == 4 and psf.shape[:2] == (1, 1)
  assert y_pred.shape[1] == 1 and y_true.shape[1] == 1
  if any(float(s) not in (1.0, 0.5) for s in scales):
    # TODO(synk): arbitrary bilinear scale factors (non-integer stride resampling).
    raise NotImplementedError("only scales {1.0, 0.5} are supported")
  w1 = sum(float(w) for s, w in zip(scales, weights) if float(s) == 1.0)
  w2 = sum(float(w) for s, w in zip(scales, weights) if float(s) == 0.5)

  B, _, H, W = y_pred.shape
  _, _, th, tw = y_true.shape
  psf_np = np.asarray(jax.device_get(psf), dtype=np.float32)[0, 0]   # PSF is a fixed buffer
  kh, kw = psf_np.shape
  # bilinear 0.5x == 2x2 average pooling only for even extents.
  assert H % 2 == 0 and W % 2 == 0 and th % 2 == 0 and tw % 2 == 0
  assert kh >= 2 and kw >= 2
  H2, W2, th2, tw2 = H // 2, W // 2, th // 2, tw // 2

  Bt = max(1, min(int(images_per_step), B))     # images per grid step
  G = -(-B // Bt)                               # grid length
  B_pad = G * Bt

  A1, A2, prow, pcol = _build_constants(psf_np.tobytes(), psf_np.shape,
                                        int(H), int(W), int(th), int(tw),
                                        int(Bt), int(insert_xy))

  # Free (metadata-only) reshapes: no [:, 0] slice or full-batch dtype copy.
  x_flat = y_pred.reshape(B, H * W)
  t1 = y_true.reshape(B, th * tw)
  t2 = y_true.reshape(B, th2, 2, tw2, 2).mean(axis=(2, 4)).reshape(B, th2 * tw2)
  if B_pad != B:
    pad = ((0, B_pad - B), (0, 0))
    x_flat = jnp.pad(x_flat, pad)               # zero images contribute exactly 0
    t1 = jnp.pad(t1, pad)
    t2 = jnp.pad(t2, pad)
  x_2d = x_flat.reshape(B_pad * H, W)

  kern = functools.partial(
      _multiscale_kernel, b_real=int(B), img_h=int(H), th=int(th), tw=int(tw),
      th2=int(th2), tw2=int(tw2), tv_w=float(tv_weight), hess_w=float(hessian_weight),
      l1_w=float(l1_weight), use_mse=bool(use_mse), w1=w1, w2=w2)

  itemsize = jnp.dtype(y_pred.dtype).itemsize
  const_bytes = 2 * (A1.size + A2.size + prow.size + pcol.size)
  block_bytes = Bt * (2 * H * W + th * tw + th2 * tw2) * itemsize
  vmem_limit = int(min(max(2 * (const_bytes + 2 * block_bytes) + (4 << 20), 32 << 20),
                       56 << 20))

  partial_losses = pl.pallas_call(
      kern,
      grid=(G,),
      out_shape=jax.ShapeDtypeStruct((G, 1), jnp.float32),
      in_specs=[
          pl.BlockSpec((Bt, H * W), lambda g: (g, 0)),       # pred, flat view  (MXU path)
          pl.BlockSpec((Bt * H, W), lambda g: (g, 0)),       # pred, 2-D view   (regularizers)
          pl.BlockSpec((Bt, th * tw), lambda g: (g, 0)),     # target, flat
          pl.BlockSpec((Bt, th2 * tw2), lambda g: (g, 0)),   # pooled target, flat
          pl.BlockSpec(A1.shape, lambda g: (0, 0)),          # resident bf16 constants
          pl.BlockSpec(A2.shape, lambda g: (0, 0)),
          pl.BlockSpec(prow.shape, lambda g: (0, 0)),
          pl.BlockSpec(pcol.shape, lambda g: (0, 0)),
      ],
      out_specs=pl.BlockSpec((1, 1), lambda g: (g, 0),
                             memory_space=pltpu.MemorySpace.SMEM),
      compiler_params=pltpu.CompilerParams(
          dimension_semantics=("parallel",),                 # v7x: grid steps split across TCs
          vmem_limit_bytes=vmem_limit),
  )(x_flat, x_2d, t1, t2, A1, A2, prow, pcol)
  return jnp.sum(partial_losses)


# ----------------------------- plain-JAX reference (sanity check) -----------------------------

def _conv_same_ref(x, k):
  kh, kw = k.shape
  ph, pw = (kh - 1) // 2, (kw - 1) // 2
  xp = jnp.pad(x, ((0, 0), (ph, kh - 1 - ph), (pw, kw - 1 - pw)))
  B, H, W = x.shape
  out = jnp.zeros_like(x)
  for i in range(kh):
    for j in range(kw):
      out = out + k[i, j] * xp[:, i:i + H, j:j + W]
  return out


def _pool2_ref(x):
  B, H, W = x.shape
  return x.reshape(B, H // 2, 2, W // 2, 2).mean(axis=(2, 4))


def _hessian_ref(p):
  yd = p[:, :-1, :] - p[:, 1:, :]
  xd = p[:, :, :-1] - p[:, :, 1:]
  xx = xd[:, :, :-1] - xd[:, :, 1:]
  yy = yd[:, :-1, :] - yd[:, 1:, :]
  xy = yd[:, :, :-1] - yd[:, :, 1:]
  yx = xd[:, :-1, :] - xd[:, 1:, :]
  return jnp.mean(xx ** 2) + jnp.mean(yy ** 2) + jnp.mean(xy ** 2) + jnp.mean(yx ** 2)


def multiscale_loss_ref(y_pred, y_true, psf, hessian_weight=0.02):
  pred, true, k = y_pred[:, 0], y_true[:, 0], psf[0, 0]

  def branch(p, t, kk, upsample):
    conv = _conv_same_ref(p, kk)
    if upsample:
      conv = _pool2_ref(conv)
    th_, tw_ = t.shape[1], t.shape[2]
    r0 = (conv.shape[1] - th_) // 2
    c0 = (conv.shape[2] - tw_) // 2
    crop = conv[:, r0:r0 + th_, c0:c0 + tw_]
    return jnp.mean(jnp.abs(crop - t)) + hessian_weight * _hessian_ref(p)

  ks = jnp.asarray(_bilinear_half_np(np.asarray(jax.device_get(psf), np.float32)[0, 0]))
  ks = ks / jnp.sum(ks)
  return 1.0 * branch(pred, true, k, True) + \
         0.5 * branch(_pool2_ref(pred), _pool2_ref(true), ks, False)


# ----------------------------- demo -----------------------------

if __name__ == "__main__":
  key = jax.random.PRNGKey(0)
  k1, k2, k3, k4 = jax.random.split(key, 4)

  B, C = 2, 1
  H = W = 64           # network output (upsampled + padded)
  th = tw = 16         # ground-truth spatial size
  y_pred = jax.random.normal(k1, (B, C, H, W), dtype=jnp.float32)
  y_true = jax.random.normal(k2, (B, C, th, tw), dtype=jnp.float32)

  # Deterministic Gaussian PSF, shape (1, 1, 7, 7), normalized to sum 1.
  kh = kw = 7
  gy, gx = jnp.meshgrid(jnp.arange(kh) - kh // 2, jnp.arange(kw) - kw // 2, indexing="ij")
  psf = jnp.exp(-(gx.astype(jnp.float32) ** 2 + gy.astype(jnp.float32) ** 2) / (2.0 * 1.5 ** 2))
  psf = (psf / jnp.sum(psf))[None, None]

  loss = jax.block_until_ready(multiscale_loss_pallas(y_pred, y_true, psf))
  ref = jax.block_until_ready(multiscale_loss_ref(y_pred, y_true, psf))
  assert abs(float(loss) - float(ref)) <= 1.5e-2 * (1.0 + abs(float(ref))), (float(loss), float(ref))

  # Odd batch: exercises batch zero-padding and a multi-step "parallel" grid.
  y_pred3 = jax.random.normal(k3, (3, C, H, W), dtype=jnp.float32)
  y_true3 = jax.random.normal(k4, (3, C, th, tw), dtype=jnp.float32)
  loss3 = jax.block_until_ready(
      multiscale_loss_pallas(y_pred3, y_true3, psf, images_per_step=2))
  ref3 = jax.block_until_ready(multiscale_loss_ref(y_pred3, y_true3, psf))
  assert abs(float(loss3) - float(ref3)) <= 1.5e-2 * (1.0 + abs(float(ref3))), (float(loss3), float(ref3))

  print("KERNEL_OK")
</pallas_src>

<mosaic_0001>
module attributes {stable_mosaic.version = 11 : i64} {
  func.func @_multiscale_kernel(%arg0: i32, %arg1: memref<2x4096xf32, #tpu.memory_space<vmem>>, %arg2: memref<128x64xf32, #tpu.memory_space<vmem>>, %arg3: memref<2x256xf32, #tpu.memory_space<vmem>>, %arg4: memref<2x64xf32, #tpu.memory_space<vmem>>, %arg5: memref<4096x256xbf16, #tpu.memory_space<vmem>>, %arg6: memref<4096x64xbf16, #tpu.memory_space<vmem>>, %arg7: memref<64x128xbf16, #tpu.memory_space<vmem>>, %arg8: memref<64x32xbf16, #tpu.memory_space<vmem>>, %arg9: memref<1x1xf32, #tpu.memory_space<smem>>) attributes {dimension_semantics = [#tpu.dimension_semantics<parallel>], iteration_bounds = array<i64: 1>, scalar_prefetch = 0 : i64, scratch_operands = 0 : i64, tpu.core_type = #tpu.core_type<tc>, window_params = [{transform_indices = @transform_0, window_bounds = array<i64: 2, 4096>}, {transform_indices = @transform_1, window_bounds = array<i64: 128, 64>}, {transform_indices = @transform_2, window_bounds = array<i64: 2, 256>}, {transform_indices = @transform_3, window_bounds = array<i64: 2, 64>}, {pipeline_mode = #tpu.pipeline_mode<synchronous>, transform_indices = @transform_4, window_bounds = array<i64: 4096, 256>}, {pipeline_mode = #tpu.pipeline_mode<synchronous>, transform_indices = @transform_5, window_bounds = array<i64: 4096, 64>}, {pipeline_mode = #tpu.pipeline_mode<synchronous>, transform_indices = @transform_6, window_bounds = array<i64: 64, 128>}, {pipeline_mode = #tpu.pipeline_mode<synchronous>, transform_indices = @transform_7, window_bounds = array<i64: 64, 32>}, {transform_indices = @transform_8, window_bounds = array<i64: 1, 1>}]} {
    %c0 = arith.constant 0 : index
    %c0_0 = arith.constant 0 : index
    %0 = vector.load %arg1[%c0, %c0_0] : memref<2x4096xf32, #tpu.memory_space<vmem>>, vector<2x4096xf32>
    %1 = arith.truncf %0 : vector<2x4096xf32> to vector<2x4096xbf16>
    %c0_1 = arith.constant 0 : index
    %c0_2 = arith.constant 0 : index
    %2 = vector.load %arg5[%c0_1, %c0_2] : memref<4096x256xbf16, #tpu.memory_space<vmem>>, vector<4096x256xbf16>
    %cst = arith.constant dense<0.000000e+00> : vector<2x256xf32>
    %3 = tpu.matmul %1, %2, %cst {dimension_numbers = #tpu.dot_dimension_numbers<[1], [0], [0], [1], [0, 0, 1, 1], [], []>} : vector<2x4096xbf16>, vector<4096x256xbf16>, vector<2x256xf32> -> vector<2x256xf32>
    %c0_3 = arith.constant 0 : index
    %c0_4 = arith.constant 0 : index
    %4 = vector.load %arg3[%c0_3, %c0_4] : memref<2x256xf32, #tpu.memory_space<vmem>>, vector<2x256xf32>
    %5 = arith.subf %3, %4 : vector<2x256xf32>
    %6 = math.absf %5 : vector<2x256xf32>
    %7 = vector.shape_cast %6 : vector<2x256xf32> to vector<1x2x256xf32>
    %cst_5 = arith.constant dense<0.000000e+00> : vector<1xf32>
    %8 = vector.multi_reduction <add>, %7, %cst_5 [1, 2] : vector<1x2x256xf32> to vector<1xf32>
    %9 = vector.shape_cast %8 : vector<1xf32> to vector<1x1x1xf32>
    %10 = vector.extract %9[0, 0, 0] : f32 from vector<1x1x1xf32>
    %cst_6 = arith.constant 1.000000e+00 : f32
    %11 = arith.mulf %cst_6, %10 : f32
    %cst_7 = arith.constant 5.120000e+02 : f32
    %12 = arith.divf %11, %cst_7 : f32
    %cst_8 = arith.constant 0.000000e+00 : f32
    %13 = arith.addf %cst_8, %12 : f32
    %c0_9 = arith.constant 0 : index
    %c0_10 = arith.constant 0 : index
    %14 = vector.load %arg6[%c0_9, %c0_10] : memref<4096x64xbf16, #tpu.memory_space<vmem>>, vector<4096x64xbf16>
    %cst_11 = arith.constant dense<0.000000e+00> : vector<2x64xf32>
    %15 = tpu.matmul %1, %14, %cst_11 {dimension_numbers = #tpu.dot_dimension_numbers<[1], [0], [0], [1], [0, 0, 1, 1], [], []>} : vector<2x4096xbf16>, vector<4096x64xbf16>, vector<2x64xf32> -> vector<2x64xf32>
    %c0_12 = arith.constant 0 : index
    %c0_13 = arith.constant 0 : index
    %16 = vector.load %arg4[%c0_12, %c0_13] : memref<2x64xf32, #tpu.memory_space<vmem>>, vector<2x64xf32>
    %17 = arith.subf %15, %16 : vector<2x64xf32>
    %18 = math.absf %17 : vector<2x64xf32>
    %19 = vector.shape_cast %18 : vector<2x64xf32> to vector<1x2x64xf32>
    %cst_14 = arith.constant dense<0.000000e+00> : vector<1xf32>
    %20 = vector.multi_reduction <add>, %19, %cst_14 [1, 2] : vector<1x2x64xf32> to vector<1xf32>
    %21 = vector.shape_cast %20 : vector<1xf32> to vector<1x1x1xf32>
    %22 = vector.extract %21[0, 0, 0] : f32 from vector<1x1x1xf32>
    %cst_15 = arith.constant 5.000000e-01 : f32
    %23 = arith.mulf %cst_15, %22 : f32
    %cst_16 = arith.constant 1.280000e+02 : f32
    %24 = arith.divf %23, %cst_16 : f32
    %25 = arith.addf %13, %24 : f32
    %c0_17 = arith.constant 0 : index
    %c0_18 = arith.constant 0 : index
    %26 = vector.load %arg2[%c0_17, %c0_18] : memref<128x64xf32, #tpu.memory_space<vmem>>, vector<128x64xf32>
    %27 = tpu.iota {dimensions = array<i32: 0>} : vector<128x64xi32>
    %c64_i32 = arith.constant 64 : i32
    %c0_i32 = arith.constant 0 : i32
    %28 = arith.cmpi eq, %c64_i32, %c0_i32 : i32
    %c1_i32 = arith.constant 1 : i32
    %29 = arith.select %28, %c1_i32, %c64_i32 : i32
    %30 = vector.broadcast %29 : i32 to vector<128x64xi32>
    %31 = arith.remsi %27, %30 : vector<128x64xi32>
    %c0_i32_19 = arith.constant 0 : i32
    %32 = vector.broadcast %c0_i32_19 : i32 to vector<128x64xi32>
    %33 = arith.cmpi ne, %31, %32 : vector<128x64xi32>
    %c0_i32_20 = arith.constant 0 : i32
    %34 = vector.broadcast %c0_i32_20 : i32 to vector<128x64xi32>
    %35 = arith.cmpi slt, %31, %34 : vector<128x64xi32>
    %c0_i32_21 = arith.constant 0 : i32
    %36 = arith.cmpi slt, %29, %c0_i32_21 : i32
    %37 = vector.broadcast %36 : i1 to vector<128x64xi1>
    %38 = vector.broadcast %37 : vector<128x64xi1> to vector<128x64xi1>
    %39 = arith.xori %35, %38 : vector<128x64xi1>
    %40 = arith.andi %39, %33 : vector<128x64xi1>
    %41 = vector.broadcast %29 : i32 to vector<128x64xi32>
    %42 = arith.addi %31, %41 : vector<128x64xi32>
    %43 = arith.select %40, %42, %31 : vector<128x64xi1>, vector<128x64xi32>
    %44 = tpu.iota {dimensions = array<i32: 1>} : vector<128x64xi32>
    %cst_22 = arith.constant 0.000000e+00 : f32
    %45 = vector.broadcast %cst_22 : f32 to vector<1x64xf32>
    %cst_23 = arith.constant 0.000000e+00 : f32
    %46 = vector.broadcast %cst_23 : f32 to vector<128x1xf32>
    %cst_24 = arith.constant 0.000000e+00 : f32
    %47 = vector.broadcast %cst_24 : f32 to vector<128x64xf32>
    %48 = vector.extract_strided_slice %26 {offsets = [1, 0], sizes = [127, 64], strides = [1, 1]} : vector<128x64xf32> to vector<127x64xf32>
    %49 = tpu.concatenate %48, %45 in 0 : vector<127x64xf32>, vector<1x64xf32> -> vector<128x64xf32>
    %50 = arith.subf %26, %49 : vector<128x64xf32>
    %51 = vector.extract_strided_slice %26 {offsets = [0, 1], sizes = [128, 63], strides = [1, 1]} : vector<128x64xf32> to vector<128x63xf32>
    %52 = tpu.concatenate %51, %46 in 1 : vector<128x63xf32>, vector<128x1xf32> -> vector<128x64xf32>
    %53 = arith.subf %26, %52 : vector<128x64xf32>
    %54 = vector.extract_strided_slice %53 {offsets = [0, 1], sizes = [128, 63], strides = [1, 1]} : vector<128x64xf32> to vector<128x63xf32>
    %55 = tpu.concatenate %54, %46 in 1 : vector<128x63xf32>, vector<128x1xf32> -> vector<128x64xf32>
    %56 = arith.subf %53, %55 : vector<128x64xf32>
    %57 = vector.extract_strided_slice %50 {offsets = [1, 0], sizes = [127, 64], strides = [1, 1]} : vector<128x64xf32> to vector<127x64xf32>
    %58 = tpu.concatenate %57, %45 in 0 : vector<127x64xf32>, vector<1x64xf32> -> vector<128x64xf32>
    %59 = arith.subf %50, %58 : vector<128x64xf32>
    %60 = vector.extract_strided_slice %50 {offsets = [0, 1], sizes = [128, 63], strides = [1, 1]} : vector<128x64xf32> to vector<128x63xf32>
    %61 = tpu.concatenate %60, %46 in 1 : vector<128x63xf32>, vector<128x1xf32> -> vector<128x64xf32>
    %62 = arith.subf %50, %61 : vector<128x64xf32>
    %63 = vector.extract_strided_slice %53 {offsets = [1, 0], sizes = [127, 64], strides = [1, 1]} : vector<128x64xf32> to vector<127x64xf32>
    %64 = tpu.concatenate %63, %45 in 0 : vector<127x64xf32>, vector<1x64xf32> -> vector<128x64xf32>
    %65 = arith.subf %53, %64 : vector<128x64xf32>
    %c62_i32 = arith.constant 62 : i32
    %66 = vector.broadcast %c62_i32 : i32 to vector<128x64xi32>
    %67 = arith.cmpi slt, %44, %66 : vector<128x64xi32>
    %68 = arith.mulf %56, %56 : vector<128x64xf32>
    %cst_25 = arith.constant 0.000000e+00 : f32
    %69 = vector.broadcast %cst_25 : f32 to vector<128x64xf32>
    %70 = arith.select %67, %68, %69 : vector<128x64xi1>, vector<128x64xf32>
    %cst_26 = arith.constant 2.52016139E-6 : f32
    %71 = vector.broadcast %cst_26 : f32 to vector<128x64xf32>
    %72 = arith.mulf %71, %70 : vector<128x64xf32>
    %73 = arith.addf %47, %72 : vector<128x64xf32>
    %c62_i32_27 = arith.constant 62 : i32
    %74 = vector.broadcast %c62_i32_27 : i32 to vector<128x64xi32>
    %75 = arith.cmpi slt, %43, %74 : vector<128x64xi32>
    %76 = arith.mulf %59, %59 : vector<128x64xf32>
    %cst_28 = arith.constant 0.000000e+00 : f32
    %77 = vector.broadcast %cst_28 : f32 to vector<128x64xf32>
    %78 = arith.select %75, %76, %77 : vector<128x64xi1>, vector<128x64xf32>
    %cst_29 = arith.constant 2.52016139E-6 : f32
    %79 = vector.broadcast %cst_29 : f32 to vector<128x64xf32>
    %80 = arith.mulf %79, %78 : vector<128x64xf32>
    %81 = arith.addf %73, %80 : vector<128x64xf32>
    %c63_i32 = arith.constant 63 : i32
    %82 = vector.broadcast %c63_i32 : i32 to vector<128x64xi32>
    %83 = arith.cmpi slt, %43, %82 : vector<128x64xi32>
    %c63_i32_30 = arith.constant 63 : i32
    %84 = vector.broadcast %c63_i32_30 : i32 to vector<128x64xi32>
    %85 = arith.cmpi slt, %44, %84 : vector<128x64xi32>
    %86 = arith.andi %83, %85 : vector<128x64xi1>
    %87 = arith.mulf %62, %62 : vector<128x64xf32>
    %88 = arith.mulf %65, %65 : vector<128x64xf32>
    %89 = arith.addf %87, %88 : vector<128x64xf32>
    %cst_31 = arith.constant 0.000000e+00 : f32
    %90 = vector.broadcast %cst_31 : f32 to vector<128x64xf32>
    %91 = arith.select %86, %89, %90 : vector<128x64xi1>, vector<128x64xf32>
    %cst_32 = arith.constant 2.51952633E-6 : f32
    %92 = vector.broadcast %cst_32 : f32 to vector<128x64xf32>
    %93 = arith.mulf %92, %91 : vector<128x64xf32>
    %94 = arith.addf %81, %93 : vector<128x64xf32>
    %95 = vector.shape_cast %94 : vector<128x64xf32> to vector<1x128x64xf32>
    %cst_33 = arith.constant dense<0.000000e+00> : vector<1xf32>
    %96 = vector.multi_reduction <add>, %95, %cst_33 [1, 2] : vector<1x128x64xf32> to vector<1xf32>
    %97 = vector.shape_cast %96 : vector<1xf32> to vector<1x1x1xf32>
    %98 = vector.extract %97[0, 0, 0] : f32 from vector<1x1x1xf32>
    %cst_34 = arith.constant 1.000000e+00 : f32
    %99 = arith.mulf %cst_34, %98 : f32
    %100 = arith.addf %25, %99 : f32
    %c0_35 = arith.constant 0 : index
    %c0_36 = arith.constant 0 : index
    %101 = vector.load %arg7[%c0_35, %c0_36] : memref<64x128xbf16, #tpu.memory_space<vmem>>, vector<64x128xbf16>
    %102 = arith.truncf %26 : vector<128x64xf32> to vector<128x64xbf16>
    %cst_37 = arith.constant dense<0.000000e+00> : vector<64x64xf32>
    %103 = tpu.matmul %101, %102, %cst_37 {dimension_numbers = #tpu.dot_dimension_numbers<[1], [0], [0], [1], [0, 0, 1, 1], [], []>} : vector<64x128xbf16>, vector<128x64xbf16>, vector<64x64xf32> -> vector<64x64xf32>
    %104 = arith.truncf %103 : vector<64x64xf32> to vector<64x64xbf16>
    %c0_38 = arith.constant 0 : index
    %c0_39 = arith.constant 0 : index
    %105 = vector.load %arg8[%c0_38, %c0_39] : memref<64x32xbf16, #tpu.memory_space<vmem>>, vector<64x32xbf16>
    %cst_40 = arith.constant dense<0.000000e+00> : vector<64x32xf32>
    %106 = tpu.matmul %104, %105, %cst_40 {dimension_numbers = #tpu.dot_dimension_numbers<[1], [0], [0], [1], [0, 0, 1, 1], [], []>} : vector<64x64xbf16>, vector<64x32xbf16>, vector<64x32xf32> -> vector<64x32xf32>
    %107 = tpu.iota {dimensions = array<i32: 0>} : vector<64x32xi32>
    %c32_i32 = arith.constant 32 : i32
    %c0_i32_41 = arith.constant 0 : i32
    %108 = arith.cmpi eq, %c32_i32, %c0_i32_41 : i32
    %c1_i32_42 = arith.constant 1 : i32
    %109 = arith.select %108, %c1_i32_42, %c32_i32 : i32
    %110 = vector.broadcast %109 : i32 to vector<64x32xi32>
    %111 = arith.remsi %107, %110 : vector<64x32xi32>
    %c0_i32_43 = arith.constant 0 : i32
    %112 = vector.broadcast %c0_i32_43 : i32 to vector<64x32xi32>
    %113 = arith.cmpi ne, %111, %112 : vector<64x32xi32>
    %c0_i32_44 = arith.constant 0 : i32
    %114 = vector.broadcast %c0_i32_44 : i32 to vector<64x32xi32>
    %115 = arith.cmpi slt, %111, %114 : vector<64x32xi32>
    %c0_i32_45 = arith.constant 0 : i32
    %116 = arith.cmpi slt, %109, %c0_i32_45 : i32
    %117 = vector.broadcast %116 : i1 to vector<64x32xi1>
    %118 = vector.broadcast %117 : vector<64x32xi1> to vector<64x32xi1>
    %119 = arith.xori %115, %118 : vector<64x32xi1>
    %120 = arith.andi %119, %113 : vector<64x32xi1>
    %121 = vector.broadcast %109 : i32 to vector<64x32xi32>
    %122 = arith.addi %111, %121 : vector<64x32xi32>
    %123 = arith.select %120, %122, %111 : vector<64x32xi1>, vector<64x32xi32>
    %124 = tpu.iota {dimensions = array<i32: 1>} : vector<64x32xi32>
    %cst_46 = arith.constant 0.000000e+00 : f32
    %125 = vector.broadcast %cst_46 : f32 to vector<1x32xf32>
    %cst_47 = arith.constant 0.000000e+00 : f32
    %126 = vector.broadcast %cst_47 : f32 to vector<64x1xf32>
    %cst_48 = arith.constant 0.000000e+00 : f32
    %127 = vector.broadcast %cst_48 : f32 to vector<64x32xf32>
    %128 = vector.extract_strided_slice %106 {offsets = [1, 0], sizes = [63, 32], strides = [1, 1]} : vector<64x32xf32> to vector<63x32xf32>
    %129 = tpu.concatenate %128, %125 in 0 : vector<63x32xf32>, vector<1x32xf32> -> vector<64x32xf32>
    %130 = arith.subf %106, %129 : vector<64x32xf32>
    %131 = vector.extract_strided_slice %106 {offsets = [0, 1], sizes = [64, 31], strides = [1, 1]} : vector<64x32xf32> to vector<64x31xf32>
    %132 = tpu.concatenate %131, %126 in 1 : vector<64x31xf32>, vector<64x1xf32> -> vector<64x32xf32>
    %133 = arith.subf %106, %132 : vector<64x32xf32>
    %134 = vector.extract_strided_slice %133 {offsets = [0, 1], sizes = [64, 31], strides = [1, 1]} : vector<64x32xf32> to vector<64x31xf32>
    %135 = tpu.concatenate %134, %126 in 1 : vector<64x31xf32>, vector<64x1xf32> -> vector<64x32xf32>
    %136 = arith.subf %133, %135 : vector<64x32xf32>
    %137 = vector.extract_strided_slice %130 {offsets = [1, 0], sizes = [63, 32], strides = [1, 1]} : vector<64x32xf32> to vector<63x32xf32>
    %138 = tpu.concatenate %137, %125 in 0 : vector<63x32xf32>, vector<1x32xf32> -> vector<64x32xf32>
    %139 = arith.subf %130, %138 : vector<64x32xf32>
    %140 = vector.extract_strided_slice %130 {offsets = [0, 1], sizes = [64, 31], strides = [1, 1]} : vector<64x32xf32> to vector<64x31xf32>
    %141 = tpu.concatenate %140, %126 in 1 : vector<64x31xf32>, vector<64x1xf32> -> vector<64x32xf32>
    %142 = arith.subf %130, %141 : vector<64x32xf32>
    %143 = vector.extract_strided_slice %133 {offsets = [1, 0], sizes = [63, 32], strides = [1, 1]} : vector<64x32xf32> to vector<63x32xf32>
    %144 = tpu.concatenate %143, %125 in 0 : vector<63x32xf32>, vector<1x32xf32> -> vector<64x32xf32>
    %145 = arith.subf %133, %144 : vector<64x32xf32>
    %c30_i32 = arith.constant 30 : i32
    %146 = vector.broadcast %c30_i32 : i32 to vector<64x32xi32>
    %147 = arith.cmpi slt, %124, %146 : vector<64x32xi32>
    %148 = arith.mulf %136, %136 : vector<64x32xf32>
    %cst_49 = arith.constant 0.000000e+00 : f32
    %149 = vector.broadcast %cst_49 : f32 to vector<64x32xf32>
    %150 = arith.select %147, %148, %149 : vector<64x32xi1>, vector<64x32xf32>
    %cst_50 = arith.constant 1.04166666E-5 : f32
    %151 = vector.broadcast %cst_50 : f32 to vector<64x32xf32>
    %152 = arith.mulf %151, %150 : vector<64x32xf32>
    %153 = arith.addf %127, %152 : vector<64x32xf32>
    %c30_i32_51 = arith.constant 30 : i32
    %154 = vector.broadcast %c30_i32_51 : i32 to vector<64x32xi32>
    %155 = arith.cmpi slt, %123, %154 : vector<64x32xi32>
    %156 = arith.mulf %139, %139 : vector<64x32xf32>
    %cst_52 = arith.constant 0.000000e+00 : f32
    %157 = vector.broadcast %cst_52 : f32 to vector<64x32xf32>
    %158 = arith.select %155, %156, %157 : vector<64x32xi1>, vector<64x32xf32>
    %cst_53 = arith.constant 1.04166666E-5 : f32
    %159 = vector.broadcast %cst_53 : f32 to vector<64x32xf32>
    %160 = arith.mulf %159, %158 : vector<64x32xf32>
    %161 = arith.addf %153, %160 : vector<64x32xf32>
    %c31_i32 = arith.constant 31 : i32
    %162 = vector.broadcast %c31_i32 : i32 to vector<64x32xi32>
    %163 = arith.cmpi slt, %123, %162 : vector<64x32xi32>
    %c31_i32_54 = arith.constant 31 : i32
    %164 = vector.broadcast %c31_i32_54 : i32 to vector<64x32xi32>
    %165 = arith.cmpi slt, %124, %164 : vector<64x32xi32>
    %166 = arith.andi %163, %165 : vector<64x32xi1>
    %167 = arith.mulf %142, %142 : vector<64x32xf32>
    %168 = arith.mulf %145, %145 : vector<64x32xf32>
    %169 = arith.addf %167, %168 : vector<64x32xf32>
    %cst_55 = arith.constant 0.000000e+00 : f32
    %170 = vector.broadcast %cst_55 : f32 to vector<64x32xf32>
    %171 = arith.select %166, %169, %170 : vector<64x32xi1>, vector<64x32xf32>
    %cst_56 = arith.constant 1.04058272E-5 : f32
    %172 = vector.broadcast %cst_56 : f32 to vector<64x32xf32>
    %173 = arith.mulf %172, %171 : vector<64x32xf32>
    %174 = arith.addf %161, %173 : vector<64x32xf32>
    %175 = vector.shape_cast %174 : vector<64x32xf32> to vector<1x64x32xf32>
    %cst_57 = arith.constant dense<0.000000e+00> : vector<1xf32>
    %176 = vector.multi_reduction <add>, %175, %cst_57 [1, 2] : vector<1x64x32xf32> to vector<1xf32>
    %177 = vector.shape_cast %176 : vector<1xf32> to vector<1x1x1xf32>
    %178 = vector.extract %177[0, 0, 0] : f32 from vector<1x1x1xf32>
    %cst_58 = arith.constant 5.000000e-01 : f32
    %179 = arith.mulf %cst_58, %178 : f32
    %180 = arith.addf %100, %179 : f32
    %c0_59 = arith.constant 0 : index
    %c0_60 = arith.constant 0 : index
    %181 = memref.load %arg9[%c0_59, %c0_60] : memref<1x1xf32, #tpu.memory_space<smem>>
    memref.store %180, %arg9[%c0_59, %c0_60] : memref<1x1xf32, #tpu.memory_space<smem>>
    return
  }
  func.func @transform_0(%arg0: i32) -> (i32, i32) {
    %c0_i32 = arith.constant 0 : i32
    %c0_i32_0 = arith.constant 0 : i32
    return %arg0, %c0_i32 : i32, i32
  }
  func.func @transform_1(%arg0: i32) -> (i32, i32) {
    %c0_i32 = arith.constant 0 : i32
    %c0_i32_0 = arith.constant 0 : i32
    return %arg0, %c0_i32 : i32, i32
  }
  func.func @transform_2(%arg0: i32) -> (i32, i32) {
    %c0_i32 = arith.constant 0 : i32
    %c0_i32_0 = arith.constant 0 : i32
    return %arg0, %c0_i32 : i32, i32
  }
  func.func @transform_3(%arg0: i32) -> (i32, i32) {
    %c0_i32 = arith.constant 0 : i32
    %c0_i32_0 = arith.constant 0 : i32
    return %arg0, %c0_i32 : i32, i32
  }
  func.func @transform_4(%arg0: i32) -> (i32, i32) {
    %c0_i32 = arith.constant 0 : i32
    %c0_i32_0 = arith.constant 0 : i32
    %c0_i32_1 = arith.constant 0 : i32
    return %c0_i32, %c0_i32_0 : i32, i32
  }
  func.func @transform_5(%arg0: i32) -> (i32, i32) {
    %c0_i32 = arith.constant 0 : i32
    %c0_i32_0 = arith.constant 0 : i32
    %c0_i32_1 = arith.constant 0 : i32
    return %c0_i32, %c0_i32_0 : i32, i32
  }
  func.func @transform_6(%arg0: i32) -> (i32, i32) {
    %c0_i32 = arith.constant 0 : i32
    %c0_i32_0 = arith.constant 0 : i32
    %c0_i32_1 = arith.constant 0 : i32
    return %c0_i32, %c0_i32_0 : i32, i32
  }
  func.func @transform_7(%arg0: i32) -> (i32, i32) {
    %c0_i32 = arith.constant 0 : i32
    %c0_i32_0 = arith.constant 0 : i32
    %c0_i32_1 = arith.constant 0 : i32
    return %c0_i32, %c0_i32_0 : i32, i32
  }
  func.func @transform_8(%arg0: i32) -> (i32, i32) {
    %c0_i32 = arith.constant 0 : i32
    %c0_i32_0 = arith.constant 0 : i32
    return %arg0, %c0_i32 : i32, i32
  }
}

</mosaic_0001>

<bundles_post_ra>
// kernel: tpu_custom_call.1
= control target key start
LH: loop header
LB: loop body
LE: loop exit
PB: predicated region body
PF: predicated region fallthrough
CT: control target
= control target key end

     0   :  { %13 = vsyncpa [#allocation3], 0  ;;  %s13208_s0 = inlined_call_operand.hbm [shape: f32[2,4096], index: 0, kind: input, shape index: {}]   ;;  %s13209_s1 = inlined_call_operand.vmem [shape: f32[128,64], index: 1, kind: input, shape index: {}]   ;;  %s13210_s2 = inlined_call_operand.hbm [shape: f32[2,256], index: 2, kind: input, shape index: {}]   ;;  %s13211_s3 = inlined_call_operand.hbm [shape: f32[2,64], index: 3, kind: input, shape index: {}]   ;;  %s13212_s4 = inlined_call_operand.hbm [shape: bf16[4096,256], index: 4, kind: input, shape index: {}]   ;;  %s13213_s5 = inlined_call_operand.vmem [shape: bf16[4096,64], index: 5, kind: input, shape index: {}]   ;;  %s13214_s6 = inlined_call_operand.hbm [shape: bf16[64,128], index: 6, kind: input, shape index: {}]   ;;  %s13215_s7 = inlined_call_operand.vmem [shape: bf16[64,32], index: 7, kind: input, shape index: {}]   ;;  %s13216_s8 = inlined_call_operand.hbm [shape: f32[1,1], index: 8, kind: output, shape index: {}]  }
   0x1   :  { %14 = vsyncpa [#allocation6], 0 }
   0x2   :  { %15 = vsyncpa [#allocation9], 0 }
   0x3   :  { %16 = vsyncpa [#allocation4], 0  ;;  %s10910_s27 = smov [#allocation5]   ;;  %s10911_s29 = smov [#allocation8]  }
   0x4   :  { %s35_s28 = sshll.u32 %s10910_s27, 4  ;;  %s54_s30 = sshll.u32 %s10911_s29, 4  ;;  %s36_s28 = int_to_ptr.vmem [resolvable:$true] %s35_s28  ;;  %s55_s30 = int_to_ptr.vmem [resolvable:$true] %s54_s30 }
   0x5   :  { %s10802_s9 = scalar_lea.vmem %s36_s28, 64  ;;  %p10807_p1 = scmp.lt.s32.totalorder %s36_s28, %s36_s28 }
   0x6   :  { %p10803_p0 = scmp.ne.s32.totalorder %s36_s28, %s10802_s9  ;;  %p10808_p2 = scmp.lt.s32.totalorder %s10802_s9, %s10802_s9 }
   0x8   :  { %p10809_p3 = por %p10808_p2, %p10807_p1 }
   0xa   :  { %p10810_p4 = pnand %p10809_p3, %p10803_p0 }
   0xc   :  { %10813 = shalt.err (!%p10810_p4)
}
   0xd   :  { %38 = dma.hbm_to_vmem [thread:$0]  %s13210_s2, 64, %s36_s28, [#allocation6]  }
   0xe   :  { %s10822_s12 = scalar_lea.vmem %s55_s30, 65536  ;;  %p10827_p6 = scmp.lt.s32.totalorder %s55_s30, %s55_s30 }
   0xf   :  { %p10823_p5 = scmp.ne.s32.totalorder %s55_s30, %s10822_s12  ;;  %p10828_p7 = scmp.lt.s32.totalorder %s10822_s12, %s10822_s12 }
  0x11   :  { %p10829_p8 = por %p10828_p7, %p10827_p6 }
  0x13   :  { %p10830_p9 = pnand %p10829_p8, %p10823_p5 }
  0x15   :  { %10833 = shalt.err (!%p10830_p9)
}
  0x16   :  { %s10912_s13 = smov 128   ;;  %s10913_s14 = smov 8  }
  0x17   :  { %60 = dma.hbm_to_vmem [thread:$0]  %s13212_s4, 65536, %s55_s30, [#allocation9], %s10912_s13, %s10912_s13, %s10913_s14  }
  0x18   :  { %s10914_s17 = smov [#allocation2]   ;;  %s10915_s19 = smov [#allocation7]  }
  0x19   :  { %s23_s18 = sshll.u32 %s10914_s17, 4  ;;  %s45_s20 = sshll.u32 %s10915_s19, 4  ;;  %s24_s18 = int_to_ptr.vmem [resolvable:$true] %s23_s18  ;;  %s46_s20 = int_to_ptr.vmem [resolvable:$true] %s45_s20 }
  0x1a   :  { %s10842_s2 = scalar_lea.vmem %s24_s18, 1024  ;;  %p10847_p11 = scmp.lt.s32.totalorder %s24_s18, %s24_s18 }
  0x1b   :  { %p10843_p10 = scmp.ne.s32.totalorder %s24_s18, %s10842_s2  ;;  %p10848_p12 = scmp.lt.s32.totalorder %s10842_s2, %s10842_s2 }
  0x1d   :  { %p10849_p13 = por %p10848_p12, %p10847_p11 }
  0x1f   :  { %p10850_p0 = pnand %p10849_p13, %p10843_p10 }
  0x21   :  { %10853 = shalt.err (!%p10850_p0)
}
  0x22   :  { %26 = dma.hbm_to_vmem [thread:$0]  %s13208_s0, 1024, %s24_s18, [#allocation3]  }
  0x23   :  { %s10862_s23 = scalar_lea.vmem %s46_s20, 32  ;;  %p10867_p2 = scmp.lt.s32.totalorder %s46_s20, %s46_s20 }
  0x24   :  { %p10863_p1 = scmp.ne.s32.totalorder %s46_s20, %s10862_s23  ;;  %p10868_p3 = scmp.lt.s32.totalorder %s10862_s23, %s10862_s23 }
  0x26   :  { %p10869_p4 = por %p10868_p3, %p10867_p2 }
  0x28   :  { %p10870_p5 = pnand %p10869_p4, %p10863_p1 }
  0x2a   :  { %10873 = shalt.err (!%p10870_p5)
}
  0x2b   :  { %48 = dma.hbm_to_vmem [thread:$0]  %s13211_s3, 32, %s46_s20, [#allocation6]  }
  0x2c   :  { %s10916_s25 = smov [#allocation10]  }
  0x2d   :  { %s68_s26 = sshll.u32 %s10916_s25, 4  ;;  %s69_s26 = int_to_ptr.vmem [resolvable:$true] %s68_s26 }
  0x2e   :  { %s10882_s27 = scalar_lea.vmem %s69_s26, 512  ;;  %p10887_p7 = scmp.lt.s32.totalorder %s69_s26, %s69_s26 }
  0x2f   :  { %p10883_p6 = scmp.ne.s32.totalorder %s69_s26, %s10882_s27  ;;  %p10888_p8 = scmp.lt.s32.totalorder %s10882_s27, %s10882_s27 }
  0x31   :  { %p10889_p9 = por %p10888_p8, %p10887_p7 }
  0x33   :  { %p10890_p10 = pnand %p10889_p9, %p10883_p6 }
  0x35   :  { %10893 = shalt.err (!%p10890_p10)
}
  0x36   :  { %s10917_s0 = smov 64   ;;  %s10918_s28 = smov 4  }
  0x37   :  { %74 = dma.hbm_to_vmem [thread:$0]  %s13214_s6, 512, %s69_s26, [#allocation9], %s10917_s0, %s10917_s0, %s10918_s28  }
  0x38   :  { %10902 = dma.done.wait [#allocation3], 1024  }
  0x39   :  { %10903 = vsyncadd [#allocation3], 4294966272 }
  0x3a   :  { %10904 = dma.done.wait [#allocation6], 96  }
  0x3b   :  { %10905 = vsyncadd [#allocation6], 4294967200 }
  0x3c   :  { %10906 = dma.done.wait [#allocation9], 66048  }
  0x3d   :  { %10907 = vsyncadd [#allocation9], 4294901248  ;;  %v9753_v0 = vld [vmem:[#allocation8 + $0x74] ss:$8 sps:$4 sm:$0xff]   ;;  %v9757_v2 = vld [vmem:[#allocation8 + $0x70] ss:$8 sps:$4 sm:$0xff]   ;;  %v113_v38 = vlaneseq }
  0x3e   :  { %v9755_v1 = vld [vmem:[#allocation8 + $0x174] ss:$8 sps:$4 sm:$0xff]   ;;  %3381 = vmatprep.subr.bf16.mxu0 %v9753_v0  ;;  %v9758_v3 = vld [vmem:[#allocation8 + $0x170] ss:$8 sps:$4 sm:$0xff]   ;;  %v9759_v4 = vld [vmem:[#allocation8 + $0x64] ss:$8 sps:$4 sm:$0xff]  }
  0x3f   :  { %3422 = vmatprep.subr.bf16.mxu1 %v9755_v1  ;;  %3382 = vmatpush1.bf16.msra.mxu0 %v9757_v2  ;;  %v9761_v5 = vld [vmem:[#allocation8 + $0x164] ss:$8 sps:$4 sm:$0xff]   ;;  %v9763_v6 = vld [vmem:[#allocation8 + $0x60] ss:$8 sps:$4 sm:$0xff]   ;;  %v9765_v8 = vld [vmem:[#allocation8 + $0x54] ss:$8 sps:$4 sm:$0xff]  }
  0x40   :  { %3423 = vmatpush1.bf16.msra.mxu1 %v9758_v3  ;;  %3383 = vmatprep.subr.bf16.mxu0 %v9759_v4  ;;  %v9764_v7 = vld [vmem:[#allocation8 + $0x160] ss:$8 sps:$4 sm:$0xff]   ;;  %v9767_v9 = vld [vmem:[#allocation8 + $0x154] ss:$8 sps:$4 sm:$0xff]   ;;  %v9769_v10 = vld [vmem:[#allocation8 + $0x50] ss:$8 sps:$4 sm:$0xff]  }
  0x41   :  { %3424 = vmatprep.subr.bf16.mxu1 %v9761_v5  ;;  %v9770_v11 = vld [vmem:[#allocation8 + $0x150] ss:$8 sps:$4 sm:$0xff]   ;;  %v9771_v12 = vld [vmem:[#allocation8 + $0x44] ss:$8 sps:$4 sm:$0xff]   ;;  %v9775_v14 = vld [vmem:[#allocation8 + $0x40] ss:$8 sps:$4 sm:$0xff]  }
  0x42   :  { %v9773_v13 = vld [vmem:[#allocation8 + $0x144] ss:$8 sps:$4 sm:$0xff]   ;;  %v9776_v15 = vld [vmem:[#allocation8 + $0x140] ss:$8 sps:$4 sm:$0xff]   ;;  %v9777_v16 = vld [vmem:[#allocation8 + $0x34] ss:$8 sps:$4 sm:$0xff]  }
  0x43   :  { %3384 = vmatpush1.bf16.msra.mxu0 %v9763_v6  ;;  %v9779_v17 = vld [vmem:[#allocation8 + $0x134] ss:$8 sps:$4 sm:$0xff]   ;;  %v9781_v18 = vld [vmem:[#allocation8 + $0x30] ss:$8 sps:$4 sm:$0xff]   ;;  %v9783_v20 = vld [vmem:[#allocation8 + $0x24] ss:$8 sps:$4 sm:$0xff]  }
  0x44   :  { %3425 = vmatpush1.bf16.msra.mxu1 %v9764_v7  ;;  %3385 = vmatprep.subr.bf16.mxu0 %v9765_v8  ;;  %v9782_v19 = vld [vmem:[#allocation8 + $0x130] ss:$8 sps:$4 sm:$0xff]   ;;  %v9785_v21 = vld [vmem:[#allocation8 + $0x124] ss:$8 sps:$4 sm:$0xff]   ;;  %v9787_v22 = vld [vmem:[#allocation8 + $0x20] ss:$8 sps:$4 sm:$0xff]  }
  0x45   :  { %3426 = vmatprep.subr.bf16.mxu1 %v9767_v9  ;;  %v9788_v23 = vld [vmem:[#allocation8 + $0x120] ss:$8 sps:$4 sm:$0xff]   ;;  %v9789_v24 = vld [vmem:[#allocation8 + $0x14] ss:$8 sps:$4 sm:$0xff]   ;;  %v9793_v26 = vld [vmem:[#allocation8 + $0x10] ss:$8 sps:$4 sm:$0xff]  }
  0x46   :  { %v9791_v25 = vld [vmem:[#allocation8 + $0x114] ss:$8 sps:$4 sm:$0xff]   ;;  %v9794_v27 = vld [vmem:[#allocation8 + $0x110] ss:$8 sps:$4 sm:$0xff]   ;;  %v9795_v28 = vld [vmem:[#allocation8 + $0x4] ss:$8 sps:$4 sm:$0xff]  }
  0x47   :  { %3386 = vmatpush1.bf16.msra.mxu0 %v9769_v10  ;;  %v9797_v29 = vld [vmem:[#allocation8 + $0x104] ss:$8 sps:$4 sm:$0xff]   ;;  %v9799_v30 = vld [vmem:[#allocation8] ss:$8 sps:$4 sm:$0xff]   ;;  %v9801_v32 = vld [vmem:[#allocation8 + $0xf4] ss:$8 sps:$4 sm:$0xff]  }
  0x48   :  { %3427 = vmatpush1.bf16.msra.mxu1 %v9770_v11  ;;  %3387 = vmatprep.subr.bf16.mxu0 %v9771_v12  ;;  %v9800_v31 = vld [vmem:[#allocation8 + $0x100] ss:$8 sps:$4 sm:$0xff]   ;;  %v9803_v33 = vld [vmem:[#allocation8 + $0x1f4] ss:$8 sps:$4 sm:$0xff]   ;;  %v9805_v34 = vld [vmem:[#allocation8 + $0xf0] ss:$8 sps:$4 sm:$0xff]  }
  0x49   :  { %3428 = vmatprep.subr.bf16.mxu1 %v9773_v13  ;;  %v9806_v35 = vld [vmem:[#allocation8 + $0x1f0] ss:$8 sps:$4 sm:$0xff]   ;;  %v10919_v36 = vmov 1983009808   ;;  %v9807_v39 = vld [vmem:[#allocation8 + $0xe4] ss:$8 sps:$4 sm:$0xff]  }
  0x4a   :  { %v111_v37 = vunpack.c.l.s4 %v10919_v36  ;;  %v9809_v40 = vld [vmem:[#allocation8 + $0x1e4] ss:$8 sps:$4 sm:$0xff]   ;;  %v9811_v41 = vld [vmem:[#allocation8 + $0xe0] ss:$8 sps:$4 sm:$0xff]   ;;  %v10983_v43 = vshrl.u32 %v113_v38, 7  ;;  %vm4053_vm0 = vcmask 1041408  }
  0x4b   :  { %3388 = vmatpush1.bf16.msra.mxu0 %v9775_v14  ;;  %v9812_v44 = vld [vmem:[#allocation8 + $0x1e0] ss:$8 sps:$4 sm:$0xff]   ;;  %v9813_v45 = vld [vmem:[#allocation8 + $0xd4] ss:$8 sps:$4 sm:$0xff]   ;;  %v9817_v47 = vld [vmem:[#allocation8 + $0xd0] ss:$8 sps:$4 sm:$0xff]  }
  0x4c   :  { %3429 = vmatpush1.bf16.msra.mxu1 %v9776_v15  ;;  %3389 = vmatprep.subr.bf16.mxu0 %v9777_v16  ;;  %v112_v42 = vunpack.c.0.s8 %v111_v37  ;;  %v9815_v46 = vld [vmem:[#allocation8 + $0x1d4] ss:$8 sps:$4 sm:$0xff]   ;;  %v9818_v48 = vld [vmem:[#allocation8 + $0x1d0] ss:$8 sps:$4 sm:$0xff]   ;;  %v9819_v50 = vld [vmem:[#allocation8 + $0xc4] ss:$8 sps:$4 sm:$0xff]  }
  0x4d   :  { %3430 = vmatprep.subr.bf16.mxu1 %v9779_v17  ;;  %v9821_v51 = vld [vmem:[#allocation8 + $0x1c4] ss:$8 sps:$4 sm:$0xff]   ;;  %v93_v52 = vld [vmem:[#allocation2] sm:$0xff]  ;;  %s10920_s10 = smov 127   ;;  %vm7020_vm1 = vcmask 1046528   ;;  %vm7133_vm2 = vcmask 515072  }
  0x4e   :  { %v10986_v49 = vsub.s32 %v112_v42, %v10983_v43  ;;  %v9823_v53 = vld [vmem:[#allocation8 + $0xc0] ss:$8 sps:$4 sm:$0xff]   ;;  %v109_v55 = vcombine.high %v93_v52, %v93_v52  ;;  %v9825_v57 = vld [vmem:[#allocation8 + $0xb4] ss:$8 sps:$4 sm:$0xff]   ;;  %v9829_v61 = vld [vmem:[#allocation8 + $0xb0] ss:$8 sps:$4 sm:$0xff]  }
  0x4f   :  { %3390 = vmatpush1.bf16.msra.mxu0 %v9781_v18  ;;  %v9824_v56 = vld [vmem:[#allocation8 + $0x1c0] ss:$8 sps:$4 sm:$0xff]   ;;  %v9827_v58 = vld [vmem:[#allocation8 + $0x1b4] ss:$8 sps:$4 sm:$0xff]   ;;  %v9830_v0 = vld [vmem:[#allocation8 + $0x1b0] ss:$8 sps:$4 sm:$0xff]  }
  0x50   :  { %3431 = vmatpush1.bf16.msra.mxu1 %v9782_v19  ;;  %3391 = vmatprep.subr.bf16.mxu0 %v9783_v20  ;;  %v116_v54 = vrot.slane %v93_v52, %v10986_v49  ;;  %v123_v60 = vrot.slane %v109_v55, %v10986_v49  ;;  %v9831_v1 = vld [vmem:[#allocation8 + $0xa4] ss:$8 sps:$4 sm:$0xff]   ;;  %v9835_v4 = vld [vmem:[#allocation8 + $0xa0] ss:$8 sps:$4 sm:$0xff]   ;;  %v9837_v6 = vld [vmem:[#allocation8 + $0x94] ss:$8 sps:$4 sm:$0xff]  }
  0x51   :  { %3432 = vmatprep.subr.bf16.mxu1 %v9785_v21  ;;  %v9833_v2 = vld [vmem:[#allocation8 + $0x1a4] ss:$8 sps:$4 sm:$0xff]   ;;  %v9836_v5 = vld [vmem:[#allocation8 + $0x1a0] ss:$8 sps:$4 sm:$0xff]   ;;  %v9839_v7 = vld [vmem:[#allocation8 + $0x194] ss:$8 sps:$4 sm:$0xff]  }
  0x52   :  { %v124_v59 = vcombine.high %v116_v54, %v116_v54  ;;  %v125_v63 = vcombine.high %v123_v60, %v123_v60  ;;  %v9841_v8 = vld [vmem:[#allocation8 + $0x90] ss:$8 sps:$4 sm:$0xff]   ;;  %v9843_v10 = vld [vmem:[#allocation8 + $0x84] ss:$8 sps:$4 sm:$0xff]   ;;  %v9847_v12 = vld [vmem:[#allocation8 + $0x80] ss:$8 sps:$4 sm:$0xff]   ;;  %v10996_v16 = vpack.c.bf16 %v116_v54, %v116_v54  ;;  %v10998_v17 = vpack.c.bf16 %v123_v60, %v123_v60 }
  0x53   :  { %3392 = vmatpush1.bf16.msra.mxu0 %v9787_v22  ;;  %v9842_v9 = vld [vmem:[#allocation8 + $0x190] ss:$8 sps:$4 sm:$0xff]   ;;  %v9845_v11 = vld [vmem:[#allocation8 + $0x184] ss:$8 sps:$4 sm:$0xff]   ;;  %v9848_v13 = vld [vmem:[#allocation8 + $0x180] ss:$8 sps:$4 sm:$0xff]  }
  0x54   :  { %3433 = vmatpush1.bf16.msra.mxu1 %v9788_v23  ;;  %3393 = vmatprep.subr.bf16.mxu0 %v9789_v24  ;;  %v10990_v62 = vpack.c.bf16 %v124_v59, %v124_v59  ;;  %v10992_v3 = vpack.c.bf16 %v125_v63, %v125_v63  ;;  %v9852_v14 = vld [vmem:[#allocation8 + $0x274] ss:$8 sps:$4 sm:$0xff]   ;;  %v9850_v18 = vld [vmem:[#allocation8 + $0x270] ss:$8 sps:$4 sm:$0xff]   ;;  %v9858_v20 = vld [vmem:[#allocation8 + $0x264] ss:$8 sps:$4 sm:$0xff]  }
  0x55   :  { %3434 = vmatprep.subr.bf16.mxu1 %v9791_v25  ;;  %v9855_v15 = vld [vmem:[#allocation8 + $0x374] ss:$8 sps:$4 sm:$0xff]   ;;  %v9853_v19 = vld [vmem:[#allocation8 + $0x370] ss:$8 sps:$4 sm:$0xff]   ;;  %v9861_v21 = vld [vmem:[#allocation8 + $0x364] ss:$8 sps:$4 sm:$0xff]  }
  0x56   :  { %3413 = vmatprep.mubr.bf16.mxu0 %v10990_v62  ;;  %3454 = vmatprep.mubr.bf16.mxu1 %v10992_v3  ;;  %v9856_v22 = vld [vmem:[#allocation8 + $0x260] ss:$8 sps:$4 sm:$0xff]   ;;  %v9864_v24 = vld [vmem:[#allocation8 + $0x254] ss:$8 sps:$4 sm:$0xff]   ;;  %v9882_v36 = vld [vmem:[#allocation8 + $0x224] ss:$8 sps:$4 sm:$0xff]  }
  0x57   :  { %3394 = vmatpush1.bf16.msra.mxu0 %v9793_v26  ;;  %v9859_v23 = vld [vmem:[#allocation8 + $0x360] ss:$8 sps:$4 sm:$0xff]   ;;  %v9867_v25 = vld [vmem:[#allocation8 + $0x354] ss:$8 sps:$4 sm:$0xff]   ;;  %v9862_v26 = vld [vmem:[#allocation8 + $0x250] ss:$8 sps:$4 sm:$0xff]  }
  0x58   :  { %3435 = vmatpush1.bf16.msra.mxu1 %v9794_v27  ;;  %3395 = vmatprep.subr.bf16.mxu0 %v9795_v28  ;;  %v9865_v27 = vld [vmem:[#allocation8 + $0x350] ss:$8 sps:$4 sm:$0xff]   ;;  %v9870_v28 = vld [vmem:[#allocation8 + $0x244] ss:$8 sps:$4 sm:$0xff]   ;;  %v9891_v42 = vld [vmem:[#allocation8 + $0x314] ss:$8 sps:$4 sm:$0xff]  }
  0x59   :  { %3436 = vmatprep.subr.bf16.mxu1 %v9797_v29  ;;  %v9873_v29 = vld [vmem:[#allocation8 + $0x344] ss:$8 sps:$4 sm:$0xff]   ;;  %v9900_v59 = vld [vmem:[#allocation8 + $0x2f4] ss:$8 sps:$4 sm:$0xff]   ;;  %v9901_v63 = vld [vmem:[#allocation8 + $0x3f0] ss:$8 sps:$4 sm:$0xff]  }
  0x5a   :  { %v9885_v37 = vld [vmem:[#allocation8 + $0x324] ss:$8 sps:$4 sm:$0xff]   ;;  %v9903_v60 = vld [vmem:[#allocation8 + $0x3f4] ss:$8 sps:$4 sm:$0xff]   ;;  %vm7760_vm3 = vcmask 523264   ;;  %vm8180_vm6 = vcmask 252928  }
  0x5b   :  { %3396 = vmatpush1.bf16.msra.mxu0 %v9799_v30  ;;  %v9868_v30 = vld [vmem:[#allocation8 + $0x240] ss:$8 sps:$4 sm:$0xff]   ;;  %v9894_v52 = vld [vmem:[#allocation8 + $0x204] ss:$8 sps:$4 sm:$0xff]   ;;  %vm6761_vm7 = vcmask 517120   ;;  %s10921_s27 = smov [#allocation11]  }
  0x5c   :  { %3437 = vmatpush1.bf16.msra.mxu1 %v9800_v31  ;;  %3397 = vmatprep.subr.bf16.mxu0 %v9801_v32  ;;  %v9871_v31 = vld [vmem:[#allocation8 + $0x340] ss:$8 sps:$4 sm:$0xff]   ;;  %v9876_v32 = vld [vmem:[#allocation8 + $0x234] ss:$8 sps:$4 sm:$0xff]  }
  0x5d   :  { %3438 = vmatprep.subr.bf16.mxu1 %v9803_v33  ;;  %v9879_v33 = vld [vmem:[#allocation8 + $0x334] ss:$8 sps:$4 sm:$0xff]  }
  0x5f   :  { %3398 = vmatpush2.bf16.msra.mxu0 %v9805_v34  ;;  %v9874_v34 = vld [vmem:[#allocation8 + $0x230] ss:$8 sps:$4 sm:$0xff]  }
  0x60   :  { %3439 = vmatpush2.bf16.msra.mxu1 %v9806_v35  ;;  %3399 = vmatprep.subr.bf16.mxu0 %v9807_v39  ;;  %v9877_v35 = vld [vmem:[#allocation8 + $0x330] ss:$8 sps:$4 sm:$0xff]   ;;  %v9880_v39 = vld [vmem:[#allocation8 + $0x220] ss:$8 sps:$4 sm:$0xff]  }
  0x61   :  { %3440 = vmatprep.subr.bf16.mxu1 %v9809_v40  ;;  %v9883_v40 = vld [vmem:[#allocation8 + $0x320] ss:$8 sps:$4 sm:$0xff]  }
  0x63   :  { %3400 = vmatpush2.bf16.msra.mxu0 %v9811_v41  ;;  %v9888_v41 = vld [vmem:[#allocation8 + $0x214] ss:$8 sps:$4 sm:$0xff]  }
  0x64   :  { %3441 = vmatpush2.bf16.msra.mxu1 %v9812_v44  ;;  %3401 = vmatprep.subr.bf16.mxu0 %v9813_v45  ;;  %v94_v44 = vld [vmem:[#allocation2 + $0x8] sm:$0xff] }
  0x65   :  { %3442 = vmatprep.subr.bf16.mxu1 %v9815_v46  ;;  %v11003_v45 = vrot.slane %v94_v44, %v10986_v49  ;;  %v126_v46 = vcombine.high %v94_v44, %v94_v44  ;;  %v9953_v44 = vld [vmem:[#allocation8 + $0x460] ss:$8 sps:$4 sm:$0xff]  }
  0x67   :  { %3402 = vmatpush2.bf16.msra.mxu0 %v9817_v47  ;;  %v9886_v47 = vld [vmem:[#allocation8 + $0x210] ss:$8 sps:$4 sm:$0xff]  }
  0x68   :  { %3443 = vmatpush2.bf16.msra.mxu1 %v9818_v48  ;;  %3403 = vmatprep.subr.bf16.mxu0 %v9819_v50  ;;  %v9889_v48 = vld [vmem:[#allocation8 + $0x310] ss:$8 sps:$4 sm:$0xff]   ;;  %v141_v50 = vcombine.high %v11003_v45, %v11003_v45 }
  0x69   :  { %3444 = vmatprep.subr.bf16.mxu1 %v9821_v51  ;;  %v11008_v51 = vrot.slane %v126_v46, %v10986_v49 }
  0x6a   :  { %v11010_v54 = vpack.c.bf16 %v141_v50, %v141_v50  ;;  %v9964_v50 = vld [vmem:[#allocation8 + $0x554] ss:$8 sps:$4 sm:$0xff]  }
  0x6b   :  { %3404 = vmatpush2.bf16.msra.mxu0 %v9823_v53  ;;  %v9897_v53 = vld [vmem:[#allocation8 + $0x304] ss:$8 sps:$4 sm:$0xff]   ;;  %v142_v55 = vcombine.high %v11008_v51, %v11008_v51 }
  0x6c   :  { %3445 = vmatpush2.bf16.msra.mxu1 %v9824_v56  ;;  %3405 = vmatprep.subr.bf16.mxu0 %v9825_v57  ;;  %v9892_v56 = vld [vmem:[#allocation8 + $0x200] ss:$8 sps:$4 sm:$0xff]  }
  0x6d   :  { %3446 = vmatprep.subr.bf16.mxu1 %v9827_v58  ;;  %v9895_v57 = vld [vmem:[#allocation8 + $0x300] ss:$8 sps:$4 sm:$0xff]   ;;  %v11014_v58 = vpack.c.bf16 %v142_v55, %v142_v55 }
  0x6f   :  { %3406 = vmatpush2.bf16.msra.mxu0 %v9829_v61  ;;  %v9898_v61 = vld [vmem:[#allocation8 + $0x2f0] ss:$8 sps:$4 sm:$0xff]  }
  0x70   :  { %3447 = vmatpush2.bf16.msra.mxu1 %v9830_v0  ;;  %3407 = vmatprep.subr.bf16.mxu0 %v9831_v1  ;;  %v9906_v0 = vld [vmem:[#allocation8 + $0x2e4] ss:$8 sps:$4 sm:$0xff]  }
  0x71   :  { %3448 = vmatprep.subr.bf16.mxu1 %v9833_v2  ;;  %v9909_v1 = vld [vmem:[#allocation8 + $0x3e4] ss:$8 sps:$4 sm:$0xff]   ;;  %v9904_v2 = vld [vmem:[#allocation8 + $0x2e0] ss:$8 sps:$4 sm:$0xff]  }
  0x73   :  { %3408 = vmatpush2.bf16.msra.mxu0 %v9835_v4  ;;  %v9907_v4 = vld [vmem:[#allocation8 + $0x3e0] ss:$8 sps:$4 sm:$0xff]  }
  0x74   :  { %3449 = vmatpush2.bf16.msra.mxu1 %v9836_v5  ;;  %3409 = vmatprep.subr.bf16.mxu0 %v9837_v6  ;;  %v9912_v5 = vld [vmem:[#allocation8 + $0x2d4] ss:$8 sps:$4 sm:$0xff]  }
  0x75   :  { %3450 = vmatprep.subr.bf16.mxu1 %v9839_v7  ;;  %v9915_v6 = vld [vmem:[#allocation8 + $0x3d4] ss:$8 sps:$4 sm:$0xff]   ;;  %v9910_v7 = vld [vmem:[#allocation8 + $0x2d0] ss:$8 sps:$4 sm:$0xff]  }
  0x77   :  { %3410 = vmatpush2.bf16.msra.mxu0 %v9841_v8  ;;  %v9913_v8 = vld [vmem:[#allocation8 + $0x3d0] ss:$8 sps:$4 sm:$0xff]  }
  0x78   :  { %3451 = vmatpush2.bf16.msra.mxu1 %v9842_v9  ;;  %3411 = vmatprep.subr.bf16.mxu0 %v9843_v10  ;;  %v9918_v9 = vld [vmem:[#allocation8 + $0x2c4] ss:$8 sps:$4 sm:$0xff]  }
  0x79   :  { %3452 = vmatprep.subr.bf16.mxu1 %v9845_v11  ;;  %v9921_v10 = vld [vmem:[#allocation8 + $0x3c4] ss:$8 sps:$4 sm:$0xff]   ;;  %v9916_v11 = vld [vmem:[#allocation8 + $0x2c0] ss:$8 sps:$4 sm:$0xff]  }
  0x7b   :  { %3412 = vmatpush2.bf16.msra.mxu0 %v9847_v12  ;;  %v9919_v12 = vld [vmem:[#allocation8 + $0x3c0] ss:$8 sps:$4 sm:$0xff]  }
  0x7c   :  { %3453 = vmatpush2.bf16.msra.mxu1 %v9848_v13  ;;  %3463 = vmatprep.subr.bf16.mxu0 %v9852_v14  ;;  %v9924_v13 = vld [vmem:[#allocation8 + $0x2b4] ss:$8 sps:$4 sm:$0xff]  }
  0x7d   :  { %3504 = vmatprep.subr.bf16.mxu1 %v9855_v15  ;;  %v9927_v14 = vld [vmem:[#allocation8 + $0x3b4] ss:$8 sps:$4 sm:$0xff]   ;;  %v9922_v15 = vld [vmem:[#allocation8 + $0x2b0] ss:$8 sps:$4 sm:$0xff]  }
  0x7e   :  { %3414 = vmatmul.mubr.bf16.vlgmr.msra.gmra.mxu0 %v10996_v16 }
  0x7f   :  { %3455 = vmatmul.mubr.bf16.vlgmr.msra.gmra.mxu1 %v10998_v17  ;;  %3464 = vmatpush1.bf16.msra.mxu0 %v9850_v18  ;;  %v9925_v18 = vld [vmem:[#allocation8 + $0x3b0] ss:$8 sps:$4 sm:$0xff]  }
  0x80   :  { %3505 = vmatpush1.bf16.msra.mxu1 %v9853_v19  ;;  %3465 = vmatprep.subr.bf16.mxu0 %v9858_v20  ;;  %v9930_v19 = vld [vmem:[#allocation8 + $0x2a4] ss:$8 sps:$4 sm:$0xff]  }
  0x81   :  { %3506 = vmatprep.subr.bf16.mxu1 %v9861_v21  ;;  %3495 = vmatprep.mubr.bf16.mxu0 %v11010_v54  ;;  %v9933_v20 = vld [vmem:[#allocation8 + $0x3a4] ss:$8 sps:$4 sm:$0xff]   ;;  %v9928_v21 = vld [vmem:[#allocation8 + $0x2a0] ss:$8 sps:$4 sm:$0xff]  }
  0x82   :  { %3536 = vmatprep.mubr.bf16.mxu1 %v11014_v58 }
  0x83   :  { %3466 = vmatpush1.bf16.msra.mxu0 %v9856_v22  ;;  %v9931_v22 = vld [vmem:[#allocation8 + $0x3a0] ss:$8 sps:$4 sm:$0xff]  }
  0x84   :  { %3507 = vmatpush1.bf16.msra.mxu1 %v9859_v23  ;;  %3467 = vmatprep.subr.bf16.mxu0 %v9864_v24  ;;  %v9936_v23 = vld [vmem:[#allocation8 + $0x294] ss:$8 sps:$4 sm:$0xff]  }
  0x85   :  { %3508 = vmatprep.subr.bf16.mxu1 %v9867_v25  ;;  %v9939_v24 = vld [vmem:[#allocation8 + $0x394] ss:$8 sps:$4 sm:$0xff]   ;;  %v9934_v25 = vld [vmem:[#allocation8 + $0x290] ss:$8 sps:$4 sm:$0xff]  }
  0x87   :  { %3468 = vmatpush1.bf16.msra.mxu0 %v9862_v26  ;;  %v9937_v26 = vld [vmem:[#allocation8 + $0x390] ss:$8 sps:$4 sm:$0xff]  }
  0x88   :  { %3509 = vmatpush1.bf16.msra.mxu1 %v9865_v27  ;;  %3469 = vmatprep.subr.bf16.mxu0 %v9870_v28  ;;  %v9942_v27 = vld [vmem:[#allocation8 + $0x284] ss:$8 sps:$4 sm:$0xff]  }
  0x89   :  { %3510 = vmatprep.subr.bf16.mxu1 %v9873_v29  ;;  %v9945_v28 = vld [vmem:[#allocation8 + $0x384] ss:$8 sps:$4 sm:$0xff]   ;;  %v9940_v29 = vld [vmem:[#allocation8 + $0x280] ss:$8 sps:$4 sm:$0xff]  }
  0x8b   :  { %3470 = vmatpush1.bf16.msra.mxu0 %v9868_v30  ;;  %v9943_v30 = vld [vmem:[#allocation8 + $0x380] ss:$8 sps:$4 sm:$0xff]  }
  0x8c   :  { %3511 = vmatpush1.bf16.msra.mxu1 %v9871_v31  ;;  %3471 = vmatprep.subr.bf16.mxu0 %v9876_v32  ;;  %v9949_v31 = vld [vmem:[#allocation8 + $0x474] ss:$8 sps:$4 sm:$0xff]  }
  0x8d   :  { %3512 = vmatprep.subr.bf16.mxu1 %v9879_v33  ;;  %v9952_v32 = vld [vmem:[#allocation8 + $0x574] ss:$8 sps:$4 sm:$0xff]   ;;  %v11020_v33 = vpack.c.bf16 %v11003_v45, %v11003_v45 }
  0x8f   :  { %3472 = vmatpush1.bf16.msra.mxu0 %v9874_v34  ;;  %v9947_v34 = vld [vmem:[#allocation8 + $0x470] ss:$8 sps:$4 sm:$0xff]  }
  0x90   :  { %3513 = vmatpush1.bf16.msra.mxu1 %v9877_v35  ;;  %3473 = vmatprep.subr.bf16.mxu0 %v9882_v36  ;;  %v11024_v35 = vpack.c.bf16 %v11008_v51, %v11008_v51  ;;  %v9950_v36 = vld [vmem:[#allocation8 + $0x570] ss:$8 sps:$4 sm:$0xff]  }
  0x91   :  { %3514 = vmatprep.subr.bf16.mxu1 %v9885_v37  ;;  %v9955_v37 = vld [vmem:[#allocation8 + $0x464] ss:$8 sps:$4 sm:$0xff]  }
  0x93   :  { %3474 = vmatpush1.bf16.msra.mxu0 %v9880_v39  ;;  %v95_v39 = vld [vmem:[#allocation2 + $0x10] sm:$0xff] }
  0x94   :  { %3515 = vmatpush1.bf16.msra.mxu1 %v9883_v40  ;;  %3475 = vmatprep.subr.bf16.mxu0 %v9888_v41  ;;  %v9958_v40 = vld [vmem:[#allocation8 + $0x564] ss:$8 sps:$4 sm:$0xff]   ;;  %v11027_v41 = vrot.slane %v95_v39, %v10986_v49 }
  0x95   :  { %3516 = vmatprep.subr.bf16.mxu1 %v9891_v42  ;;  %v143_v42 = vcombine.high %v95_v39, %v95_v39  ;;  %v10019_v39 = vld [vmem:[#allocation8 + $0x4b0] ss:$8 sps:$4 sm:$0xff]  }
  0x96   :  { %v158_v45 = vcombine.high %v11027_v41, %v11027_v41 }
  0x97   :  { %3476 = vmatpush1.bf16.msra.mxu0 %v9886_v47  ;;  %v11034_v46 = vrot.slane %v143_v42, %v10986_v49  ;;  %v9956_v47 = vld [vmem:[#allocation8 + $0x560] ss:$8 sps:$4 sm:$0xff]   ;;  %v10027_v42 = vld [vmem:[#allocation8 + $0x4a4] ss:$8 sps:$4 sm:$0xff]  }
  0x98   :  { %3517 = vmatpush1.bf16.msra.mxu1 %v9889_v48  ;;  %3477 = vmatprep.subr.bf16.mxu0 %v9894_v52  ;;  %v9961_v48 = vld [vmem:[#allocation8 + $0x454] ss:$8 sps:$4 sm:$0xff]   ;;  %v11036_v51 = vpack.c.bf16 %v158_v45, %v158_v45  ;;  %v10025_v45 = vld [vmem:[#allocation8 + $0x4a0] ss:$8 sps:$4 sm:$0xff]  }
  0x99   :  { %3518 = vmatprep.subr.bf16.mxu1 %v9897_v53  ;;  %v159_v52 = vcombine.high %v11034_v46, %v11034_v46  ;;  %v9959_v53 = vld [vmem:[#allocation8 + $0x450] ss:$8 sps:$4 sm:$0xff]  }
  0x9b   :  { %3478 = vmatpush1.bf16.msra.mxu0 %v9892_v56  ;;  %v11041_v55 = vpack.c.bf16 %v159_v52, %v159_v52  ;;  %v9962_v56 = vld [vmem:[#allocation8 + $0x550] ss:$8 sps:$4 sm:$0xff]   ;;  %v10036_v52 = vld [vmem:[#allocation8 + $0x594] ss:$8 sps:$4 sm:$0xff]  }
  0x9c   :  { %3519 = vmatpush1.bf16.msra.mxu1 %v9895_v57  ;;  %3479 = vmatprep.subr.bf16.mxu0 %v9900_v59  ;;  %v9967_v57 = vld [vmem:[#allocation8 + $0x444] ss:$8 sps:$4 sm:$0xff]  }
  0x9d   :  { %3520 = vmatprep.subr.bf16.mxu1 %v9903_v60  ;;  %v9970_v59 = vld [vmem:[#allocation8 + $0x544] ss:$8 sps:$4 sm:$0xff]   ;;  %v9965_v60 = vld [vmem:[#allocation8 + $0x440] ss:$8 sps:$4 sm:$0xff]  }
  0x9f   :  { %3480 = vmatpush2.bf16.msra.mxu0 %v9898_v61  ;;  %v9968_v61 = vld [vmem:[#allocation8 + $0x540] ss:$8 sps:$4 sm:$0xff]  }
  0xa0   :  { %3521 = vmatpush2.bf16.msra.mxu1 %v9901_v63  ;;  %3481 = vmatprep.subr.bf16.mxu0 %v9906_v0  ;;  %v9973_v63 = vld [vmem:[#allocation8 + $0x434] ss:$8 sps:$4 sm:$0xff]  }
  0xa1   :  { %3522 = vmatprep.subr.bf16.mxu1 %v9909_v1  ;;  %v9976_v0 = vld [vmem:[#allocation8 + $0x534] ss:$8 sps:$4 sm:$0xff]   ;;  %v9971_v1 = vld [vmem:[#allocation8 + $0x430] ss:$8 sps:$4 sm:$0xff]  }
  0xa3   :  { %3482 = vmatpush2.bf16.msra.mxu0 %v9904_v2  ;;  %v9974_v2 = vld [vmem:[#allocation8 + $0x530] ss:$8 sps:$4 sm:$0xff]  }
  0xa4   :  { %3523 = vmatpush2.bf16.msra.mxu1 %v9907_v4  ;;  %3483 = vmatprep.subr.bf16.mxu0 %v9912_v5  ;;  %v9979_v4 = vld [vmem:[#allocation8 + $0x424] ss:$8 sps:$4 sm:$0xff]  }
  0xa5   :  { %3524 = vmatprep.subr.bf16.mxu1 %v9915_v6  ;;  %v9982_v5 = vld [vmem:[#allocation8 + $0x524] ss:$8 sps:$4 sm:$0xff]   ;;  %v9977_v6 = vld [vmem:[#allocation8 + $0x420] ss:$8 sps:$4 sm:$0xff]  }
  0xa7   :  { %3484 = vmatpush2.bf16.msra.mxu0 %v9910_v7  ;;  %v9980_v7 = vld [vmem:[#allocation8 + $0x520] ss:$8 sps:$4 sm:$0xff]  }
  0xa8   :  { %3525 = vmatpush2.bf16.msra.mxu1 %v9913_v8  ;;  %3485 = vmatprep.subr.bf16.mxu0 %v9918_v9  ;;  %v9985_v8 = vld [vmem:[#allocation8 + $0x414] ss:$8 sps:$4 sm:$0xff]  }
  0xa9   :  { %3526 = vmatprep.subr.bf16.mxu1 %v9921_v10  ;;  %v9988_v9 = vld [vmem:[#allocation8 + $0x514] ss:$8 sps:$4 sm:$0xff]   ;;  %v9983_v10 = vld [vmem:[#allocation8 + $0x410] ss:$8 sps:$4 sm:$0xff]  }
  0xab   :  { %3486 = vmatpush2.bf16.msra.mxu0 %v9916_v11  ;;  %v9986_v11 = vld [vmem:[#allocation8 + $0x510] ss:$8 sps:$4 sm:$0xff]  }
  0xac   :  { %3527 = vmatpush2.bf16.msra.mxu1 %v9919_v12  ;;  %3487 = vmatprep.subr.bf16.mxu0 %v9924_v13  ;;  %v9991_v12 = vld [vmem:[#allocation8 + $0x404] ss:$8 sps:$4 sm:$0xff]  }
  0xad   :  { %3528 = vmatprep.subr.bf16.mxu1 %v9927_v14  ;;  %v9994_v13 = vld [vmem:[#allocation8 + $0x504] ss:$8 sps:$4 sm:$0xff]   ;;  %v9989_v14 = vld [vmem:[#allocation8 + $0x400] ss:$8 sps:$4 sm:$0xff]  }
  0xaf   :  { %3488 = vmatpush2.bf16.msra.mxu0 %v9922_v15  ;;  %v9992_v15 = vld [vmem:[#allocation8 + $0x500] ss:$8 sps:$4 sm:$0xff]  }
  0xb0   :  { %3529 = vmatpush2.bf16.msra.mxu1 %v9925_v18  ;;  %3489 = vmatprep.subr.bf16.mxu0 %v9930_v19  ;;  %v9997_v18 = vld [vmem:[#allocation8 + $0x4f4] ss:$8 sps:$4 sm:$0xff]  }
  0xb1   :  { %3530 = vmatprep.subr.bf16.mxu1 %v9933_v20  ;;  %v10000_v19 = vld [vmem:[#allocation8 + $0x5f4] ss:$8 sps:$4 sm:$0xff]   ;;  %v9995_v20 = vld [vmem:[#allocation8 + $0x4f0] ss:$8 sps:$4 sm:$0xff]  }
  0xb3   :  { %3490 = vmatpush2.bf16.msra.mxu0 %v9928_v21  ;;  %v9998_v21 = vld [vmem:[#allocation8 + $0x5f0] ss:$8 sps:$4 sm:$0xff]  }
  0xb4   :  { %3531 = vmatpush2.bf16.msra.mxu1 %v9931_v22  ;;  %3491 = vmatprep.subr.bf16.mxu0 %v9936_v23  ;;  %v10003_v22 = vld [vmem:[#allocation8 + $0x4e4] ss:$8 sps:$4 sm:$0xff]  }
  0xb5   :  { %3532 = vmatprep.subr.bf16.mxu1 %v9939_v24  ;;  %v10006_v23 = vld [vmem:[#allocation8 + $0x5e4] ss:$8 sps:$4 sm:$0xff]   ;;  %v10001_v24 = vld [vmem:[#allocation8 + $0x4e0] ss:$8 sps:$4 sm:$0xff]  }
  0xb7   :  { %3492 = vmatpush2.bf16.msra.mxu0 %v9934_v25  ;;  %v10004_v25 = vld [vmem:[#allocation8 + $0x5e0] ss:$8 sps:$4 sm:$0xff]  }
  0xb8   :  { %3533 = vmatpush2.bf16.msra.mxu1 %v9937_v26  ;;  %3493 = vmatprep.subr.bf16.mxu0 %v9942_v27  ;;  %v10009_v26 = vld [vmem:[#allocation8 + $0x4d4] ss:$8 sps:$4 sm:$0xff]  }
  0xb9   :  { %3534 = vmatprep.subr.bf16.mxu1 %v9945_v28  ;;  %v10012_v27 = vld [vmem:[#allocation8 + $0x5d4] ss:$8 sps:$4 sm:$0xff]   ;;  %v10007_v28 = vld [vmem:[#allocation8 + $0x4d0] ss:$8 sps:$4 sm:$0xff]  }
  0xbb   :  { %3494 = vmatpush2.bf16.msra.mxu0 %v9940_v29  ;;  %v10010_v29 = vld [vmem:[#allocation8 + $0x5d0] ss:$8 sps:$4 sm:$0xff]  }
  0xbc   :  { %3535 = vmatpush2.bf16.msra.mxu1 %v9943_v30  ;;  %3545 = vmatprep.subr.bf16.mxu0 %v9949_v31  ;;  %v10015_v30 = vld [vmem:[#allocation8 + $0x4c4] ss:$8 sps:$4 sm:$0xff]  }
  0xbd   :  { %3586 = vmatprep.subr.bf16.mxu1 %v9952_v32  ;;  %v10018_v31 = vld [vmem:[#allocation8 + $0x5c4] ss:$8 sps:$4 sm:$0xff]   ;;  %v10013_v32 = vld [vmem:[#allocation8 + $0x4c0] ss:$8 sps:$4 sm:$0xff]  }
  0xbe   :  { %3496 = vmatmul.mubr.bf16.vlgmr.msra.gmra.mxu0 %v11020_v33 }
  0xbf   :  { %3537 = vmatmul.mubr.bf16.vlgmr.msra.gmra.mxu1 %v11024_v35  ;;  %3546 = vmatpush1.bf16.msra.mxu0 %v9947_v34  ;;  %v10016_v34 = vld [vmem:[#allocation8 + $0x5c0] ss:$8 sps:$4 sm:$0xff]  }
  0xc0   :  { %3587 = vmatpush1.bf16.msra.mxu1 %v9950_v36  ;;  %3547 = vmatprep.subr.bf16.mxu0 %v9955_v37  ;;  %v10021_v36 = vld [vmem:[#allocation8 + $0x4b4] ss:$8 sps:$4 sm:$0xff]  }
  0xc1   :  { %3588 = vmatprep.subr.bf16.mxu1 %v9958_v40  ;;  %3577 = vmatprep.mubr.bf16.mxu0 %v11036_v51  ;;  %v10024_v37 = vld [vmem:[#allocation8 + $0x5b4] ss:$8 sps:$4 sm:$0xff]   ;;  %v10022_v40 = vld [vmem:[#allocation8 + $0x5b0] ss:$8 sps:$4 sm:$0xff]  }
  0xc2   :  { %3618 = vmatprep.mubr.bf16.mxu1 %v11041_v55 }
  0xc3   :  { %3548 = vmatpush1.bf16.msra.mxu0 %v9953_v44  ;;  %v10030_v44 = vld [vmem:[#allocation8 + $0x5a4] ss:$8 sps:$4 sm:$0xff]  }
  0xc4   :  { %3589 = vmatpush1.bf16.msra.mxu1 %v9956_v47  ;;  %3549 = vmatprep.subr.bf16.mxu0 %v9961_v48  ;;  %v10028_v47 = vld [vmem:[#allocation8 + $0x5a0] ss:$8 sps:$4 sm:$0xff]   ;;  %v96_v48 = vld [vmem:[#allocation2 + $0x18] sm:$0xff] }
  0xc5   :  { %3590 = vmatprep.subr.bf16.mxu1 %v9964_v50  ;;  %v10033_v50 = vld [vmem:[#allocation8 + $0x494] ss:$8 sps:$4 sm:$0xff]  }
  0xc7   :  { %3550 = vmatpush1.bf16.msra.mxu0 %v9959_v53  ;;  %v160_v53 = vcombine.high %v96_v48, %v96_v48 }
  0xc8   :  { %3591 = vmatpush1.bf16.msra.mxu1 %v9962_v56  ;;  %3551 = vmatprep.subr.bf16.mxu0 %v9967_v57  ;;  %v10031_v56 = vld [vmem:[#allocation8 + $0x490] ss:$8 sps:$4 sm:$0xff]  }
  0xc9   :  { %3592 = vmatprep.subr.bf16.mxu1 %v9970_v59  ;;  %v10034_v57 = vld [vmem:[#allocation8 + $0x590] ss:$8 sps:$4 sm:$0xff]   ;;  %v10039_v59 = vld [vmem:[#allocation8 + $0x484] ss:$8 sps:$4 sm:$0xff]  }
  0xcb   :  { %3552 = vmatpush1.bf16.msra.mxu0 %v9965_v60  ;;  %v10042_v60 = vld [vmem:[#allocation8 + $0x584] ss:$8 sps:$4 sm:$0xff]  }
  0xcc   :  { %3593 = vmatpush1.bf16.msra.mxu1 %v9968_v61  ;;  %3553 = vmatprep.subr.bf16.mxu0 %v9973_v63  ;;  %v11045_v61 = vrot.slane %v96_v48, %v10986_v49  ;;  %v11048_v63 = vrot.slane %v160_v53, %v10986_v49  ;;  %v10097_v48 = vld [vmem:[#allocation8 + $0x7f4] ss:$8 sps:$4 sm:$0xff]   ;;  %v10100_v53 = vld [vmem:[#allocation8 + $0x6e4] ss:$8 sps:$4 sm:$0xff]  }
  0xcd   :  { %3594 = vmatprep.subr.bf16.mxu1 %v9976_v0  ;;  %v10037_v0 = vld [vmem:[#allocation8 + $0x480] ss:$8 sps:$4 sm:$0xff]  }
  0xcf   :  { %3554 = vmatpush1.bf16.msra.mxu0 %v9971_v1  ;;  %v10040_v1 = vld [vmem:[#allocation8 + $0x580] ss:$8 sps:$4 sm:$0xff]  }
  0xd0   :  { %3595 = vmatpush1.bf16.msra.mxu1 %v9974_v2  ;;  %3555 = vmatprep.subr.bf16.mxu0 %v9979_v4  ;;  %v10046_v2 = vld [vmem:[#allocation8 + $0x674] ss:$8 sps:$4 sm:$0xff]  }
  0xd1   :  { %3596 = vmatprep.subr.bf16.mxu1 %v9982_v5  ;;  %v10049_v4 = vld [vmem:[#allocation8 + $0x774] ss:$8 sps:$4 sm:$0xff]   ;;  %v175_v5 = vcombine.high %v11045_v61, %v11045_v61 }
  0xd3   :  { %3556 = vmatpush1.bf16.msra.mxu0 %v9977_v6  ;;  %v176_v6 = vcombine.high %v11048_v63, %v11048_v63 }
  0xd4   :  { %3597 = vmatpush1.bf16.msra.mxu1 %v9980_v7  ;;  %3557 = vmatprep.subr.bf16.mxu0 %v9985_v8  ;;  %v11056_v7 = vpack.c.bf16 %v11027_v41, %v11027_v41  ;;  %v10044_v8 = vld [vmem:[#allocation8 + $0x670] ss:$8 sps:$4 sm:$0xff]   ;;  %v10050_v41 = vld [vmem:[#allocation8 + $0x660] ss:$8 sps:$4 sm:$0xff]  }
  0xd5   :  { %3598 = vmatprep.subr.bf16.mxu1 %v9988_v9  ;;  %v10047_v9 = vld [vmem:[#allocation8 + $0x770] ss:$8 sps:$4 sm:$0xff]  }
  0xd7   :  { %3558 = vmatpush1.bf16.msra.mxu0 %v9983_v10  ;;  %v11060_v10 = vpack.c.bf16 %v11034_v46, %v11034_v46  ;;  %v10058_v46 = vld [vmem:[#allocation8 + $0x654] ss:$8 sps:$4 sm:$0xff]  }
  0xd8   :  { %3599 = vmatpush1.bf16.msra.mxu1 %v9986_v11  ;;  %3559 = vmatprep.subr.bf16.mxu0 %v9991_v12  ;;  %v10052_v11 = vld [vmem:[#allocation8 + $0x664] ss:$8 sps:$4 sm:$0xff]  }
  0xd9   :  { %3600 = vmatprep.subr.bf16.mxu1 %v9994_v13  ;;  %v10055_v12 = vld [vmem:[#allocation8 + $0x764] ss:$8 sps:$4 sm:$0xff]   ;;  %v11062_v13 = vpack.c.bf16 %v175_v5, %v175_v5 }
  0xda   :  { %v10115_v5 = vld [vmem:[#allocation8 + $0x7c4] ss:$8 sps:$4 sm:$0xff]  }
  0xdb   :  { %3560 = vmatpush1.bf16.msra.mxu0 %v9989_v14  ;;  %v11064_v14 = vpack.c.bf16 %v176_v6, %v176_v6  ;;  %v10110_v6 = vld [vmem:[#allocation8 + $0x6c0] ss:$8 sps:$4 sm:$0xff]  }
  0xdc   :  { %3601 = vmatpush1.bf16.msra.mxu1 %v9992_v15  ;;  %3561 = vmatprep.subr.bf16.mxu0 %v9997_v18  ;;  %v10053_v15 = vld [vmem:[#allocation8 + $0x760] ss:$8 sps:$4 sm:$0xff]   ;;  %v10061_v18 = vld [vmem:[#allocation8 + $0x754] ss:$8 sps:$4 sm:$0xff]  }
  0xdd   :  { %3602 = vmatprep.subr.bf16.mxu1 %v10000_v19  ;;  %v10056_v19 = vld [vmem:[#allocation8 + $0x650] ss:$8 sps:$4 sm:$0xff]  }
  0xdf   :  { %3562 = vmatpush2.bf16.msra.mxu0 %v9995_v20  ;;  %v10059_v20 = vld [vmem:[#allocation8 + $0x750] ss:$8 sps:$4 sm:$0xff]  }
  0xe0   :  { %3603 = vmatpush2.bf16.msra.mxu1 %v9998_v21  ;;  %3563 = vmatprep.subr.bf16.mxu0 %v10003_v22  ;;  %v10064_v21 = vld [vmem:[#allocation8 + $0x644] ss:$8 sps:$4 sm:$0xff]  }
  0xe1   :  { %3604 = vmatprep.subr.bf16.mxu1 %v10006_v23  ;;  %v10067_v22 = vld [vmem:[#allocation8 + $0x744] ss:$8 sps:$4 sm:$0xff]   ;;  %v10062_v23 = vld [vmem:[#allocation8 + $0x640] ss:$8 sps:$4 sm:$0xff]  }
  0xe3   :  { %3564 = vmatpush2.bf16.msra.mxu0 %v10001_v24  ;;  %v10065_v24 = vld [vmem:[#allocation8 + $0x740] ss:$8 sps:$4 sm:$0xff]  }
  0xe4   :  { %3605 = vmatpush2.bf16.msra.mxu1 %v10004_v25  ;;  %3565 = vmatprep.subr.bf16.mxu0 %v10009_v26  ;;  %v10070_v25 = vld [vmem:[#allocation8 + $0x634] ss:$8 sps:$4 sm:$0xff]  }
  0xe5   :  { %3606 = vmatprep.subr.bf16.mxu1 %v10012_v27  ;;  %v10073_v26 = vld [vmem:[#allocation8 + $0x734] ss:$8 sps:$4 sm:$0xff]   ;;  %v10068_v27 = vld [vmem:[#allocation8 + $0x630] ss:$8 sps:$4 sm:$0xff]  }
  0xe7   :  { %3566 = vmatpush2.bf16.msra.mxu0 %v10007_v28  ;;  %v10071_v28 = vld [vmem:[#allocation8 + $0x730] ss:$8 sps:$4 sm:$0xff]  }
  0xe8   :  { %3607 = vmatpush2.bf16.msra.mxu1 %v10010_v29  ;;  %3567 = vmatprep.subr.bf16.mxu0 %v10015_v30  ;;  %v10076_v29 = vld [vmem:[#allocation8 + $0x624] ss:$8 sps:$4 sm:$0xff]  }
  0xe9   :  { %3608 = vmatprep.subr.bf16.mxu1 %v10018_v31  ;;  %v10079_v30 = vld [vmem:[#allocation8 + $0x724] ss:$8 sps:$4 sm:$0xff]   ;;  %v10074_v31 = vld [vmem:[#allocation8 + $0x620] ss:$8 sps:$4 sm:$0xff]  }
  0xeb   :  { %3568 = vmatpush2.bf16.msra.mxu0 %v10013_v32  ;;  %v10077_v32 = vld [vmem:[#allocation8 + $0x720] ss:$8 sps:$4 sm:$0xff]  }
  0xec   :  { %3609 = vmatpush2.bf16.msra.mxu1 %v10016_v34  ;;  %3569 = vmatprep.subr.bf16.mxu0 %v10021_v36  ;;  %v10082_v34 = vld [vmem:[#allocation8 + $0x614] ss:$8 sps:$4 sm:$0xff]  }
  0xed   :  { %3610 = vmatprep.subr.bf16.mxu1 %v10024_v37  ;;  %v10085_v36 = vld [vmem:[#allocation8 + $0x714] ss:$8 sps:$4 sm:$0xff]   ;;  %v10080_v37 = vld [vmem:[#allocation8 + $0x610] ss:$8 sps:$4 sm:$0xff]  }
  0xef   :  { %3570 = vmatpush2.bf16.msra.mxu0 %v10019_v39  ;;  %v10083_v39 = vld [vmem:[#allocation8 + $0x710] ss:$8 sps:$4 sm:$0xff]  }
  0xf0   :  { %3611 = vmatpush2.bf16.msra.mxu1 %v10022_v40  ;;  %3571 = vmatprep.subr.bf16.mxu0 %v10027_v42  ;;  %v10088_v40 = vld [vmem:[#allocation8 + $0x604] ss:$8 sps:$4 sm:$0xff]  }
  0xf1   :  { %3612 = vmatprep.subr.bf16.mxu1 %v10030_v44  ;;  %v10091_v42 = vld [vmem:[#allocation8 + $0x704] ss:$8 sps:$4 sm:$0xff]   ;;  %v10086_v44 = vld [vmem:[#allocation8 + $0x600] ss:$8 sps:$4 sm:$0xff]  }
  0xf3   :  { %3572 = vmatpush2.bf16.msra.mxu0 %v10025_v45  ;;  %v10089_v45 = vld [vmem:[#allocation8 + $0x700] ss:$8 sps:$4 sm:$0xff]  }
  0xf4   :  { %3613 = vmatpush2.bf16.msra.mxu1 %v10028_v47  ;;  %3573 = vmatprep.subr.bf16.mxu0 %v10033_v50  ;;  %v10094_v47 = vld [vmem:[#allocation8 + $0x6f4] ss:$8 sps:$4 sm:$0xff]   ;;  %v10092_v50 = vld [vmem:[#allocation8 + $0x6f0] ss:$8 sps:$4 sm:$0xff]  }
  0xf5   :  { %3614 = vmatprep.subr.bf16.mxu1 %v10036_v52  ;;  %v10095_v52 = vld [vmem:[#allocation8 + $0x7f0] ss:$8 sps:$4 sm:$0xff]  }
  0xf7   :  { %3574 = vmatpush2.bf16.msra.mxu0 %v10031_v56  ;;  %v10103_v56 = vld [vmem:[#allocation8 + $0x7e4] ss:$8 sps:$4 sm:$0xff]  }
  0xf8   :  { %3615 = vmatpush2.bf16.msra.mxu1 %v10034_v57  ;;  %3575 = vmatprep.subr.bf16.mxu0 %v10039_v59  ;;  %v10098_v57 = vld [vmem:[#allocation8 + $0x6e0] ss:$8 sps:$4 sm:$0xff]  }
  0xf9   :  { %3616 = vmatprep.subr.bf16.mxu1 %v10042_v60  ;;  %v10101_v59 = vld [vmem:[#allocation8 + $0x7e0] ss:$8 sps:$4 sm:$0xff]   ;;  %v10106_v60 = vld [vmem:[#allocation8 + $0x6d4] ss:$8 sps:$4 sm:$0xff]  }
  0xfb   :  { %3576 = vmatpush2.bf16.msra.mxu0 %v10037_v0  ;;  %v10109_v0 = vld [vmem:[#allocation8 + $0x7d4] ss:$8 sps:$4 sm:$0xff]  }
  0xfc   :  { %3617 = vmatpush2.bf16.msra.mxu1 %v10040_v1  ;;  %3627 = vmatprep.subr.bf16.mxu0 %v10046_v2  ;;  %v10104_v1 = vld [vmem:[#allocation8 + $0x6d0] ss:$8 sps:$4 sm:$0xff]  }
  0xfd   :  { %3668 = vmatprep.subr.bf16.mxu1 %v10049_v4  ;;  %v10107_v2 = vld [vmem:[#allocation8 + $0x7d0] ss:$8 sps:$4 sm:$0xff]   ;;  %v10112_v4 = vld [vmem:[#allocation8 + $0x6c4] ss:$8 sps:$4 sm:$0xff]  }
  0xfe   :  { %3578 = vmatmul.mubr.bf16.vlgmr.msra.gmra.mxu0 %v11056_v7 }
  0xff   :  { %3619 = vmatmul.mubr.bf16.vlgmr.msra.gmra.mxu1 %v11060_v10  ;;  %3628 = vmatpush1.bf16.msra.mxu0 %v10044_v8  ;;  %v10113_v8 = vld [vmem:[#allocation8 + $0x7c0] ss:$8 sps:$4 sm:$0xff]  }
 0x100   :  { %3669 = vmatpush1.bf16.msra.mxu1 %v10047_v9  ;;  %3629 = vmatprep.subr.bf16.mxu0 %v10052_v11  ;;  %v10118_v9 = vld [vmem:[#allocation8 + $0x6b4] ss:$8 sps:$4 sm:$0xff]  }
 0x101   :  { %3670 = vmatprep.subr.bf16.mxu1 %v10055_v12  ;;  %3659 = vmatprep.mubr.bf16.mxu0 %v11062_v13  ;;  %v10121_v11 = vld [vmem:[#allocation8 + $0x7b4] ss:$8 sps:$4 sm:$0xff]   ;;  %v10116_v12 = vld [vmem:[#allocation8 + $0x6b0] ss:$8 sps:$4 sm:$0xff]  }
 0x102   :  { %3700 = vmatprep.mubr.bf16.mxu1 %v11064_v14 }
 0x103   :  { %3630 = vmatpush1.bf16.msra.mxu0 %v10050_v41  ;;  %v10119_v41 = vld [vmem:[#allocation8 + $0x7b0] ss:$8 sps:$4 sm:$0xff]  }
 0x104   :  { %3671 = vmatpush1.bf16.msra.mxu1 %v10053_v15  ;;  %3631 = vmatprep.subr.bf16.mxu0 %v10058_v46  ;;  %v10124_v15 = vld [vmem:[#allocation8 + $0x6a4] ss:$8 sps:$4 sm:$0xff]  }
 0x105   :  { %3672 = vmatprep.subr.bf16.mxu1 %v10061_v18  ;;  %v10127_v46 = vld [vmem:[#allocation8 + $0x7a4] ss:$8 sps:$4 sm:$0xff]   ;;  %v10122_v18 = vld [vmem:[#allocation8 + $0x6a0] ss:$8 sps:$4 sm:$0xff]  }
 0x107   :  { %3632 = vmatpush1.bf16.msra.mxu0 %v10056_v19  ;;  %v97_v19 = vld [vmem:[#allocation2 + $0x20] sm:$0xff] }
 0x108   :  { %3673 = vmatpush1.bf16.msra.mxu1 %v10059_v20  ;;  %3633 = vmatprep.subr.bf16.mxu0 %v10064_v21  ;;  %v10125_v20 = vld [vmem:[#allocation8 + $0x7a0] ss:$8 sps:$4 sm:$0xff]   ;;  %v10130_v21 = vld [vmem:[#allocation8 + $0x694] ss:$8 sps:$4 sm:$0xff]  }
 0x109   :  { %3674 = vmatprep.subr.bf16.mxu1 %v10067_v22  ;;  %v10133_v22 = vld [vmem:[#allocation8 + $0x794] ss:$8 sps:$4 sm:$0xff]  }
 0x10b   :  { %3634 = vmatpush1.bf16.msra.mxu0 %v10062_v23  ;;  %v177_v23 = vcombine.high %v97_v19, %v97_v19 }
 0x10c   :  { %3675 = vmatpush1.bf16.msra.mxu1 %v10065_v24  ;;  %3635 = vmatprep.subr.bf16.mxu0 %v10070_v25  ;;  %v10128_v24 = vld [vmem:[#allocation8 + $0x690] ss:$8 sps:$4 sm:$0xff]  }
 0x10d   :  { %3676 = vmatprep.subr.bf16.mxu1 %v10073_v26  ;;  %v10131_v25 = vld [vmem:[#allocation8 + $0x790] ss:$8 sps:$4 sm:$0xff]   ;;  %v10136_v26 = vld [vmem:[#allocation8 + $0x684] ss:$8 sps:$4 sm:$0xff]  }
 0x10f   :  { %3636 = vmatpush1.bf16.msra.mxu0 %v10068_v27  ;;  %v10139_v27 = vld [vmem:[#allocation8 + $0x784] ss:$8 sps:$4 sm:$0xff]  }
 0x110   :  { %3677 = vmatpush1.bf16.msra.mxu1 %v10071_v28  ;;  %3637 = vmatprep.subr.bf16.mxu0 %v10076_v29  ;;  %v11071_v28 = vrot.slane %v97_v19, %v10986_v49  ;;  %v11074_v29 = vrot.slane %v177_v23, %v10986_v49  ;;  %v10165_v19 = vld [vmem:[#allocation8 + $0x830] ss:$8 sps:$4 sm:$0xff]   ;;  %v10171_v23 = vld [vmem:[#allocation8 + $0x820] ss:$8 sps:$4 sm:$0xff]  }
 0x111   :  { %3678 = vmatprep.subr.bf16.mxu1 %v10079_v30  ;;  %v10134_v30 = vld [vmem:[#allocation8 + $0x680] ss:$8 sps:$4 sm:$0xff]  }
 0x113   :  { %3638 = vmatpush1.bf16.msra.mxu0 %v10074_v31  ;;  %v10137_v31 = vld [vmem:[#allocation8 + $0x780] ss:$8 sps:$4 sm:$0xff]  }
 0x114   :  { %3679 = vmatpush1.bf16.msra.mxu1 %v10077_v32  ;;  %3639 = vmatprep.subr.bf16.mxu0 %v10082_v34  ;;  %v10143_v32 = vld [vmem:[#allocation8 + $0x874] ss:$8 sps:$4 sm:$0xff]  }
 0x115   :  { %3680 = vmatprep.subr.bf16.mxu1 %v10085_v36  ;;  %v10146_v34 = vld [vmem:[#allocation8 + $0x974] ss:$8 sps:$4 sm:$0xff]   ;;  %v192_v36 = vcombine.high %v11071_v28, %v11071_v28 }
 0x117   :  { %3640 = vmatpush1.bf16.msra.mxu0 %v10080_v37  ;;  %v193_v37 = vcombine.high %v11074_v29, %v11074_v29 }
 0x118   :  { %3681 = vmatpush1.bf16.msra.mxu1 %v10083_v39  ;;  %3641 = vmatprep.subr.bf16.mxu0 %v10088_v40  ;;  %v11082_v39 = vpack.c.bf16 %v11045_v61, %v11045_v61  ;;  %v10141_v40 = vld [vmem:[#allocation8 + $0x870] ss:$8 sps:$4 sm:$0xff]   ;;  %v10147_v61 = vld [vmem:[#allocation8 + $0x860] ss:$8 sps:$4 sm:$0xff]  }
 0x119   :  { %3682 = vmatprep.subr.bf16.mxu1 %v10091_v42  ;;  %v11086_v42 = vpack.c.bf16 %v11048_v63, %v11048_v63 }
 0x11b   :  { %3642 = vmatpush1.bf16.msra.mxu0 %v10086_v44  ;;  %v10144_v44 = vld [vmem:[#allocation8 + $0x970] ss:$8 sps:$4 sm:$0xff]  }
 0x11c   :  { %3683 = vmatpush1.bf16.msra.mxu1 %v10089_v45  ;;  %3643 = vmatprep.subr.bf16.mxu0 %v10094_v47  ;;  %v10149_v45 = vld [vmem:[#allocation8 + $0x864] ss:$8 sps:$4 sm:$0xff]  }
 0x11d   :  { %3684 = vmatprep.subr.bf16.mxu1 %v10097_v48  ;;  %v10152_v47 = vld [vmem:[#allocation8 + $0x964] ss:$8 sps:$4 sm:$0xff]   ;;  %v11088_v48 = vpack.c.bf16 %v192_v36, %v192_v36  ;;  %v10186_v36 = vld [vmem:[#allocation8 + $0x900] ss:$8 sps:$4 sm:$0xff]  }
 0x11f   :  { %3644 = vmatpush2.bf16.msra.mxu0 %v10092_v50  ;;  %v11090_v50 = vpack.c.bf16 %v193_v37, %v193_v37  ;;  %v10191_v37 = vld [vmem:[#allocation8 + $0x8f4] ss:$8 sps:$4 sm:$0xff]  }
 0x120   :  { %3685 = vmatpush2.bf16.msra.mxu1 %v10095_v52  ;;  %3645 = vmatprep.subr.bf16.mxu0 %v10100_v53 }
 0x121   :  { %3686 = vmatprep.subr.bf16.mxu1 %v10103_v56  ;;  %v10150_v56 = vld [vmem:[#allocation8 + $0x960] ss:$8 sps:$4 sm:$0xff]  }
 0x123   :  { %3646 = vmatpush2.bf16.msra.mxu0 %v10098_v57  ;;  %v10155_v57 = vld [vmem:[#allocation8 + $0x854] ss:$8 sps:$4 sm:$0xff]  }
 0x124   :  { %3687 = vmatpush2.bf16.msra.mxu1 %v10101_v59  ;;  %3647 = vmatprep.subr.bf16.mxu0 %v10106_v60 }
 0x125   :  { %3688 = vmatprep.subr.bf16.mxu1 %v10109_v0  ;;  %v10158_v0 = vld [vmem:[#allocation8 + $0x954] ss:$8 sps:$4 sm:$0xff]  }
 0x127   :  { %3648 = vmatpush2.bf16.msra.mxu0 %v10104_v1 }
 0x128   :  { %3689 = vmatpush2.bf16.msra.mxu1 %v10107_v2  ;;  %3649 = vmatprep.subr.bf16.mxu0 %v10112_v4  ;;  %v10153_v2 = vld [vmem:[#allocation8 + $0x850] ss:$8 sps:$4 sm:$0xff]  }
 0x129   :  { %3690 = vmatprep.subr.bf16.mxu1 %v10115_v5  ;;  %v10156_v5 = vld [vmem:[#allocation8 + $0x950] ss:$8 sps:$4 sm:$0xff]  }
 0x12b   :  { %3650 = vmatpush2.bf16.msra.mxu0 %v10110_v6 }
 0x12c   :  { %3691 = vmatpush2.bf16.msra.mxu1 %v10113_v8  ;;  %3651 = vmatprep.subr.bf16.mxu0 %v10118_v9  ;;  %v10161_v9 = vld [vmem:[#allocation8 + $0x844] ss:$8 sps:$4 sm:$0xff]  }
 0x12d   :  { %3692 = vmatprep.subr.bf16.mxu1 %v10121_v11  ;;  %v10164_v11 = vld [vmem:[#allocation8 + $0x944] ss:$8 sps:$4 sm:$0xff]  }
 0x12f   :  { %3652 = vmatpush2.bf16.msra.mxu0 %v10116_v12 }
 0x130   :  { %3693 = vmatpush2.bf16.msra.mxu1 %v10119_v41  ;;  %3653 = vmatprep.subr.bf16.mxu0 %v10124_v15  ;;  %v10159_v41 = vld [vmem:[#allocation8 + $0x840] ss:$8 sps:$4 sm:$0xff]  }
 0x131   :  { %3694 = vmatprep.subr.bf16.mxu1 %v10127_v46  ;;  %v10162_v15 = vld [vmem:[#allocation8 + $0x940] ss:$8 sps:$4 sm:$0xff]   ;;  %v10167_v46 = vld [vmem:[#allocation8 + $0x834] ss:$8 sps:$4 sm:$0xff]  }
 0x133   :  { %3654 = vmatpush2.bf16.msra.mxu0 %v10122_v18  ;;  %v10170_v18 = vld [vmem:[#allocation8 + $0x934] ss:$8 sps:$4 sm:$0xff]  }
 0x134   :  { %3695 = vmatpush2.bf16.msra.mxu1 %v10125_v20  ;;  %3655 = vmatprep.subr.bf16.mxu0 %v10130_v21  ;;  %v10168_v20 = vld [vmem:[#allocation8 + $0x930] ss:$8 sps:$4 sm:$0xff]   ;;  %v10173_v21 = vld [vmem:[#allocation8 + $0x824] ss:$8 sps:$4 sm:$0xff]  }
 0x135   :  { %3696 = vmatprep.subr.bf16.mxu1 %v10133_v22  ;;  %v10176_v22 = vld [vmem:[#allocation8 + $0x924] ss:$8 sps:$4 sm:$0xff]  }
 0x137   :  { %3656 = vmatpush2.bf16.msra.mxu0 %v10128_v24  ;;  %v10174_v24 = vld [vmem:[#allocation8 + $0x920] ss:$8 sps:$4 sm:$0xff]  }
 0x138   :  { %3697 = vmatpush2.bf16.msra.mxu1 %v10131_v25  ;;  %3657 = vmatprep.subr.bf16.mxu0 %v10136_v26  ;;  %v10179_v25 = vld [vmem:[#allocation8 + $0x814] ss:$8 sps:$4 sm:$0xff]  }
 0x139   :  { %3698 = vmatprep.subr.bf16.mxu1 %v10139_v27  ;;  %v10182_v26 = vld [vmem:[#allocation8 + $0x914] ss:$8 sps:$4 sm:$0xff]   ;;  %v10177_v27 = vld [vmem:[#allocation8 + $0x810] ss:$8 sps:$4 sm:$0xff]  }
 0x13b   :  { %3658 = vmatpush2.bf16.msra.mxu0 %v10134_v30  ;;  %v10180_v30 = vld [vmem:[#allocation8 + $0x910] ss:$8 sps:$4 sm:$0xff]  }
 0x13c   :  { %3699 = vmatpush2.bf16.msra.mxu1 %v10137_v31  ;;  %3709 = vmatprep.subr.bf16.mxu0 %v10143_v32  ;;  %v10185_v31 = vld [vmem:[#allocation8 + $0x804] ss:$8 sps:$4 sm:$0xff]  }
 0x13d   :  { %3750 = vmatprep.subr.bf16.mxu1 %v10146_v34  ;;  %v10188_v32 = vld [vmem:[#allocation8 + $0x904] ss:$8 sps:$4 sm:$0xff]   ;;  %v10183_v34 = vld [vmem:[#allocation8 + $0x800] ss:$8 sps:$4 sm:$0xff]  }
 0x13e   :  { %v3415_v52 = vpop.f32.mrf.mxu0  ;;  %3660 = vmatmul.mubr.bf16.vlgmr.msra.gmra.mxu0 %v11082_v39 }
 0x13f   :  { %v3456_v53 = vpop.f32.mrf.mxu1  ;;  %3701 = vmatmul.mubr.bf16.vlgmr.msra.gmra.mxu1 %v11086_v42  ;;  %3710 = vmatpush1.bf16.msra.mxu0 %v10141_v40  ;;  %v10194_v40 = vld [vmem:[#allocation8 + $0x9f4] ss:$8 sps:$4 sm:$0xff]  }
 0x140   :  { %v11094_v63 = vadd.f32 %v3456_v53, %v3415_v52  ;;  %3751 = vmatpush1.bf16.msra.mxu1 %v10144_v44  ;;  %v3417_v59 = vpop.f32.mrf.mxu0  ;;  %3711 = vmatprep.subr.bf16.mxu0 %v10149_v45  ;;  %v10189_v44 = vld [vmem:[#allocation8 + $0x8f0] ss:$8 sps:$4 sm:$0xff]   ;;  %v10200_v52 = vld [vmem:[#allocation8 + $0x9e4] ss:$8 sps:$4 sm:$0xff]   ;;  %v10195_v53 = vld [vmem:[#allocation8 + $0x8e0] ss:$8 sps:$4 sm:$0xff]  }
 0x141   :  { %v3458_v60 = vpop.f32.mrf.mxu1  ;;  %3752 = vmatprep.subr.bf16.mxu1 %v10152_v47  ;;  %3741 = vmatprep.mubr.bf16.mxu0 %v11088_v48  ;;  %v10192_v45 = vld [vmem:[#allocation8 + $0x9f0] ss:$8 sps:$4 sm:$0xff]   ;;  %v10197_v47 = vld [vmem:[#allocation8 + $0x8e4] ss:$8 sps:$4 sm:$0xff]  }
 0x142   :  { %v11096_v1 = vadd.f32 %v3458_v60, %v3417_v59  ;;  %3782 = vmatprep.mubr.bf16.mxu1 %v11090_v50  ;;  %v3419_v4 = vpop.f32.mrf.mxu0  ;;  %v10201_v59 = vld [vmem:[#allocation8 + $0x8d0] ss:$8 sps:$4 sm:$0xff]  }
 0x143   :  { %v3460_v6 = vpop.f32.mrf.mxu1  ;;  %3712 = vmatpush1.bf16.msra.mxu0 %v10147_v61  ;;  %v10198_v61 = vld [vmem:[#allocation8 + $0x9e0] ss:$8 sps:$4 sm:$0xff]   ;;  %v10204_v60 = vld [vmem:[#allocation8 + $0x9d0] ss:$8 sps:$4 sm:$0xff]  }
 0x144   :  { %3753 = vmatpush1.bf16.msra.mxu1 %v10150_v56  ;;  %v3420_v8 = vpop.f32.mrf.mxu0  ;;  %3713 = vmatprep.subr.bf16.mxu0 %v10155_v57  ;;  %v10203_v56 = vld [vmem:[#allocation8 + $0x8d4] ss:$8 sps:$4 sm:$0xff]   ;;  %v10207_v4 = vld [vmem:[#allocation8 + $0x8c0] ss:$8 sps:$4 sm:$0xff]  }
 0x145   :  { %3754 = vmatprep.subr.bf16.mxu1 %v10158_v0  ;;  %v3461_v12 = vpop.f32.mrf.mxu1  ;;  %v10206_v57 = vld [vmem:[#allocation8 + $0x9d4] ss:$8 sps:$4 sm:$0xff]   ;;  %v10209_v0 = vld [vmem:[#allocation8 + $0x8c4] ss:$8 sps:$4 sm:$0xff]  }
 0x146   :  { %v10215_v6 = vld [vmem:[#allocation8 + $0x8b4] ss:$8 sps:$4 sm:$0xff]   ;;  %v10221_v12 = vld [vmem:[#allocation8 + $0x8a4] ss:$8 sps:$4 sm:$0xff]  }
 0x147   :  { %3714 = vmatpush1.bf16.msra.mxu0 %v10153_v2  ;;  %v10212_v2 = vld [vmem:[#allocation8 + $0x9c4] ss:$8 sps:$4 sm:$0xff]   ;;  %v10218_v8 = vld [vmem:[#allocation8 + $0x9b4] ss:$8 sps:$4 sm:$0xff]  }
 0x148   :  { %3755 = vmatpush1.bf16.msra.mxu1 %v10156_v5  ;;  %3715 = vmatprep.subr.bf16.mxu0 %v10161_v9  ;;  %v10210_v5 = vld [vmem:[#allocation8 + $0x9c0] ss:$8 sps:$4 sm:$0xff]   ;;  %v10213_v9 = vld [vmem:[#allocation8 + $0x8b0] ss:$8 sps:$4 sm:$0xff]  }
 0x149   :  { %3756 = vmatprep.subr.bf16.mxu1 %v10164_v11  ;;  %v10216_v11 = vld [vmem:[#allocation8 + $0x9b0] ss:$8 sps:$4 sm:$0xff]  }
 0x14b   :  { %3716 = vmatpush1.bf16.msra.mxu0 %v10159_v41  ;;  %v10224_v41 = vld [vmem:[#allocation8 + $0x9a4] ss:$8 sps:$4 sm:$0xff]  }
 0x14c   :  { %3757 = vmatpush1.bf16.msra.mxu1 %v10162_v15  ;;  %3717 = vmatprep.subr.bf16.mxu0 %v10167_v46  ;;  %v98_v15 = vld [vmem:[#allocation2 + $0x28] sm:$0xff] }
 0x14d   :  { %3758 = vmatprep.subr.bf16.mxu1 %v10170_v18  ;;  %v10219_v46 = vld [vmem:[#allocation8 + $0x8a0] ss:$8 sps:$4 sm:$0xff]  }
 0x14e   :  { %v10222_v18 = vld [vmem:[#allocation8 + $0x9a0] ss:$8 sps:$4 sm:$0xff]  }
 0x14f   :  { %3718 = vmatpush1.bf16.msra.mxu0 %v10165_v19  ;;  %v10227_v19 = vld [vmem:[#allocation8 + $0x894] ss:$8 sps:$4 sm:$0xff]  }
 0x150   :  { %3759 = vmatpush1.bf16.msra.mxu1 %v10168_v20  ;;  %3719 = vmatprep.subr.bf16.mxu0 %v10173_v21  ;;  %v10230_v20 = vld [vmem:[#allocation8 + $0x994] ss:$8 sps:$4 sm:$0xff]   ;;  %v194_v21 = vcombine.high %v98_v15, %v98_v15 }
 0x151   :  { %3760 = vmatprep.subr.bf16.mxu1 %v10176_v22  ;;  %v10225_v22 = vld [vmem:[#allocation8 + $0x890] ss:$8 sps:$4 sm:$0xff]  }
 0x153   :  { %3720 = vmatpush1.bf16.msra.mxu0 %v10171_v23  ;;  %v10228_v23 = vld [vmem:[#allocation8 + $0x990] ss:$8 sps:$4 sm:$0xff]  }
 0x154   :  { %3761 = vmatpush1.bf16.msra.mxu1 %v10174_v24  ;;  %3721 = vmatprep.subr.bf16.mxu0 %v10179_v25  ;;  %v10233_v24 = vld [vmem:[#allocation8 + $0x884] ss:$8 sps:$4 sm:$0xff]  }
 0x155   :  { %3762 = vmatprep.subr.bf16.mxu1 %v10182_v26  ;;  %v10236_v25 = vld [vmem:[#allocation8 + $0x984] ss:$8 sps:$4 sm:$0xff]   ;;  %v11101_v26 = vrot.slane %v98_v15, %v10986_v49 }
 0x157   :  { %3722 = vmatpush1.bf16.msra.mxu0 %v10177_v27  ;;  %v11104_v27 = vrot.slane %v194_v21, %v10986_v49  ;;  %v10264_v21 = vld [vmem:[#allocation8 + $0xa34] ss:$8 sps:$4 sm:$0xff]  }
 0x158   :  { %3763 = vmatpush1.bf16.msra.mxu1 %v10180_v30  ;;  %3723 = vmatprep.subr.bf16.mxu0 %v10185_v31  ;;  %v10231_v30 = vld [vmem:[#allocation8 + $0x880] ss:$8 sps:$4 sm:$0xff]  }
 0x159   :  { %3764 = vmatprep.subr.bf16.mxu1 %v10188_v32  ;;  %v10234_v31 = vld [vmem:[#allocation8 + $0x980] ss:$8 sps:$4 sm:$0xff]   ;;  %v10240_v32 = vld [vmem:[#allocation8 + $0xa74] ss:$8 sps:$4 sm:$0xff]  }
 0x15b   :  { %3724 = vmatpush1.bf16.msra.mxu0 %v10183_v34  ;;  %v10243_v34 = vld [vmem:[#allocation8 + $0xb74] ss:$8 sps:$4 sm:$0xff]  }
 0x15c   :  { %3765 = vmatpush1.bf16.msra.mxu1 %v10186_v36  ;;  %3725 = vmatprep.subr.bf16.mxu0 %v10191_v37  ;;  %v10238_v36 = vld [vmem:[#allocation8 + $0xa70] ss:$8 sps:$4 sm:$0xff]  }
 0x15d   :  { %3766 = vmatprep.subr.bf16.mxu1 %v10194_v40  ;;  %v10241_v37 = vld [vmem:[#allocation8 + $0xb70] ss:$8 sps:$4 sm:$0xff]   ;;  %v209_v40 = vcombine.high %v11101_v26, %v11101_v26 }
 0x15f   :  { %3726 = vmatpush2.bf16.msra.mxu0 %v10189_v44  ;;  %v210_v44 = vcombine.high %v11104_v27, %v11104_v27 }
 0x160   :  { %3767 = vmatpush2.bf16.msra.mxu1 %v10192_v45  ;;  %3727 = vmatprep.subr.bf16.mxu0 %v10197_v47  ;;  %v11112_v45 = vpack.c.bf16 %v11071_v28, %v11071_v28  ;;  %v11116_v47 = vpack.c.bf16 %v11074_v29, %v11074_v29 }
 0x161   :  { %3768 = vmatprep.subr.bf16.mxu1 %v10200_v52  ;;  %v10246_v52 = vld [vmem:[#allocation8 + $0xa64] ss:$8 sps:$4 sm:$0xff]  }
 0x163   :  { %3728 = vmatpush2.bf16.msra.mxu0 %v10195_v53  ;;  %v10249_v53 = vld [vmem:[#allocation8 + $0xb64] ss:$8 sps:$4 sm:$0xff]  }
 0x164   :  { %3769 = vmatpush2.bf16.msra.mxu1 %v10198_v61  ;;  %3729 = vmatprep.subr.bf16.mxu0 %v10203_v56  ;;  %v10244_v61 = vld [vmem:[#allocation8 + $0xa60] ss:$8 sps:$4 sm:$0xff]  }
 0x165   :  { %3770 = vmatprep.subr.bf16.mxu1 %v10206_v57  ;;  %v10247_v56 = vld [vmem:[#allocation8 + $0xb60] ss:$8 sps:$4 sm:$0xff]   ;;  %v11118_v57 = vpack.c.bf16 %v209_v40, %v209_v40  ;;  %v10277_v40 = vld [vmem:[#allocation8 + $0xb10] ss:$8 sps:$4 sm:$0xff]  }
 0x167   :  { %3730 = vmatpush2.bf16.msra.mxu0 %v10201_v59  ;;  %v11120_v59 = vpack.c.bf16 %v210_v44, %v210_v44  ;;  %v10282_v44 = vld [vmem:[#allocation8 + $0xa04] ss:$8 sps:$4 sm:$0xff]  }
 0x168   :  { %3771 = vmatpush2.bf16.msra.mxu1 %v10204_v60  ;;  %3731 = vmatprep.subr.bf16.mxu0 %v10209_v0 }
 0x169   :  { %3772 = vmatprep.subr.bf16.mxu1 %v10212_v2 }
 0x16b   :  { %3732 = vmatpush2.bf16.msra.mxu0 %v10207_v4  ;;  %v10252_v4 = vld [vmem:[#allocation8 + $0xa54] ss:$8 sps:$4 sm:$0xff]  }
 0x16c   :  { %3773 = vmatpush2.bf16.msra.mxu1 %v10210_v5  ;;  %3733 = vmatprep.subr.bf16.mxu0 %v10215_v6  ;;  %v10255_v5 = vld [vmem:[#allocation8 + $0xb54] ss:$8 sps:$4 sm:$0xff]  }
 0x16d   :  { %3774 = vmatprep.subr.bf16.mxu1 %v10218_v8 }
 0x16f   :  { %3734 = vmatpush2.bf16.msra.mxu0 %v10213_v9  ;;  %v10250_v9 = vld [vmem:[#allocation8 + $0xa50] ss:$8 sps:$4 sm:$0xff]  }
 0x170   :  { %3775 = vmatpush2.bf16.msra.mxu1 %v10216_v11  ;;  %3735 = vmatprep.subr.bf16.mxu0 %v10221_v12  ;;  %v10253_v11 = vld [vmem:[#allocation8 + $0xb50] ss:$8 sps:$4 sm:$0xff]  }
 0x171   :  { %3776 = vmatprep.subr.bf16.mxu1 %v10224_v41 }
 0x173   :  { %3736 = vmatpush2.bf16.msra.mxu0 %v10219_v46  ;;  %v10258_v46 = vld [vmem:[#allocation8 + $0xa44] ss:$8 sps:$4 sm:$0xff]  }
 0x174   :  { %3777 = vmatpush2.bf16.msra.mxu1 %v10222_v18  ;;  %3737 = vmatprep.subr.bf16.mxu0 %v10227_v19  ;;  %v10261_v18 = vld [vmem:[#allocation8 + $0xb44] ss:$8 sps:$4 sm:$0xff]   ;;  %v10256_v19 = vld [vmem:[#allocation8 + $0xa40] ss:$8 sps:$4 sm:$0xff]  }
 0x175   :  { %3778 = vmatprep.subr.bf16.mxu1 %v10230_v20  ;;  %v10259_v20 = vld [vmem:[#allocation8 + $0xb40] ss:$8 sps:$4 sm:$0xff]  }
 0x177   :  { %3738 = vmatpush2.bf16.msra.mxu0 %v10225_v22  ;;  %v10267_v22 = vld [vmem:[#allocation8 + $0xb34] ss:$8 sps:$4 sm:$0xff]  }
 0x178   :  { %3779 = vmatpush2.bf16.msra.mxu1 %v10228_v23  ;;  %3739 = vmatprep.subr.bf16.mxu0 %v10233_v24  ;;  %v10262_v23 = vld [vmem:[#allocation8 + $0xa30] ss:$8 sps:$4 sm:$0xff]  }
 0x179   :  { %3780 = vmatprep.subr.bf16.mxu1 %v10236_v25  ;;  %v10265_v24 = vld [vmem:[#allocation8 + $0xb30] ss:$8 sps:$4 sm:$0xff]   ;;  %v10270_v25 = vld [vmem:[#allocation8 + $0xa24] ss:$8 sps:$4 sm:$0xff]  }
 0x17b   :  { %3740 = vmatpush2.bf16.msra.mxu0 %v10231_v30  ;;  %v10273_v30 = vld [vmem:[#allocation8 + $0xb24] ss:$8 sps:$4 sm:$0xff]  }
 0x17c   :  { %3781 = vmatpush2.bf16.msra.mxu1 %v10234_v31  ;;  %3791 = vmatprep.subr.bf16.mxu0 %v10240_v32  ;;  %v10268_v31 = vld [vmem:[#allocation8 + $0xa20] ss:$8 sps:$4 sm:$0xff]  }
 0x17d   :  { %3832 = vmatprep.subr.bf16.mxu1 %v10243_v34  ;;  %v10271_v32 = vld [vmem:[#allocation8 + $0xb20] ss:$8 sps:$4 sm:$0xff]   ;;  %v10276_v34 = vld [vmem:[#allocation8 + $0xa14] ss:$8 sps:$4 sm:$0xff]  }
 0x17e   :  { %v3497_v60 = vpop.f32.mrf.mxu0  ;;  %3742 = vmatmul.mubr.bf16.vlgmr.msra.gmra.mxu0 %v11112_v45 }
 0x17f   :  { %3783 = vmatmul.mubr.bf16.vlgmr.msra.gmra.mxu1 %v11116_v47  ;;  %v3538_v28 = vpop.f32.mrf.mxu1  ;;  %v3498_v29 = vadd.f32 %v3497_v60, %v11094_v63  ;;  %3792 = vmatpush1.bf16.msra.mxu0 %v10238_v36  ;;  %v10279_v36 = vld [vmem:[#allocation8 + $0xb14] ss:$8 sps:$4 sm:$0xff]  }
 0x180   :  { %3833 = vmatpush1.bf16.msra.mxu1 %v10241_v37  ;;  %v3499_v0 = vpop.f32.mrf.mxu0  ;;  %3793 = vmatprep.subr.bf16.mxu0 %v10246_v52  ;;  %v10274_v37 = vld [vmem:[#allocation8 + $0xa10] ss:$8 sps:$4 sm:$0xff]   ;;  %v10285_v52 = vld [vmem:[#allocation8 + $0xb04] ss:$8 sps:$4 sm:$0xff]   ;;  %v10291_v60 = vld [vmem:[#allocation8 + $0xbf4] ss:$8 sps:$4 sm:$0xff]  }
 0x181   :  { %v3540_v2 = vpop.f32.mrf.mxu1  ;;  %3834 = vmatprep.subr.bf16.mxu1 %v10249_v53  ;;  %v3500_v6 = vadd.f32 %v3499_v0, %v11096_v1  ;;  %v11126_v8 = vadd.f32 %v3538_v28, %v3498_v29  ;;  %3823 = vmatprep.mubr.bf16.mxu0 %v11118_v57  ;;  %v10280_v53 = vld [vmem:[#allocation8 + $0xa00] ss:$8 sps:$4 sm:$0xff]   ;;  %v10286_v28 = vld [vmem:[#allocation8 + $0xaf0] ss:$8 sps:$4 sm:$0xff]   ;;  %v10294_v0 = vld [vmem:[#allocation8 + $0xae4] ss:$8 sps:$4 sm:$0xff]  }
 0x182   :  { %3864 = vmatprep.mubr.bf16.mxu1 %v11120_v59  ;;  %v3501_v12 = vpop.f32.mrf.mxu0  ;;  %v10289_v29 = vld [vmem:[#allocation8 + $0xbf0] ss:$8 sps:$4 sm:$0xff]  }
 0x183   :  { %v3542_v63 = vpop.f32.mrf.mxu1  ;;  %v11130_v41 = vadd.f32 %v3540_v2, %v3500_v6  ;;  %3794 = vmatpush1.bf16.msra.mxu0 %v10244_v61  ;;  %v10283_v61 = vld [vmem:[#allocation8 + $0xb00] ss:$8 sps:$4 sm:$0xff]   ;;  %v10297_v2 = vld [vmem:[#allocation8 + $0xbe4] ss:$8 sps:$4 sm:$0xff]   ;;  %v10300_v6 = vld [vmem:[#allocation8 + $0xad4] ss:$8 sps:$4 sm:$0xff]  }
 0x184   :  { %3835 = vmatpush1.bf16.msra.mxu1 %v10247_v56  ;;  %v3502_v15 = vpop.f32.mrf.mxu0  ;;  %3795 = vmatprep.subr.bf16.mxu0 %v10252_v4  ;;  %v10288_v56 = vld [vmem:[#allocation8 + $0xaf4] ss:$8 sps:$4 sm:$0xff]   ;;  %v10292_v4 = vld [vmem:[#allocation8 + $0xae0] ss:$8 sps:$4 sm:$0xff]   ;;  %v10301_v12 = vld [vmem:[#allocation8 + $0xbd0] ss:$8 sps:$4 sm:$0xff]  }
 0x185   :  { %3836 = vmatprep.subr.bf16.mxu1 %v10255_v5  ;;  %v3543_v1 = vpop.f32.mrf.mxu1  ;;  %v10295_v5 = vld [vmem:[#allocation8 + $0xbe0] ss:$8 sps:$4 sm:$0xff]   ;;  %v10306_v63 = vld [vmem:[#allocation8 + $0xac4] ss:$8 sps:$4 sm:$0xff]  }
 0x186   :  { %v10309_v15 = vld [vmem:[#allocation8 + $0xbc4] ss:$8 sps:$4 sm:$0xff]   ;;  %v10312_v1 = vld [vmem:[#allocation8 + $0xab4] ss:$8 sps:$4 sm:$0xff]  }
 0x187   :  { %3796 = vmatpush1.bf16.msra.mxu0 %v10250_v9  ;;  %v10303_v9 = vld [vmem:[#allocation8 + $0xbd4] ss:$8 sps:$4 sm:$0xff]  }
 0x188   :  { %3837 = vmatpush1.bf16.msra.mxu1 %v10253_v11  ;;  %3797 = vmatprep.subr.bf16.mxu0 %v10258_v46  ;;  %v10298_v11 = vld [vmem:[#allocation8 + $0xad0] ss:$8 sps:$4 sm:$0xff]   ;;  %v10304_v46 = vld [vmem:[#allocation8 + $0xac0] ss:$8 sps:$4 sm:$0xff]  }
 0x189   :  { %3838 = vmatprep.subr.bf16.mxu1 %v10261_v18  ;;  %v10307_v18 = vld [vmem:[#allocation8 + $0xbc0] ss:$8 sps:$4 sm:$0xff]  }
 0x18b   :  { %3798 = vmatpush1.bf16.msra.mxu0 %v10256_v19  ;;  %v10315_v19 = vld [vmem:[#allocation8 + $0xbb4] ss:$8 sps:$4 sm:$0xff]  }
 0x18c   :  { %3839 = vmatpush1.bf16.msra.mxu1 %v10259_v20  ;;  %3799 = vmatprep.subr.bf16.mxu0 %v10264_v21  ;;  %v10310_v20 = vld [vmem:[#allocation8 + $0xab0] ss:$8 sps:$4 sm:$0xff]  }
 0x18d   :  { %3840 = vmatprep.subr.bf16.mxu1 %v10267_v22  ;;  %v10313_v21 = vld [vmem:[#allocation8 + $0xbb0] ss:$8 sps:$4 sm:$0xff]   ;;  %v10318_v22 = vld [vmem:[#allocation8 + $0xaa4] ss:$8 sps:$4 sm:$0xff]  }
 0x18f   :  { %3800 = vmatpush1.bf16.msra.mxu0 %v10262_v23  ;;  %v10321_v23 = vld [vmem:[#allocation8 + $0xba4] ss:$8 sps:$4 sm:$0xff]  }
 0x190   :  { %3841 = vmatpush1.bf16.msra.mxu1 %v10265_v24  ;;  %3801 = vmatprep.subr.bf16.mxu0 %v10270_v25  ;;  %v99_v24 = vld [vmem:[#allocation2 + $0x30] sm:$0xff] }
 0x191   :  { %3842 = vmatprep.subr.bf16.mxu1 %v10273_v30  ;;  %v10316_v25 = vld [vmem:[#allocation8 + $0xaa0] ss:$8 sps:$4 sm:$0xff]  }
 0x192   :  { %v10319_v30 = vld [vmem:[#allocation8 + $0xba0] ss:$8 sps:$4 sm:$0xff]  }
 0x193   :  { %3802 = vmatpush1.bf16.msra.mxu0 %v10268_v31  ;;  %v10324_v31 = vld [vmem:[#allocation8 + $0xa94] ss:$8 sps:$4 sm:$0xff]  }
 0x194   :  { %3843 = vmatpush1.bf16.msra.mxu1 %v10271_v32  ;;  %3803 = vmatprep.subr.bf16.mxu0 %v10276_v34  ;;  %v10327_v32 = vld [vmem:[#allocation8 + $0xb94] ss:$8 sps:$4 sm:$0xff]   ;;  %v211_v34 = vcombine.high %v99_v24, %v99_v24 }
 0x195   :  { %3844 = vmatprep.subr.bf16.mxu1 %v10279_v36  ;;  %v10322_v36 = vld [vmem:[#allocation8 + $0xa90] ss:$8 sps:$4 sm:$0xff]  }
 0x197   :  { %3804 = vmatpush1.bf16.msra.mxu0 %v10274_v37  ;;  %v10325_v37 = vld [vmem:[#allocation8 + $0xb90] ss:$8 sps:$4 sm:$0xff]  }
 0x198   :  { %3845 = vmatpush1.bf16.msra.mxu1 %v10277_v40  ;;  %3805 = vmatprep.subr.bf16.mxu0 %v10282_v44  ;;  %v10330_v40 = vld [vmem:[#allocation8 + $0xa84] ss:$8 sps:$4 sm:$0xff]  }
 0x199   :  { %3846 = vmatprep.subr.bf16.mxu1 %v10285_v52  ;;  %v10333_v44 = vld [vmem:[#allocation8 + $0xb84] ss:$8 sps:$4 sm:$0xff]   ;;  %v11133_v52 = vrot.slane %v99_v24, %v10986_v49  ;;  %v10347_v24 = vld [vmem:[#allocation8 + $0xc50] ss:$8 sps:$4 sm:$0xff]  }
 0x19b   :  { %3806 = vmatpush1.bf16.msra.mxu0 %v10280_v53  ;;  %v11136_v53 = vrot.slane %v211_v34, %v10986_v49  ;;  %v10355_v34 = vld [vmem:[#allocation8 + $0xc44] ss:$8 sps:$4 sm:$0xff]  }
 0x19c   :  { %3847 = vmatpush1.bf16.msra.mxu1 %v10283_v61  ;;  %3807 = vmatprep.subr.bf16.mxu0 %v10288_v56  ;;  %v10328_v61 = vld [vmem:[#allocation8 + $0xa80] ss:$8 sps:$4 sm:$0xff]  }
 0x19d   :  { %3848 = vmatprep.subr.bf16.mxu1 %v10291_v60  ;;  %v10331_v56 = vld [vmem:[#allocation8 + $0xb80] ss:$8 sps:$4 sm:$0xff]   ;;  %v10337_v60 = vld [vmem:[#allocation8 + $0xc74] ss:$8 sps:$4 sm:$0xff]  }
 0x19f   :  { %3808 = vmatpush2.bf16.msra.mxu0 %v10286_v28  ;;  %v10340_v28 = vld [vmem:[#allocation8 + $0xd74] ss:$8 sps:$4 sm:$0xff]  }
 0x1a0   :  { %3849 = vmatpush2.bf16.msra.mxu1 %v10289_v29  ;;  %3809 = vmatprep.subr.bf16.mxu0 %v10294_v0  ;;  %v10335_v29 = vld [vmem:[#allocation8 + $0xc70] ss:$8 sps:$4 sm:$0xff]  }
 0x1a1   :  { %3850 = vmatprep.subr.bf16.mxu1 %v10297_v2  ;;  %v10338_v0 = vld [vmem:[#allocation8 + $0xd70] ss:$8 sps:$4 sm:$0xff]   ;;  %v226_v2 = vcombine.high %v11133_v52, %v11133_v52 }
 0x1a3   :  { %3810 = vmatpush2.bf16.msra.mxu0 %v10292_v4  ;;  %v227_v4 = vcombine.high %v11136_v53, %v11136_v53 }
 0x1a4   :  { %3851 = vmatpush2.bf16.msra.mxu1 %v10295_v5  ;;  %3811 = vmatprep.subr.bf16.mxu0 %v10300_v6  ;;  %v11144_v5 = vpack.c.bf16 %v11101_v26, %v11101_v26  ;;  %v11148_v6 = vpack.c.bf16 %v11104_v27, %v11104_v27 }
 0x1a5   :  { %3852 = vmatprep.subr.bf16.mxu1 %v10303_v9  ;;  %v10343_v9 = vld [vmem:[#allocation8 + $0xc64] ss:$8 sps:$4 sm:$0xff]  }
 0x1a7   :  { %3812 = vmatpush2.bf16.msra.mxu0 %v10298_v11  ;;  %v10346_v11 = vld [vmem:[#allocation8 + $0xd64] ss:$8 sps:$4 sm:$0xff]  }
 0x1a8   :  { %3853 = vmatpush2.bf16.msra.mxu1 %v10301_v12  ;;  %3813 = vmatprep.subr.bf16.mxu0 %v10306_v63  ;;  %v10341_v12 = vld [vmem:[#allocation8 + $0xc60] ss:$8 sps:$4 sm:$0xff]  }
 0x1a9   :  { %3854 = vmatprep.subr.bf16.mxu1 %v10309_v15  ;;  %v10344_v63 = vld [vmem:[#allocation8 + $0xd60] ss:$8 sps:$4 sm:$0xff]   ;;  %v11150_v15 = vpack.c.bf16 %v226_v2, %v226_v2 }
 0x1aa   :  { %v10368_v2 = vld [vmem:[#allocation8 + $0xd20] ss:$8 sps:$4 sm:$0xff]  }
 0x1ab   :  { %3814 = vmatpush2.bf16.msra.mxu0 %v10304_v46  ;;  %v11152_v46 = vpack.c.bf16 %v227_v4, %v227_v4  ;;  %v10373_v4 = vld [vmem:[#allocation8 + $0xc14] ss:$8 sps:$4 sm:$0xff]  }
 0x1ac   :  { %3855 = vmatpush2.bf16.msra.mxu1 %v10307_v18  ;;  %3815 = vmatprep.subr.bf16.mxu0 %v10312_v1 }
 0x1ad   :  { %3856 = vmatprep.subr.bf16.mxu1 %v10315_v19 }
 0x1af   :  { %3816 = vmatpush2.bf16.msra.mxu0 %v10310_v20  ;;  %v10349_v20 = vld [vmem:[#allocation8 + $0xc54] ss:$8 sps:$4 sm:$0xff]  }
 0x1b0   :  { %3857 = vmatpush2.bf16.msra.mxu1 %v10313_v21  ;;  %3817 = vmatprep.subr.bf16.mxu0 %v10318_v22  ;;  %v10352_v21 = vld [vmem:[#allocation8 + $0xd54] ss:$8 sps:$4 sm:$0xff]  }
 0x1b1   :  { %3858 = vmatprep.subr.bf16.mxu1 %v10321_v23 }
 0x1b3   :  { %3818 = vmatpush2.bf16.msra.mxu0 %v10316_v25  ;;  %v10350_v25 = vld [vmem:[#allocation8 + $0xd50] ss:$8 sps:$4 sm:$0xff]  }
 0x1b4   :  { %3859 = vmatpush2.bf16.msra.mxu1 %v10319_v30  ;;  %3819 = vmatprep.subr.bf16.mxu0 %v10324_v31 }
 0x1b5   :  { %3860 = vmatprep.subr.bf16.mxu1 %v10327_v32 }
 0x1b7   :  { %3820 = vmatpush2.bf16.msra.mxu0 %v10322_v36  ;;  %v10358_v36 = vld [vmem:[#allocation8 + $0xd44] ss:$8 sps:$4 sm:$0xff]  }
 0x1b8   :  { %3861 = vmatpush2.bf16.msra.mxu1 %v10325_v37  ;;  %3821 = vmatprep.subr.bf16.mxu0 %v10330_v40  ;;  %v10353_v37 = vld [vmem:[#allocation8 + $0xc40] ss:$8 sps:$4 sm:$0xff]  }
 0x1b9   :  { %3862 = vmatprep.subr.bf16.mxu1 %v10333_v44  ;;  %v10356_v40 = vld [vmem:[#allocation8 + $0xd40] ss:$8 sps:$4 sm:$0xff]   ;;  %v10361_v44 = vld [vmem:[#allocation8 + $0xc34] ss:$8 sps:$4 sm:$0xff]  }
 0x1bb   :  { %3822 = vmatpush2.bf16.msra.mxu0 %v10328_v61  ;;  %v10364_v61 = vld [vmem:[#allocation8 + $0xd34] ss:$8 sps:$4 sm:$0xff]  }
 0x1bc   :  { %3863 = vmatpush2.bf16.msra.mxu1 %v10331_v56  ;;  %3873 = vmatprep.subr.bf16.mxu0 %v10337_v60  ;;  %v10359_v56 = vld [vmem:[#allocation8 + $0xc30] ss:$8 sps:$4 sm:$0xff]  }
 0x1bd   :  { %3914 = vmatprep.subr.bf16.mxu1 %v10340_v28  ;;  %v10362_v60 = vld [vmem:[#allocation8 + $0xd30] ss:$8 sps:$4 sm:$0xff]   ;;  %v10367_v28 = vld [vmem:[#allocation8 + $0xc24] ss:$8 sps:$4 sm:$0xff]  }
 0x1be   :  { %v3579_v18 = vpop.f32.mrf.mxu0  ;;  %3824 = vmatmul.mubr.bf16.vlgmr.msra.gmra.mxu0 %v11144_v5 }
 0x1bf   :  { %3865 = vmatmul.mubr.bf16.vlgmr.msra.gmra.mxu1 %v11148_v6  ;;  %v3620_v26 = vpop.f32.mrf.mxu1  ;;  %v3580_v27 = vadd.f32 %v3579_v18, %v11126_v8  ;;  %3874 = vmatpush1.bf16.msra.mxu0 %v10335_v29  ;;  %v10370_v29 = vld [vmem:[#allocation8 + $0xd24] ss:$8 sps:$4 sm:$0xff]  }
 0x1c0   :  { %3915 = vmatpush1.bf16.msra.mxu1 %v10338_v0  ;;  %v3581_v1 = vpop.f32.mrf.mxu0  ;;  %3875 = vmatprep.subr.bf16.mxu0 %v10343_v9  ;;  %v10365_v0 = vld [vmem:[#allocation8 + $0xc20] ss:$8 sps:$4 sm:$0xff]   ;;  %v10376_v9 = vld [vmem:[#allocation8 + $0xd14] ss:$8 sps:$4 sm:$0xff]   ;;  %v10382_v18 = vld [vmem:[#allocation8 + $0xd04] ss:$8 sps:$4 sm:$0xff]  }
 0x1c1   :  { %v3622_v19 = vpop.f32.mrf.mxu1  ;;  %3916 = vmatprep.subr.bf16.mxu1 %v10346_v11  ;;  %v3582_v22 = vadd.f32 %v3581_v1, %v11130_v41  ;;  %v11158_v23 = vadd.f32 %v3620_v26, %v3580_v27  ;;  %3905 = vmatprep.mubr.bf16.mxu0 %v11150_v15  ;;  %v10371_v11 = vld [vmem:[#allocation8 + $0xc10] ss:$8 sps:$4 sm:$0xff]   ;;  %v10377_v26 = vld [vmem:[#allocation8 + $0xc00] ss:$8 sps:$4 sm:$0xff]   ;;  %v10385_v1 = vld [vmem:[#allocation8 + $0xcf4] ss:$8 sps:$4 sm:$0xff]  }
 0x1c2   :  { %3946 = vmatprep.mubr.bf16.mxu1 %v11152_v46  ;;  %v3583_v30 = vpop.f32.mrf.mxu0  ;;  %v10380_v27 = vld [vmem:[#allocation8 + $0xd00] ss:$8 sps:$4 sm:$0xff]  }
 0x1c3   :  { %v3624_v8 = vpop.f32.mrf.mxu1  ;;  %v11162_v31 = vadd.f32 %v3622_v19, %v3582_v22  ;;  %3876 = vmatpush1.bf16.msra.mxu0 %v10341_v12  ;;  %v10374_v12 = vld [vmem:[#allocation8 + $0xd10] ss:$8 sps:$4 sm:$0xff]   ;;  %v10388_v19 = vld [vmem:[#allocation8 + $0xdf4] ss:$8 sps:$4 sm:$0xff]   ;;  %v10391_v22 = vld [vmem:[#allocation8 + $0xce4] ss:$8 sps:$4 sm:$0xff]  }
 0x1c4   :  { %3917 = vmatpush1.bf16.msra.mxu1 %v10344_v63  ;;  %v3584_v32 = vpop.f32.mrf.mxu0  ;;  %3877 = vmatprep.subr.bf16.mxu0 %v10349_v20  ;;  %v10379_v63 = vld [vmem:[#allocation8 + $0xc04] ss:$8 sps:$4 sm:$0xff]   ;;  %v10383_v20 = vld [vmem:[#allocation8 + $0xcf0] ss:$8 sps:$4 sm:$0xff]   ;;  %v10392_v30 = vld [vmem:[#allocation8 + $0xde0] ss:$8 sps:$4 sm:$0xff]  }
 0x1c5   :  { %3918 = vmatprep.subr.bf16.mxu1 %v10352_v21  ;;  %v3625_v41 = vpop.f32.mrf.mxu1  ;;  %v10386_v21 = vld [vmem:[#allocation8 + $0xdf0] ss:$8 sps:$4 sm:$0xff]   ;;  %v10397_v8 = vld [vmem:[#allocation8 + $0xcd4] ss:$8 sps:$4 sm:$0xff]  }
 0x1c6   :  { %v10400_v32 = vld [vmem:[#allocation8 + $0xdd4] ss:$8 sps:$4 sm:$0xff]   ;;  %v10403_v41 = vld [vmem:[#allocation8 + $0xcc4] ss:$8 sps:$4 sm:$0xff]  }
 0x1c7   :  { %3878 = vmatpush1.bf16.msra.mxu0 %v10347_v24  ;;  %v10394_v24 = vld [vmem:[#allocation8 + $0xde4] ss:$8 sps:$4 sm:$0xff]  }
 0x1c8   :  { %3919 = vmatpush1.bf16.msra.mxu1 %v10350_v25  ;;  %3879 = vmatprep.subr.bf16.mxu0 %v10355_v34  ;;  %v10389_v25 = vld [vmem:[#allocation8 + $0xce0] ss:$8 sps:$4 sm:$0xff]   ;;  %v10395_v34 = vld [vmem:[#allocation8 + $0xcd0] ss:$8 sps:$4 sm:$0xff]  }
 0x1c9   :  { %3920 = vmatprep.subr.bf16.mxu1 %v10358_v36  ;;  %v10398_v36 = vld [vmem:[#allocation8 + $0xdd0] ss:$8 sps:$4 sm:$0xff]  }
 0x1cb   :  { %3880 = vmatpush1.bf16.msra.mxu0 %v10353_v37  ;;  %v10406_v37 = vld [vmem:[#allocation8 + $0xdc4] ss:$8 sps:$4 sm:$0xff]  }
 0x1cc   :  { %3921 = vmatpush1.bf16.msra.mxu1 %v10356_v40  ;;  %3881 = vmatprep.subr.bf16.mxu0 %v10361_v44  ;;  %v10401_v40 = vld [vmem:[#allocation8 + $0xcc0] ss:$8 sps:$4 sm:$0xff]  }
 0x1cd   :  { %3922 = vmatprep.subr.bf16.mxu1 %v10364_v61  ;;  %v10404_v44 = vld [vmem:[#allocation8 + $0xdc0] ss:$8 sps:$4 sm:$0xff]   ;;  %v10409_v61 = vld [vmem:[#allocation8 + $0xcb4] ss:$8 sps:$4 sm:$0xff]  }
 0x1cf   :  { %3882 = vmatpush1.bf16.msra.mxu0 %v10359_v56  ;;  %v10412_v56 = vld [vmem:[#allocation8 + $0xdb4] ss:$8 sps:$4 sm:$0xff]  }
 0x1d0   :  { %3923 = vmatpush1.bf16.msra.mxu1 %v10362_v60  ;;  %3883 = vmatprep.subr.bf16.mxu0 %v10367_v28  ;;  %v10407_v60 = vld [vmem:[#allocation8 + $0xcb0] ss:$8 sps:$4 sm:$0xff]  }
 0x1d1   :  { %3924 = vmatprep.subr.bf16.mxu1 %v10370_v29  ;;  %v10410_v28 = vld [vmem:[#allocation8 + $0xdb0] ss:$8 sps:$4 sm:$0xff]   ;;  %v10415_v29 = vld [vmem:[#allocation8 + $0xca4] ss:$8 sps:$4 sm:$0xff]  }
 0x1d3   :  { %3884 = vmatpush1.bf16.msra.mxu0 %v10365_v0  ;;  %v10418_v0 = vld [vmem:[#allocation8 + $0xda4] ss:$8 sps:$4 sm:$0xff]  }
 0x1d4   :  { %3925 = vmatpush1.bf16.msra.mxu1 %v10368_v2  ;;  %3885 = vmatprep.subr.bf16.mxu0 %v10373_v4  ;;  %v10413_v2 = vld [vmem:[#allocation8 + $0xca0] ss:$8 sps:$4 sm:$0xff]   ;;  %v100_v4 = vld [vmem:[#allocation2 + $0x38] sm:$0xff] }
 0x1d5   :  { %3926 = vmatprep.subr.bf16.mxu1 %v10376_v9  ;;  %v10416_v9 = vld [vmem:[#allocation8 + $0xda0] ss:$8 sps:$4 sm:$0xff]  }
 0x1d7   :  { %3886 = vmatpush1.bf16.msra.mxu0 %v10371_v11  ;;  %v10421_v11 = vld [vmem:[#allocation8 + $0xc94] ss:$8 sps:$4 sm:$0xff]  }
 0x1d8   :  { %3927 = vmatpush1.bf16.msra.mxu1 %v10374_v12  ;;  %3887 = vmatprep.subr.bf16.mxu0 %v10379_v63  ;;  %v10424_v12 = vld [vmem:[#allocation8 + $0xd94] ss:$8 sps:$4 sm:$0xff]   ;;  %v228_v63 = vcombine.high %v100_v4, %v100_v4 }
 0x1d9   :  { %3928 = vmatprep.subr.bf16.mxu1 %v10382_v18  ;;  %v10419_v18 = vld [vmem:[#allocation8 + $0xc90] ss:$8 sps:$4 sm:$0xff]  }
 0x1db   :  { %3888 = vmatpush1.bf16.msra.mxu0 %v10377_v26  ;;  %v10422_v26 = vld [vmem:[#allocation8 + $0xd90] ss:$8 sps:$4 sm:$0xff]  }
 0x1dc   :  { %3929 = vmatpush1.bf16.msra.mxu1 %v10380_v27  ;;  %3889 = vmatprep.subr.bf16.mxu0 %v10385_v1  ;;  %v10427_v27 = vld [vmem:[#allocation8 + $0xc84] ss:$8 sps:$4 sm:$0xff]  }
 0x1dd   :  { %3930 = vmatprep.subr.bf16.mxu1 %v10388_v19  ;;  %v10430_v1 = vld [vmem:[#allocation8 + $0xd84] ss:$8 sps:$4 sm:$0xff]   ;;  %v11165_v19 = vrot.slane %v100_v4, %v10986_v49 }
 0x1df   :  { %3890 = vmatpush2.bf16.msra.mxu0 %v10383_v20  ;;  %v11168_v20 = vrot.slane %v228_v63, %v10986_v49  ;;  %v10435_v49 = vld [vmem:[#allocation8 + $0xf70] ss:$8 sps:$4 sm:$0xff]  }
 0x1e0   :  { %3931 = vmatpush2.bf16.msra.mxu1 %v10386_v21  ;;  %3891 = vmatprep.subr.bf16.mxu0 %v10391_v22  ;;  %v10425_v21 = vld [vmem:[#allocation8 + $0xc80] ss:$8 sps:$4 sm:$0xff]  }
 0x1e1   :  { %3932 = vmatprep.subr.bf16.mxu1 %v10394_v24  ;;  %v10428_v22 = vld [vmem:[#allocation8 + $0xd80] ss:$8 sps:$4 sm:$0xff]   ;;  %v10434_v24 = vld [vmem:[#allocation8 + $0xe74] ss:$8 sps:$4 sm:$0xff]  }
 0x1e3   :  { %3892 = vmatpush2.bf16.msra.mxu0 %v10389_v25  ;;  %v10437_v25 = vld [vmem:[#allocation8 + $0xf74] ss:$8 sps:$4 sm:$0xff]  }
 0x1e4   :  { %3933 = vmatpush2.bf16.msra.mxu1 %v10392_v30  ;;  %3893 = vmatprep.subr.bf16.mxu0 %v10397_v8  ;;  %v10432_v30 = vld [vmem:[#allocation8 + $0xe70] ss:$8 sps:$4 sm:$0xff]   ;;  %v243_v8 = vcombine.high %v11165_v19, %v11165_v19 }
 0x1e5   :  { %3934 = vmatprep.subr.bf16.mxu1 %v10400_v32  ;;  %v244_v32 = vcombine.high %v11168_v20, %v11168_v20 }
 0x1e7   :  { %3894 = vmatpush2.bf16.msra.mxu0 %v10395_v34  ;;  %v11176_v34 = vpack.c.bf16 %v11133_v52, %v11133_v52 }
 0x1e8   :  { %3935 = vmatpush2.bf16.msra.mxu1 %v10398_v36  ;;  %3895 = vmatprep.subr.bf16.mxu0 %v10403_v41  ;;  %v11180_v36 = vpack.c.bf16 %v11136_v53, %v11136_v53  ;;  %v10440_v41 = vld [vmem:[#allocation8 + $0xe64] ss:$8 sps:$4 sm:$0xff]  }
 0x1e9   :  { %3936 = vmatprep.subr.bf16.mxu1 %v10406_v37  ;;  %v10443_v37 = vld [vmem:[#allocation8 + $0xf64] ss:$8 sps:$4 sm:$0xff]  }
 0x1eb   :  { %3896 = vmatpush2.bf16.msra.mxu0 %v10401_v40  ;;  %v10438_v40 = vld [vmem:[#allocation8 + $0xe60] ss:$8 sps:$4 sm:$0xff]  }
 0x1ec   :  { %3937 = vmatpush2.bf16.msra.mxu1 %v10404_v44  ;;  %3897 = vmatprep.subr.bf16.mxu0 %v10409_v61  ;;  %v11182_v44 = vpack.c.bf16 %v243_v8, %v243_v8  ;;  %v11184_v61 = vpack.c.bf16 %v244_v32, %v244_v32  ;;  %v10459_v8 = vld [vmem:[#allocation8 + $0xf30] ss:$8 sps:$4 sm:$0xff]   ;;  %v10464_v32 = vld [vmem:[#allocation8 + $0xe24] ss:$8 sps:$4 sm:$0xff]  }
 0x1ed   :  { %3938 = vmatprep.subr.bf16.mxu1 %v10412_v56 }
 0x1ef   :  { %3898 = vmatpush2.bf16.msra.mxu0 %v10407_v60  ;;  %v10441_v60 = vld [vmem:[#allocation8 + $0xf60] ss:$8 sps:$4 sm:$0xff]  }
 0x1f0   :  { %3939 = vmatpush2.bf16.msra.mxu1 %v10410_v28  ;;  %3899 = vmatprep.subr.bf16.mxu0 %v10415_v29  ;;  %v10446_v28 = vld [vmem:[#allocation8 + $0xe54] ss:$8 sps:$4 sm:$0xff]  }
 0x1f1   :  { %3940 = vmatprep.subr.bf16.mxu1 %v10418_v0 }
 0x1f3   :  { %3900 = vmatpush2.bf16.msra.mxu0 %v10413_v2  ;;  %v10449_v2 = vld [vmem:[#allocation8 + $0xf54] ss:$8 sps:$4 sm:$0xff]  }
 0x1f4   :  { %3941 = vmatpush2.bf16.msra.mxu1 %v10416_v9  ;;  %3901 = vmatprep.subr.bf16.mxu0 %v10421_v11 }
 0x1f5   :  { %3942 = vmatprep.subr.bf16.mxu1 %v10424_v12  ;;  %v10444_v12 = vld [vmem:[#allocation8 + $0xe50] ss:$8 sps:$4 sm:$0xff]  }
 0x1f7   :  { %3902 = vmatpush2.bf16.msra.mxu0 %v10419_v18  ;;  %v10447_v18 = vld [vmem:[#allocation8 + $0xf50] ss:$8 sps:$4 sm:$0xff]  }
 0x1f8   :  { %3943 = vmatpush2.bf16.msra.mxu1 %v10422_v26  ;;  %3903 = vmatprep.subr.bf16.mxu0 %v10427_v27  ;;  %v10452_v27 = vld [vmem:[#allocation8 + $0xe44] ss:$8 sps:$4 sm:$0xff]  }
 0x1f9   :  { %3944 = vmatprep.subr.bf16.mxu1 %v10430_v1  ;;  %v10455_v1 = vld [vmem:[#allocation8 + $0xf44] ss:$8 sps:$4 sm:$0xff]  }
 0x1fb   :  { %3904 = vmatpush2.bf16.msra.mxu0 %v10425_v21  ;;  %v10450_v21 = vld [vmem:[#allocation8 + $0xe40] ss:$8 sps:$4 sm:$0xff]  }
 0x1fc   :  { %3945 = vmatpush2.bf16.msra.mxu1 %v10428_v22  ;;  %3955 = vmatprep.subr.bf16.mxu0 %v10434_v24  ;;  %v10453_v22 = vld [vmem:[#allocation8 + $0xf40] ss:$8 sps:$4 sm:$0xff]   ;;  %v10458_v24 = vld [vmem:[#allocation8 + $0xe34] ss:$8 sps:$4 sm:$0xff]  }
 0x1fd   :  { %3996 = vmatprep.subr.bf16.mxu1 %v10437_v25  ;;  %v10461_v25 = vld [vmem:[#allocation8 + $0xf34] ss:$8 sps:$4 sm:$0xff]  }
 0x1fe   :  { %v3661_v56 = vpop.f32.mrf.mxu0  ;;  %3906 = vmatmul.mubr.bf16.vlgmr.msra.gmra.mxu0 %v11176_v34 }
 0x1ff   :  { %3947 = vmatmul.mubr.bf16.vlgmr.msra.gmra.mxu1 %v11180_v36  ;;  %v3702_v52 = vpop.f32.mrf.mxu1  ;;  %v3662_v53 = vadd.f32 %v3661_v56, %v11158_v23  ;;  %3956 = vmatpush1.bf16.msra.mxu0 %v10432_v30  ;;  %v10456_v30 = vld [vmem:[#allocation8 + $0xe30] ss:$8 sps:$4 sm:$0xff]   ;;  %v10473_v56 = vld [vmem:[#allocation8 + $0xf14] ss:$8 sps:$4 sm:$0xff]  }
 0x200   :  { %3997 = vmatpush1.bf16.msra.mxu1 %v10435_v49  ;;  %v3663_v29 = vpop.f32.mrf.mxu0  ;;  %3957 = vmatprep.subr.bf16.mxu0 %v10440_v41  ;;  %v10467_v49 = vld [vmem:[#allocation8 + $0xf24] ss:$8 sps:$4 sm:$0xff]   ;;  %v10462_v41 = vld [vmem:[#allocation8 + $0xe20] ss:$8 sps:$4 sm:$0xff]  }
 0x201   :  { %v3704_v0 = vpop.f32.mrf.mxu1  ;;  %3998 = vmatprep.subr.bf16.mxu1 %v10443_v37  ;;  %v3664_v4 = vadd.f32 %v3663_v29, %v11162_v31  ;;  %v11190_v9 = vadd.f32 %v3702_v52, %v3662_v53  ;;  %3987 = vmatprep.mubr.bf16.mxu0 %v11182_v44  ;;  %v10465_v37 = vld [vmem:[#allocation8 + $0xf20] ss:$8 sps:$4 sm:$0xff]   ;;  %v10468_v52 = vld [vmem:[#allocation8 + $0xe10] ss:$8 sps:$4 sm:$0xff]   ;;  %v10476_v53 = vld [vmem:[#allocation8 + $0xe04] ss:$8 sps:$4 sm:$0xff]  }
 0x202   :  { %4028 = vmatprep.mubr.bf16.mxu1 %v11184_v61  ;;  %v3665_v11 = vpop.f32.mrf.mxu0  ;;  %v10474_v29 = vld [vmem:[#allocation8 + $0xe00] ss:$8 sps:$4 sm:$0xff]  }
 0x203   :  { %v3706_v63 = vpop.f32.mrf.mxu1  ;;  %v11194_v23 = vadd.f32 %v3704_v0, %v3664_v4  ;;  %3958 = vmatpush1.bf16.msra.mxu0 %v10438_v40  ;;  %v10470_v40 = vld [vmem:[#allocation8 + $0xe14] ss:$8 sps:$4 sm:$0xff]   ;;  %v10477_v0 = vld [vmem:[#allocation8 + $0xf00] ss:$8 sps:$4 sm:$0xff]   ;;  %v10480_v11 = vld [vmem:[#allocation8 + $0xef0] ss:$8 sps:$4 sm:$0xff]  }
 0x204   :  { %3999 = vmatpush1.bf16.msra.mxu1 %v10441_v60  ;;  %v3666_v26 = vpop.f32.mrf.mxu0  ;;  %3959 = vmatprep.subr.bf16.mxu0 %v10446_v28  ;;  %v10471_v60 = vld [vmem:[#allocation8 + $0xf10] ss:$8 sps:$4 sm:$0xff]   ;;  %v10479_v28 = vld [vmem:[#allocation8 + $0xf04] ss:$8 sps:$4 sm:$0xff]   ;;  %v10485_v4 = vld [vmem:[#allocation8 + $0xff4] ss:$8 sps:$4 sm:$0xff]  }
 0x205   :  { %4000 = vmatprep.subr.bf16.mxu1 %v10449_v2  ;;  %v3707_v31 = vpop.f32.mrf.mxu1  ;;  %v10482_v2 = vld [vmem:[#allocation8 + $0xef4] ss:$8 sps:$4 sm:$0xff]   ;;  %v10488_v63 = vld [vmem:[#allocation8 + $0xee4] ss:$8 sps:$4 sm:$0xff]   ;;  %v10486_v26 = vld [vmem:[#allocation8 + $0xee0] ss:$8 sps:$4 sm:$0xff]  }
 0x206   :  { %v10497_v31 = vld [vmem:[#allocation8 + $0xfd4] ss:$8 sps:$4 sm:$0xff]  }
 0x207   :  { %3960 = vmatpush1.bf16.msra.mxu0 %v10444_v12  ;;  %v10483_v12 = vld [vmem:[#allocation8 + $0xff0] ss:$8 sps:$4 sm:$0xff]  }
 0x208   :  { %4001 = vmatpush1.bf16.msra.mxu1 %v10447_v18  ;;  %3961 = vmatprep.subr.bf16.mxu0 %v10452_v27  ;;  %v10491_v18 = vld [vmem:[#allocation8 + $0xfe4] ss:$8 sps:$4 sm:$0xff]   ;;  %v10489_v27 = vld [vmem:[#allocation8 + $0xfe0] ss:$8 sps:$4 sm:$0xff]  }
 0x209   :  { %4002 = vmatprep.subr.bf16.mxu1 %v10455_v1  ;;  %v10494_v1 = vld [vmem:[#allocation8 + $0xed4] ss:$8 sps:$4 sm:$0xff]  }
 0x20b   :  { %3962 = vmatpush1.bf16.msra.mxu0 %v10450_v21  ;;  %v10492_v21 = vld [vmem:[#allocation8 + $0xed0] ss:$8 sps:$4 sm:$0xff]  }
 0x20c   :  { %4003 = vmatpush1.bf16.msra.mxu1 %v10453_v22  ;;  %3963 = vmatprep.subr.bf16.mxu0 %v10458_v24  ;;  %v10495_v22 = vld [vmem:[#allocation8 + $0xfd0] ss:$8 sps:$4 sm:$0xff]   ;;  %v10500_v24 = vld [vmem:[#allocation8 + $0xec4] ss:$8 sps:$4 sm:$0xff]  }
 0x20d   :  { %4004 = vmatprep.subr.bf16.mxu1 %v10461_v25  ;;  %v10503_v25 = vld [vmem:[#allocation8 + $0xfc4] ss:$8 sps:$4 sm:$0xff]  }
 0x20f   :  { %3964 = vmatpush1.bf16.msra.mxu0 %v10456_v30  ;;  %v10498_v30 = vld [vmem:[#allocation8 + $0xec0] ss:$8 sps:$4 sm:$0xff]  }
 0x210   :  { %4005 = vmatpush1.bf16.msra.mxu1 %v10459_v8  ;;  %3965 = vmatprep.subr.bf16.mxu0 %v10464_v32  ;;  %v10501_v8 = vld [vmem:[#allocation8 + $0xfc0] ss:$8 sps:$4 sm:$0xff]   ;;  %v10506_v32 = vld [vmem:[#allocation8 + $0xeb4] ss:$8 sps:$4 sm:$0xff]  }
 0x211   :  { %4006 = vmatprep.subr.bf16.mxu1 %v10467_v49  ;;  %v10509_v49 = vld [vmem:[#allocation8 + $0xfb4] ss:$8 sps:$4 sm:$0xff]  }
 0x213   :  { %3966 = vmatpush1.bf16.msra.mxu0 %v10462_v41  ;;  %v10504_v41 = vld [vmem:[#allocation8 + $0xeb0] ss:$8 sps:$4 sm:$0xff]  }
 0x214   :  { %4007 = vmatpush1.bf16.msra.mxu1 %v10465_v37  ;;  %3967 = vmatprep.subr.bf16.mxu0 %v10470_v40  ;;  %v10507_v37 = vld [vmem:[#allocation8 + $0xfb0] ss:$8 sps:$4 sm:$0xff]   ;;  %v10512_v40 = vld [vmem:[#allocation8 + $0xea4] ss:$8 sps:$4 sm:$0xff]  }
 0x215   :  { %4008 = vmatprep.subr.bf16.mxu1 %v10473_v56  ;;  %v10515_v56 = vld [vmem:[#allocation8 + $0xfa4] ss:$8 sps:$4 sm:$0xff]  }
 0x217   :  { %3968 = vmatpush1.bf16.msra.mxu0 %v10468_v52  ;;  %v10510_v52 = vld [vmem:[#allocation8 + $0xea0] ss:$8 sps:$4 sm:$0xff]  }
 0x218   :  { %4009 = vmatpush1.bf16.msra.mxu1 %v10471_v60  ;;  %3969 = vmatprep.subr.bf16.mxu0 %v10476_v53  ;;  %v10513_v60 = vld [vmem:[#allocation8 + $0xfa0] ss:$8 sps:$4 sm:$0xff]   ;;  %v10518_v53 = vld [vmem:[#allocation8 + $0xe94] ss:$8 sps:$4 sm:$0xff]  }
 0x219   :  { %4010 = vmatprep.subr.bf16.mxu1 %v10479_v28  ;;  %v10521_v28 = vld [vmem:[#allocation8 + $0xf94] ss:$8 sps:$4 sm:$0xff]  }
 0x21b   :  { %3970 = vmatpush1.bf16.msra.mxu0 %v10474_v29  ;;  %v10516_v29 = vld [vmem:[#allocation8 + $0xe90] ss:$8 sps:$4 sm:$0xff]  }
 0x21c   :  { %4011 = vmatpush1.bf16.msra.mxu1 %v10477_v0  ;;  %3971 = vmatprep.subr.bf16.mxu0 %v10482_v2  ;;  %v10519_v0 = vld [vmem:[#allocation8 + $0xf90] ss:$8 sps:$4 sm:$0xff]   ;;  %v10524_v2 = vld [vmem:[#allocation8 + $0xe84] ss:$8 sps:$4 sm:$0xff]  }
 0x21d   :  { %4012 = vmatprep.subr.bf16.mxu1 %v10485_v4  ;;  %v10527_v4 = vld [vmem:[#allocation8 + $0xf84] ss:$8 sps:$4 sm:$0xff]  }
 0x21f   :  { %3972 = vmatpush2.bf16.msra.mxu0 %v10480_v11  ;;  %v10522_v11 = vld [vmem:[#allocation8 + $0xe80] ss:$8 sps:$4 sm:$0xff]  }
 0x220   :  { %4013 = vmatpush2.bf16.msra.mxu1 %v10483_v12  ;;  %3973 = vmatprep.subr.bf16.mxu0 %v10488_v63  ;;  %v10525_v12 = vld [vmem:[#allocation8 + $0xf80] ss:$8 sps:$4 sm:$0xff]   ;;  %v10529_v63 = vld [vmem:[%s13213_s5 + $0x78] sm:$0xff]  }
 0x221   :  { %4014 = vmatprep.subr.bf16.mxu1 %v10491_v18  ;;  %v10530_v18 = vld [vmem:[%s13213_s5 + $0xf8] sm:$0xff]  }
 0x223   :  { %3974 = vmatpush2.bf16.msra.mxu0 %v10486_v26  ;;  %v10531_v26 = vld [vmem:[%s13213_s5 + $0x38] sm:$0xff]  }
 0x224   :  { %4015 = vmatpush2.bf16.msra.mxu1 %v10489_v27  ;;  %3975 = vmatprep.subr.bf16.mxu0 %v10494_v1  ;;  %v11207_v27 = vpack.c.bf16 %v11165_v19, %v11165_v19  ;;  %v11211_v1 = vpack.c.bf16 %v11168_v20, %v11168_v20  ;;  %v10534_v19 = vld [vmem:[%s13213_s5 + $0xf0] sm:$0xff]  }
 0x225   :  { %4016 = vmatprep.subr.bf16.mxu1 %v10497_v31  ;;  %v10532_v31 = vld [vmem:[%s13213_s5 + $0xb8] sm:$0xff]   ;;  %v10535_v20 = vld [vmem:[%s13213_s5 + $0x30] sm:$0xff]  }
 0x227   :  { %3976 = vmatpush2.bf16.msra.mxu0 %v10492_v21  ;;  %v10533_v21 = vld [vmem:[%s13213_s5 + $0x70] sm:$0xff]  }
 0x228   :  { %4017 = vmatpush2.bf16.msra.mxu1 %v10495_v22  ;;  %3977 = vmatprep.subr.bf16.mxu0 %v10500_v24 }
 0x229   :  { %4018 = vmatprep.subr.bf16.mxu1 %v10503_v25  ;;  %v10536_v25 = vld [vmem:[%s13213_s5 + $0xb0] sm:$0xff]  }
 0x22b   :  { %3978 = vmatpush2.bf16.msra.mxu0 %v10498_v30 }
 0x22c   :  { %4019 = vmatpush2.bf16.msra.mxu1 %v10501_v8  ;;  %3979 = vmatprep.subr.bf16.mxu0 %v10506_v32  ;;  %v10537_v8 = vld [vmem:[%s13213_s5 + $0x68] sm:$0xff]  }
 0x22d   :  { %4020 = vmatprep.subr.bf16.mxu1 %v10509_v49 }
 0x22f   :  { %3980 = vmatpush2.bf16.msra.mxu0 %v10504_v41  ;;  %v10538_v41 = vld [vmem:[%s13213_s5 + $0xe8] sm:$0xff]  }
 0x230   :  { %4021 = vmatpush2.bf16.msra.mxu1 %v10507_v37  ;;  %3981 = vmatprep.subr.bf16.mxu0 %v10512_v40 }
 0x231   :  { %4022 = vmatprep.subr.bf16.mxu1 %v10515_v56  ;;  %v10539_v56 = vld [vmem:[%s13213_s5 + $0x28] sm:$0xff]  }
 0x233   :  { %3982 = vmatpush2.bf16.msra.mxu0 %v10510_v52 }
 0x234   :  { %4023 = vmatpush2.bf16.msra.mxu1 %v10513_v60  ;;  %3983 = vmatprep.subr.bf16.mxu0 %v10518_v53 }
 0x235   :  { %4024 = vmatprep.subr.bf16.mxu1 %v10521_v28 }
 0x237   :  { %3984 = vmatpush2.bf16.msra.mxu0 %v10516_v29  ;;  %v10543_v29 = vld [vmem:[%s13213_s5 + $0x20] sm:$0xff]  }
 0x238   :  { %4025 = vmatpush2.bf16.msra.mxu1 %v10519_v0  ;;  %3985 = vmatprep.subr.bf16.mxu0 %v10524_v2  ;;  %v10544_v0 = vld [vmem:[%s13213_s5 + $0xa0] sm:$0xff]   ;;  %v10545_v2 = vld [vmem:[%s13213_s5 + $0x58] sm:$0xff]  }
 0x239   :  { %4026 = vmatprep.subr.bf16.mxu1 %v10527_v4  ;;  %v10546_v4 = vld [vmem:[%s13213_s5 + $0xd8] sm:$0xff]  }
 0x23b   :  { %3986 = vmatpush2.bf16.msra.mxu0 %v10522_v11  ;;  %v10547_v11 = vld [vmem:[%s13213_s5 + $0x18] sm:$0xff]  }
 0x23c   :  { %4027 = vmatpush2.bf16.msra.mxu1 %v10525_v12  ;;  %9321 = vmatprep.subr.bf16.mxu0 %v10529_v63  ;;  %v10548_v12 = vld [vmem:[%s13213_s5 + $0x98] sm:$0xff]   ;;  %v10549_v63 = vld [vmem:[%s13213_s5 + $0x50] sm:$0xff]  }
 0x23d   :  { %9343 = vmatprep.subr.bf16.mxu1 %v10530_v18  ;;  %v10550_v18 = vld [vmem:[%s13213_s5 + $0xd0] sm:$0xff]  }
 0x23e   :  { %v3743_v22 = vpop.f32.mrf.mxu0  ;;  %3988 = vmatmul.mubr.bf16.vlgmr.msra.gmra.mxu0 %v11207_v27 }
 0x23f   :  { %4029 = vmatmul.mubr.bf16.vlgmr.msra.gmra.mxu1 %v11211_v1  ;;  %v3784_v24 = vpop.f32.mrf.mxu1  ;;  %v3744_v30 = vadd.f32 %v3743_v22, %v11190_v9  ;;  %9322 = vmatpush3.bf16.msra.mxu0 %v10531_v26  ;;  %v10551_v26 = vld [vmem:[%s13213_s5 + $0x10] sm:$0xff]   ;;  %v10556_v22 = vld [vmem:[%s13213_s5 + $0x88] sm:$0xff]  }
 0x240   :  { %9344 = vmatpush3.bf16.msra.mxu1 %v10532_v31  ;;  %v3745_v32 = vpop.f32.mrf.mxu0  ;;  %9323 = vmatprep.subr.bf16.mxu0 %v10533_v21  ;;  %v10552_v31 = vld [vmem:[%s13213_s5 + $0x90] sm:$0xff]   ;;  %v10553_v21 = vld [vmem:[%s13213_s5 + $0x48] sm:$0xff]  }
 0x241   :  { %v3786_v49 = vpop.f32.mrf.mxu1  ;;  %9345 = vmatprep.subr.bf16.mxu1 %v10534_v19  ;;  %v3746_v37 = vadd.f32 %v3745_v32, %v11194_v23  ;;  %v11238_v40 = vadd.f32 %v3784_v24, %v3744_v30  ;;  %6150 = vmatprep.mubr.bf16.mxu0 %v10990_v62  ;;  %v10540_v23 = vld [vmem:[%s13213_s5 + $0xa8] sm:$0xff]   ;;  %v10541_v62 = vld [vmem:[%s13213_s5 + $0x60] sm:$0xff]   ;;  %v10561_v32 = vld [vmem:[%s13213_s5 + $0x178] sm:$0xff]  }
 0x242   :  { %6190 = vmatprep.mubr.bf16.mxu1 %v10992_v3  ;;  %v3747_v9 = vpop.f32.mrf.mxu0  ;;  %v10542_v3 = vld [vmem:[%s13213_s5 + $0xe0] sm:$0xff]   ;;  %v10554_v19 = vld [vmem:[%s13213_s5 + $0xc8] sm:$0xff]  }
 0x243   :  { %v3788_v52 = vpop.f32.mrf.mxu1  ;;  %v11245_v60 = vadd.f32 %v3786_v49, %v3746_v37  ;;  %9324 = vmatpush3.bf16.msra.mxu0 %v10535_v20  ;;  %v10555_v20 = vld [vmem:[%s13213_s5 + $0x8] sm:$0xff]   ;;  %v10557_v24 = vld [vmem:[%s13213_s5 + $0x40] sm:$0xff]   ;;  %v10563_v49 = vld [vmem:[%s13213_s5 + $0x1f8] sm:$0xff]  }
 0x244   :  { %9346 = vmatpush3.bf16.msra.mxu1 %v10536_v25  ;;  %v3748_v53 = vpop.f32.mrf.mxu0  ;;  %9325 = vmatprep.subr.bf16.mxu0 %v10537_v8  ;;  %v10558_v25 = vld [vmem:[%s13213_s5 + $0xc0] sm:$0xff]   ;;  %v10564_v37 = vld [vmem:[%s13213_s5 + $0x1b8] sm:$0xff]   ;;  %v10565_v9 = vld [vmem:[%s13213_s5 + $0x170] sm:$0xff]  }
 0x245   :  { %9347 = vmatprep.subr.bf16.mxu1 %v10538_v41  ;;  %v3789_v28 = vpop.f32.mrf.mxu1  ;;  %v10559_v30 = vld [vmem:[%s13213_s5] sm:$0xff]   ;;  %v10562_v41 = vld [vmem:[%s13213_s5 + $0x138] sm:$0xff]   ;;  %v10566_v52 = vld [vmem:[%s13213_s5 + $0x130] sm:$0xff]  }
 0x246   :  { %v10560_v8 = vld [vmem:[%s13213_s5 + $0x80] sm:$0xff]   ;;  %v10569_v53 = vld [vmem:[%s13213_s5 + $0x168] sm:$0xff]  }
 0x247   :  { %9326 = vmatpush3.bf16.msra.mxu0 %v10539_v56  ;;  %v10567_v56 = vld [vmem:[%s13213_s5 + $0x1f0] sm:$0xff]   ;;  %v10576_v28 = vld [vmem:[%s13213_s5 + $0x1a0] sm:$0xff]  }
 0x248   :  { %9348 = vmatpush3.bf16.msra.mxu1 %v10540_v23  ;;  %9327 = vmatprep.subr.bf16.mxu0 %v10541_v62  ;;  %v10568_v23 = vld [vmem:[%s13213_s5 + $0x1b0] sm:$0xff]   ;;  %v10572_v62 = vld [vmem:[%s13213_s5 + $0x1a8] sm:$0xff]  }
 0x249   :  { %9349 = vmatprep.subr.bf16.mxu1 %v10542_v3  ;;  %v10573_v3 = vld [vmem:[%s13213_s5 + $0x160] sm:$0xff]  }
 0x24b   :  { %9328 = vmatpush3.bf16.msra.mxu0 %v10543_v29  ;;  %v10577_v29 = vld [vmem:[%s13213_s5 + $0x158] sm:$0xff]  }
 0x24c   :  { %9350 = vmatpush3.bf16.msra.mxu1 %v10544_v0  ;;  %9329 = vmatprep.subr.bf16.mxu0 %v10545_v2  ;;  %v10579_v0 = vld [vmem:[%s13213_s5 + $0x1d8] sm:$0xff]  }
 0x24d   :  { %9351 = vmatprep.subr.bf16.mxu1 %v10546_v4  ;;  %v10578_v2 = vld [vmem:[%s13213_s5 + $0x118] sm:$0xff]  }
 0x24e   :  { %v10580_v4 = vld [vmem:[%s13213_s5 + $0x198] sm:$0xff]  }
 0x24f   :  { %9330 = vmatpush3.bf16.msra.mxu0 %v10547_v11  ;;  %v10581_v11 = vld [vmem:[%s13213_s5 + $0x150] sm:$0xff]  }
 0x250   :  { %9352 = vmatpush3.bf16.msra.mxu1 %v10548_v12  ;;  %9331 = vmatprep.subr.bf16.mxu0 %v10549_v63  ;;  %v10583_v12 = vld [vmem:[%s13213_s5 + $0x1d0] sm:$0xff]  }
 0x251   :  { %9353 = vmatprep.subr.bf16.mxu1 %v10550_v18  ;;  %v10582_v63 = vld [vmem:[%s13213_s5 + $0x110] sm:$0xff]  }
 0x252   :  { %v10584_v18 = vld [vmem:[%s13213_s5 + $0x190] sm:$0xff]  }
 0x253   :  { %9332 = vmatpush3.bf16.msra.mxu0 %v10551_v26  ;;  %v10585_v26 = vld [vmem:[%s13213_s5 + $0x148] sm:$0xff]  }
 0x254   :  { %9354 = vmatpush3.bf16.msra.mxu1 %v10552_v31  ;;  %9333 = vmatprep.subr.bf16.mxu0 %v10553_v21  ;;  %v10587_v31 = vld [vmem:[%s13213_s5 + $0x1c8] sm:$0xff]  }
 0x255   :  { %9355 = vmatprep.subr.bf16.mxu1 %v10554_v19  ;;  %v10586_v21 = vld [vmem:[%s13213_s5 + $0x108] sm:$0xff]  }
 0x256   :  { %v10588_v19 = vld [vmem:[%s13213_s5 + $0x188] sm:$0xff]  }
 0x257   :  { %9334 = vmatpush3.bf16.msra.mxu0 %v10555_v20  ;;  %v10589_v20 = vld [vmem:[%s13213_s5 + $0x140] sm:$0xff]  }
 0x258   :  { %9356 = vmatpush3.bf16.msra.mxu1 %v10556_v22  ;;  %9335 = vmatprep.subr.bf16.mxu0 %v10557_v24  ;;  %v10591_v22 = vld [vmem:[%s13213_s5 + $0x1c0] sm:$0xff]  }
 0x259   :  { %9357 = vmatprep.subr.bf16.mxu1 %v10558_v25  ;;  %v10590_v24 = vld [vmem:[%s13213_s5 + $0x100] sm:$0xff]  }
 0x25a   :  { %v10592_v25 = vld [vmem:[%s13213_s5 + $0x180] sm:$0xff]  }
 0x25b   :  { %9336 = vmatpush3.bf16.msra.mxu0 %v10559_v30  ;;  %v10593_v30 = vld [vmem:[%s13213_s5 + $0x278] sm:$0xff]  }
 0x25c   :  { %9358 = vmatpush3.bf16.msra.mxu1 %v10560_v8  ;;  %9365 = vmatprep.subr.bf16.mxu0 %v10561_v32  ;;  %v10595_v8 = vld [vmem:[%s13213_s5 + $0x2f8] sm:$0xff]  }
 0x25d   :  { %9387 = vmatprep.subr.bf16.mxu1 %v10563_v49  ;;  %v10594_v32 = vld [vmem:[%s13213_s5 + $0x238] sm:$0xff]  }
 0x25e   :  { %6151 = vmatmul.mubr.bf16.vlgmr.msra.gmra.mxu0 %v10996_v16  ;;  %v10571_v16 = vld [vmem:[%s13213_s5 + $0x1e8] sm:$0xff]   ;;  %v10596_v49 = vld [vmem:[%s13213_s5 + $0x2b8] sm:$0xff]  }
 0x25f   :  { %6191 = vmatmul.mubr.bf16.vlgmr.msra.gmra.mxu1 %v10998_v17  ;;  %9366 = vmatpush3.bf16.msra.mxu0 %v10562_v41  ;;  %v10570_v17 = vld [vmem:[%s13213_s5 + $0x128] sm:$0xff]   ;;  %v10597_v41 = vld [vmem:[%s13213_s5 + $0x270] sm:$0xff]  }
 0x260   :  { %9388 = vmatpush3.bf16.msra.mxu1 %v10564_v37  ;;  %9367 = vmatprep.subr.bf16.mxu0 %v10565_v9  ;;  %v10599_v37 = vld [vmem:[%s13213_s5 + $0x2f0] sm:$0xff]  }
 0x261   :  { %9389 = vmatprep.subr.bf16.mxu1 %v10567_v56  ;;  %6230 = vmatprep.mubr.bf16.mxu0 %v11010_v54  ;;  %v10575_v54 = vld [vmem:[%s13213_s5 + $0x1e0] sm:$0xff]   ;;  %v10598_v9 = vld [vmem:[%s13213_s5 + $0x230] sm:$0xff]  }
 0x262   :  { %6270 = vmatprep.mubr.bf16.mxu1 %v11014_v58  ;;  %v10574_v58 = vld [vmem:[%s13213_s5 + $0x120] sm:$0xff]  }
 0x263   :  { %9368 = vmatpush3.bf16.msra.mxu0 %v10566_v52 }
 0x264   :  { %9390 = vmatpush3.bf16.msra.mxu1 %v10568_v23  ;;  %9369 = vmatprep.subr.bf16.mxu0 %v10569_v53  ;;  %v10600_v23 = vld [vmem:[%s13213_s5 + $0x2b0] sm:$0xff]  }
 0x265   :  { %9391 = vmatprep.subr.bf16.mxu1 %v10571_v16  ;;  %v10601_v16 = vld [vmem:[%s13213_s5 + $0x268] sm:$0xff]  }
 0x267   :  { %9370 = vmatpush3.bf16.msra.mxu0 %v10570_v17 }
 0x268   :  { %9392 = vmatpush3.bf16.msra.mxu1 %v10572_v62  ;;  %9371 = vmatprep.subr.bf16.mxu0 %v10573_v3 }
 0x269   :  { %9393 = vmatprep.subr.bf16.mxu1 %v10575_v54 }
 0x26b   :  { %9372 = vmatpush3.bf16.msra.mxu0 %v10574_v58  ;;  %v10604_v58 = vld [vmem:[%s13213_s5 + $0x2a8] sm:$0xff]  }
 0x26c   :  { %9394 = vmatpush3.bf16.msra.mxu1 %v10576_v28  ;;  %9373 = vmatprep.subr.bf16.mxu0 %v10577_v29 }
 0x26d   :  { %9395 = vmatprep.subr.bf16.mxu1 %v10579_v0 }
 0x26f   :  { %9374 = vmatpush3.bf16.msra.mxu0 %v10578_v2  ;;  %v10606_v2 = vld [vmem:[%s13213_s5 + $0x220] sm:$0xff]  }
 0x270   :  { %9396 = vmatpush3.bf16.msra.mxu1 %v10580_v4  ;;  %9375 = vmatprep.subr.bf16.mxu0 %v10581_v11  ;;  %v10608_v4 = vld [vmem:[%s13213_s5 + $0x2a0] sm:$0xff]   ;;  %v10609_v11 = vld [vmem:[%s13213_s5 + $0x258] sm:$0xff]  }
 0x271   :  { %9397 = vmatprep.subr.bf16.mxu1 %v10583_v12  ;;  %v10611_v12 = vld [vmem:[%s13213_s5 + $0x2d8] sm:$0xff]  }
 0x273   :  { %9376 = vmatpush3.bf16.msra.mxu0 %v10582_v63  ;;  %v10610_v63 = vld [vmem:[%s13213_s5 + $0x218] sm:$0xff]  }
 0x274   :  { %9398 = vmatpush3.bf16.msra.mxu1 %v10584_v18  ;;  %9377 = vmatprep.subr.bf16.mxu0 %v10585_v26  ;;  %v10612_v18 = vld [vmem:[%s13213_s5 + $0x298] sm:$0xff]   ;;  %v10613_v26 = vld [vmem:[%s13213_s5 + $0x250] sm:$0xff]  }
 0x275   :  { %9399 = vmatprep.subr.bf16.mxu1 %v10587_v31  ;;  %v10615_v31 = vld [vmem:[%s13213_s5 + $0x2d0] sm:$0xff]  }
 0x277   :  { %9378 = vmatpush3.bf16.msra.mxu0 %v10586_v21  ;;  %v10614_v21 = vld [vmem:[%s13213_s5 + $0x210] sm:$0xff]  }
 0x278   :  { %9400 = vmatpush3.bf16.msra.mxu1 %v10588_v19  ;;  %9379 = vmatprep.subr.bf16.mxu0 %v10589_v20  ;;  %v10616_v19 = vld [vmem:[%s13213_s5 + $0x290] sm:$0xff]   ;;  %v10617_v20 = vld [vmem:[%s13213_s5 + $0x248] sm:$0xff]  }
 0x279   :  { %9401 = vmatprep.subr.bf16.mxu1 %v10591_v22  ;;  %v10619_v22 = vld [vmem:[%s13213_s5 + $0x2c8] sm:$0xff]  }
 0x27b   :  { %9380 = vmatpush3.bf16.msra.mxu0 %v10590_v24  ;;  %v10618_v24 = vld [vmem:[%s13213_s5 + $0x208] sm:$0xff]  }
 0x27c   :  { %9402 = vmatpush3.bf16.msra.mxu1 %v10592_v25  ;;  %9409 = vmatprep.subr.bf16.mxu0 %v10593_v30  ;;  %v10620_v25 = vld [vmem:[%s13213_s5 + $0x288] sm:$0xff]   ;;  %v10621_v30 = vld [vmem:[%s13213_s5 + $0x240] sm:$0xff]  }
 0x27d   :  { %9431 = vmatprep.subr.bf16.mxu1 %v10595_v8  ;;  %v10623_v8 = vld [vmem:[%s13213_s5 + $0x2c0] sm:$0xff]  }
 0x27e   :  { %v3825_v56 = vpop.f32.mrf.mxu0  ;;  %6231 = vmatmul.mubr.bf16.vlgmr.msra.gmra.mxu0 %v11020_v33  ;;  %v10603_v33 = vld [vmem:[%s13213_s5 + $0x2e8] sm:$0xff]  }
 0x27f   :  { %v3866_v52 = vpop.f32.mrf.mxu1  ;;  %6271 = vmatmul.mubr.bf16.vlgmr.msra.gmra.mxu1 %v11024_v35  ;;  %v3826_v53 = vadd.f32 %v3825_v56, %v11238_v40  ;;  %9410 = vmatpush3.bf16.msra.mxu0 %v10594_v32  ;;  %v10602_v40 = vld [vmem:[%s13213_s5 + $0x228] sm:$0xff]   ;;  %v10622_v32 = vld [vmem:[%s13213_s5 + $0x200] sm:$0xff]   ;;  %v10628_v56 = vld [vmem:[%s13213_s5 + $0x3b8] sm:$0xff]  }
 0x280   :  { %9432 = vmatpush3.bf16.msra.mxu1 %v10596_v49  ;;  %v3827_v17 = vpop.f32.mrf.mxu0  ;;  %9411 = vmatprep.subr.bf16.mxu0 %v10597_v41  ;;  %v10624_v49 = vld [vmem:[%s13213_s5 + $0x280] sm:$0xff]   ;;  %v10625_v41 = vld [vmem:[%s13213_s5 + $0x378] sm:$0xff]  }
 0x281   :  { %v3868_v62 = vpop.f32.mrf.mxu1  ;;  %9433 = vmatprep.subr.bf16.mxu1 %v10599_v37  ;;  %v3828_v35 = vadd.f32 %v3827_v17, %v11245_v60  ;;  %v11444_v3 = vadd.f32 %v3866_v52, %v3826_v53  ;;  %6310 = vmatprep.mubr.bf16.mxu0 %v11036_v51  ;;  %v10605_v60 = vld [vmem:[%s13213_s5 + $0x260] sm:$0xff]   ;;  %v10627_v37 = vld [vmem:[%s13213_s5 + $0x3f8] sm:$0xff]   ;;  %v10629_v52 = vld [vmem:[%s13213_s5 + $0x370] sm:$0xff]  }
 0x282   :  { %6350 = vmatprep.mubr.bf16.mxu1 %v11041_v55  ;;  %v3829_v54 = vpop.f32.mrf.mxu0  ;;  %v10607_v51 = vld [vmem:[%s13213_s5 + $0x2e0] sm:$0xff]   ;;  %v10630_v53 = vld [vmem:[%s13213_s5 + $0x330] sm:$0xff]   ;;  %v10633_v17 = vld [vmem:[%s13213_s5 + $0x368] sm:$0xff]  }
 0x283   :  { %v3870_v28 = vpop.f32.mrf.mxu1  ;;  %v11454_v29 = vadd.f32 %v3868_v62, %v3828_v35  ;;  %9412 = vmatpush3.bf16.msra.mxu0 %v10598_v9  ;;  %v10626_v9 = vld [vmem:[%s13213_s5 + $0x338] sm:$0xff]   ;;  %v10636_v62 = vld [vmem:[%s13213_s5 + $0x3a8] sm:$0xff]   ;;  %v10640_v35 = vld [vmem:[%s13213_s5 + $0x3a0] sm:$0xff]  }
 0x284   :  { %9434 = vmatpush3.bf16.msra.mxu1 %v10600_v23  ;;  %v3830_v0 = vpop.f32.mrf.mxu0  ;;  %9413 = vmatprep.subr.bf16.mxu0 %v10601_v16  ;;  %v10631_v23 = vld [vmem:[%s13213_s5 + $0x3f0] sm:$0xff]   ;;  %v10643_v54 = vld [vmem:[%s13213_s5 + $0x3d8] sm:$0xff]  }
 0x285   :  { %9435 = vmatprep.subr.bf16.mxu1 %v10603_v33  ;;  %v3871_v55 = vpop.f32.mrf.mxu1  ;;  %v10632_v16 = vld [vmem:[%s13213_s5 + $0x3b0] sm:$0xff]   ;;  %v10637_v33 = vld [vmem:[%s13213_s5 + $0x360] sm:$0xff]   ;;  %v10644_v28 = vld [vmem:[%s13213_s5 + $0x398] sm:$0xff]  }
 0x286   :  { %v10647_v0 = vld [vmem:[%s13213_s5 + $0x3d0] sm:$0xff]  }
 0x287   :  { %9414 = vmatpush3.bf16.msra.mxu0 %v10602_v40  ;;  %v10641_v40 = vld [vmem:[%s13213_s5 + $0x358] sm:$0xff]   ;;  %v10648_v55 = vld [vmem:[%s13213_s5 + $0x390] sm:$0xff]  }
 0x288   :  { %9436 = vmatpush3.bf16.msra.mxu1 %v10604_v58  ;;  %9415 = vmatprep.subr.bf16.mxu0 %v10605_v60  ;;  %v10642_v58 = vld [vmem:[%s13213_s5 + $0x318] sm:$0xff]   ;;  %v10645_v60 = vld [vmem:[%s13213_s5 + $0x350] sm:$0xff]  }
 0x289   :  { %9437 = vmatprep.subr.bf16.mxu1 %v10607_v51  ;;  %v10646_v51 = vld [vmem:[%s13213_s5 + $0x310] sm:$0xff]  }
 0x28b   :  { %9416 = vmatpush3.bf16.msra.mxu0 %v10606_v2  ;;  %v10649_v2 = vld [vmem:[%s13213_s5 + $0x348] sm:$0xff]  }
 0x28c   :  { %9438 = vmatpush3.bf16.msra.mxu1 %v10608_v4  ;;  %9417 = vmatprep.subr.bf16.mxu0 %v10609_v11  ;;  %v10651_v4 = vld [vmem:[%s13213_s5 + $0x3c8] sm:$0xff]  }
 0x28d   :  { %9439 = vmatprep.subr.bf16.mxu1 %v10611_v12  ;;  %v10650_v11 = vld [vmem:[%s13213_s5 + $0x308] sm:$0xff]  }
 0x28e   :  { %v10652_v12 = vld [vmem:[%s13213_s5 + $0x388] sm:$0xff]  }
 0x28f   :  { %9418 = vmatpush3.bf16.msra.mxu0 %v10610_v63  ;;  %v10653_v63 = vld [vmem:[%s13213_s5 + $0x340] sm:$0xff]  }
 0x290   :  { %9440 = vmatpush3.bf16.msra.mxu1 %v10612_v18  ;;  %9419 = vmatprep.subr.bf16.mxu0 %v10613_v26  ;;  %v10655_v18 = vld [vmem:[%s13213_s5 + $0x3c0] sm:$0xff]  }
 0x291   :  { %9441 = vmatprep.subr.bf16.mxu1 %v10615_v31  ;;  %v10654_v26 = vld [vmem:[%s13213_s5 + $0x300] sm:$0xff]  }
 0x292   :  { %v10656_v31 = vld [vmem:[%s13213_s5 + $0x380] sm:$0xff]  }
 0x293   :  { %9420 = vmatpush3.bf16.msra.mxu0 %v10614_v21  ;;  %v10657_v21 = vld [vmem:[%s13213_s5 + $0x478] sm:$0xff]  }
 0x294   :  { %9442 = vmatpush3.bf16.msra.mxu1 %v10616_v19  ;;  %9421 = vmatprep.subr.bf16.mxu0 %v10617_v20  ;;  %v10659_v19 = vld [vmem:[%s13213_s5 + $0x4f8] sm:$0xff]  }
 0x295   :  { %9443 = vmatprep.subr.bf16.mxu1 %v10619_v22  ;;  %v10658_v20 = vld [vmem:[%s13213_s5 + $0x438] sm:$0xff]  }
 0x296   :  { %v10660_v22 = vld [vmem:[%s13213_s5 + $0x4b8] sm:$0xff]  }
 0x297   :  { %9422 = vmatpush3.bf16.msra.mxu0 %v10618_v24  ;;  %v10661_v24 = vld [vmem:[%s13213_s5 + $0x470] sm:$0xff]  }
 0x298   :  { %9444 = vmatpush3.bf16.msra.mxu1 %v10620_v25  ;;  %9423 = vmatprep.subr.bf16.mxu0 %v10621_v30  ;;  %v10663_v25 = vld [vmem:[%s13213_s5 + $0x4f0] sm:$0xff]  }
 0x299   :  { %9445 = vmatprep.subr.bf16.mxu1 %v10623_v8 }
 0x29b   :  { %9424 = vmatpush3.bf16.msra.mxu0 %v10622_v32 }
 0x29c   :  { %9446 = vmatpush3.bf16.msra.mxu1 %v10624_v49  ;;  %9453 = vmatprep.subr.bf16.mxu0 %v10625_v41  ;;  %v10662_v49 = vld [vmem:[%s13213_s5 + $0x430] sm:$0xff]  }
 0x29d   :  { %9475 = vmatprep.subr.bf16.mxu1 %v10627_v37  ;;  %v10664_v41 = vld [vmem:[%s13213_s5 + $0x4b0] sm:$0xff]  }
 0x29e   :  { %6311 = vmatmul.mubr.bf16.vlgmr.msra.gmra.mxu0 %v11056_v7  ;;  %v10635_v7 = vld [vmem:[%s13213_s5 + $0x3e8] sm:$0xff]  }
 0x29f   :  { %6351 = vmatmul.mubr.bf16.vlgmr.msra.gmra.mxu1 %v11060_v10  ;;  %9454 = vmatpush3.bf16.msra.mxu0 %v10626_v9  ;;  %v10634_v10 = vld [vmem:[%s13213_s5 + $0x328] sm:$0xff]  }
 0x2a0   :  { %9476 = vmatpush3.bf16.msra.mxu1 %v10628_v56  ;;  %9455 = vmatprep.subr.bf16.mxu0 %v10629_v52 }
 0x2a1   :  { %9477 = vmatprep.subr.bf16.mxu1 %v10631_v23  ;;  %6390 = vmatprep.mubr.bf16.mxu0 %v11062_v13  ;;  %v10639_v13 = vld [vmem:[%s13213_s5 + $0x3e0] sm:$0xff]  }
 0x2a2   :  { %6430 = vmatprep.mubr.bf16.mxu1 %v11064_v14  ;;  %v10638_v14 = vld [vmem:[%s13213_s5 + $0x320] sm:$0xff]  }
 0x2a3   :  { %9456 = vmatpush3.bf16.msra.mxu0 %v10630_v53 }
 0x2a4   :  { %9478 = vmatpush3.bf16.msra.mxu1 %v10632_v16  ;;  %9457 = vmatprep.subr.bf16.mxu0 %v10633_v17  ;;  %v10666_v16 = vld [vmem:[%s13213_s5 + $0x428] sm:$0xff]  }
 0x2a5   :  { %9479 = vmatprep.subr.bf16.mxu1 %v10635_v7 }
 0x2a7   :  { %9458 = vmatpush3.bf16.msra.mxu0 %v10634_v10  ;;  %v10670_v10 = vld [vmem:[%s13213_s5 + $0x420] sm:$0xff]  }
 0x2a8   :  { %9480 = vmatpush3.bf16.msra.mxu1 %v10636_v62  ;;  %9459 = vmatprep.subr.bf16.mxu0 %v10637_v33  ;;  %v10672_v62 = vld [vmem:[%s13213_s5 + $0x4a0] sm:$0xff]   ;;  %v10673_v33 = vld [vmem:[%s13213_s5 + $0x458] sm:$0xff]  }
 0x2a9   :  { %9481 = vmatprep.subr.bf16.mxu1 %v10639_v13  ;;  %v10675_v13 = vld [vmem:[%s13213_s5 + $0x4d8] sm:$0xff]  }
 0x2ab   :  { %9460 = vmatpush3.bf16.msra.mxu0 %v10638_v14  ;;  %v10674_v14 = vld [vmem:[%s13213_s5 + $0x418] sm:$0xff]  }
 0x2ac   :  { %9482 = vmatpush3.bf16.msra.mxu1 %v10640_v35  ;;  %9461 = vmatprep.subr.bf16.mxu0 %v10641_v40  ;;  %v10676_v35 = vld [vmem:[%s13213_s5 + $0x498] sm:$0xff]   ;;  %v10677_v40 = vld [vmem:[%s13213_s5 + $0x450] sm:$0xff]  }
 0x2ad   :  { %9483 = vmatprep.subr.bf16.mxu1 %v10643_v54  ;;  %v10679_v54 = vld [vmem:[%s13213_s5 + $0x4d0] sm:$0xff]  }
 0x2af   :  { %9462 = vmatpush3.bf16.msra.mxu0 %v10642_v58  ;;  %v10678_v58 = vld [vmem:[%s13213_s5 + $0x410] sm:$0xff]  }
 0x2b0   :  { %9484 = vmatpush3.bf16.msra.mxu1 %v10644_v28  ;;  %9463 = vmatprep.subr.bf16.mxu0 %v10645_v60  ;;  %v10680_v28 = vld [vmem:[%s13213_s5 + $0x490] sm:$0xff]   ;;  %v10681_v60 = vld [vmem:[%s13213_s5 + $0x448] sm:$0xff]  }
 0x2b1   :  { %9485 = vmatprep.subr.bf16.mxu1 %v10647_v0  ;;  %v10683_v0 = vld [vmem:[%s13213_s5 + $0x4c8] sm:$0xff]  }
 0x2b3   :  { %9464 = vmatpush3.bf16.msra.mxu0 %v10646_v51  ;;  %v10682_v51 = vld [vmem:[%s13213_s5 + $0x408] sm:$0xff]  }
 0x2b4   :  { %9486 = vmatpush3.bf16.msra.mxu1 %v10648_v55  ;;  %9465 = vmatprep.subr.bf16.mxu0 %v10649_v2  ;;  %v10684_v55 = vld [vmem:[%s13213_s5 + $0x488] sm:$0xff]   ;;  %v10685_v2 = vld [vmem:[%s13213_s5 + $0x440] sm:$0xff]  }
 0x2b5   :  { %9487 = vmatprep.subr.bf16.mxu1 %v10651_v4  ;;  %v10687_v4 = vld [vmem:[%s13213_s5 + $0x4c0] sm:$0xff]  }
 0x2b7   :  { %9466 = vmatpush3.bf16.msra.mxu0 %v10650_v11  ;;  %v10686_v11 = vld [vmem:[%s13213_s5 + $0x400] sm:$0xff]  }
 0x2b8   :  { %9488 = vmatpush3.bf16.msra.mxu1 %v10652_v12  ;;  %9467 = vmatprep.subr.bf16.mxu0 %v10653_v63  ;;  %v10688_v12 = vld [vmem:[%s13213_s5 + $0x480] sm:$0xff]   ;;  %v10689_v63 = vld [vmem:[%s13213_s5 + $0x578] sm:$0xff]  }
 0x2b9   :  { %9489 = vmatprep.subr.bf16.mxu1 %v10655_v18  ;;  %v10691_v18 = vld [vmem:[%s13213_s5 + $0x5f8] sm:$0xff]  }
 0x2bb   :  { %9468 = vmatpush3.bf16.msra.mxu0 %v10654_v26  ;;  %v10690_v26 = vld [vmem:[%s13213_s5 + $0x538] sm:$0xff]  }
 0x2bc   :  { %9490 = vmatpush3.bf16.msra.mxu1 %v10656_v31  ;;  %9497 = vmatprep.subr.bf16.mxu0 %v10657_v21  ;;  %v10692_v31 = vld [vmem:[%s13213_s5 + $0x5b8] sm:$0xff]   ;;  %v10693_v21 = vld [vmem:[%s13213_s5 + $0x570] sm:$0xff]  }
 0x2bd   :  { %9519 = vmatprep.subr.bf16.mxu1 %v10659_v19  ;;  %v10695_v19 = vld [vmem:[%s13213_s5 + $0x5f0] sm:$0xff]  }
 0x2be   :  { %v3907_v30 = vpop.f32.mrf.mxu0  ;;  %6391 = vmatmul.mubr.bf16.vlgmr.msra.gmra.mxu0 %v11082_v39  ;;  %v10665_v39 = vld [vmem:[%s13213_s5 + $0x468] sm:$0xff]  }
 0x2bf   :  { %v3948_v8 = vpop.f32.mrf.mxu1  ;;  %6431 = vmatmul.mubr.bf16.vlgmr.msra.gmra.mxu1 %v11086_v42  ;;  %v3908_v32 = vadd.f32 %v3907_v30, %v11444_v3  ;;  %9498 = vmatpush3.bf16.msra.mxu0 %v10658_v20  ;;  %v10667_v42 = vld [vmem:[%s13213_s5 + $0x4e8] sm:$0xff]   ;;  %v10694_v20 = vld [vmem:[%s13213_s5 + $0x530] sm:$0xff]   ;;  %v10701_v30 = vld [vmem:[%s13213_s5 + $0x560] sm:$0xff]  }
 0x2c0   :  { %9520 = vmatpush3.bf16.msra.mxu1 %v10660_v22  ;;  %v3909_v37 = vpop.f32.mrf.mxu0  ;;  %9499 = vmatprep.subr.bf16.mxu0 %v10661_v24  ;;  %v10696_v22 = vld [vmem:[%s13213_s5 + $0x5b0] sm:$0xff]   ;;  %v10697_v24 = vld [vmem:[%s13213_s5 + $0x568] sm:$0xff]  }
 0x2c1   :  { %v3950_v9 = vpop.f32.mrf.mxu1  ;;  %9521 = vmatprep.subr.bf16.mxu1 %v10663_v25  ;;  %v3910_v3 = vadd.f32 %v3909_v37, %v11454_v29  ;;  %v11650_v56 = vadd.f32 %v3948_v8, %v3908_v32  ;;  %6470 = vmatprep.mubr.bf16.mxu0 %v11088_v48  ;;  %v10668_v29 = vld [vmem:[%s13213_s5 + $0x4a8] sm:$0xff]   ;;  %v10669_v48 = vld [vmem:[%s13213_s5 + $0x460] sm:$0xff]   ;;  %v10705_v32 = vld [vmem:[%s13213_s5 + $0x558] sm:$0xff]  }
 0x2c2   :  { %6510 = vmatprep.mubr.bf16.mxu1 %v11090_v50  ;;  %v3911_v52 = vpop.f32.mrf.mxu0  ;;  %v10671_v50 = vld [vmem:[%s13213_s5 + $0x4e0] sm:$0xff]   ;;  %v10700_v25 = vld [vmem:[%s13213_s5 + $0x5a8] sm:$0xff]   ;;  %v10708_v37 = vld [vmem:[%s13213_s5 + $0x598] sm:$0xff]  }
 0x2c3   :  { %v3952_v23 = vpop.f32.mrf.mxu1  ;;  %v11654_v53 = vadd.f32 %v3950_v9, %v3910_v3  ;;  %9500 = vmatpush3.bf16.msra.mxu0 %v10662_v49  ;;  %v10704_v8 = vld [vmem:[%s13213_s5 + $0x5a0] sm:$0xff]   ;;  %v10707_v49 = vld [vmem:[%s13213_s5 + $0x5d8] sm:$0xff]   ;;  %v10709_v9 = vld [vmem:[%s13213_s5 + $0x550] sm:$0xff]  }
 0x2c4   :  { %9522 = vmatpush3.bf16.msra.mxu1 %v10664_v41  ;;  %v3912_v17 = vpop.f32.mrf.mxu0  ;;  %9501 = vmatprep.subr.bf16.mxu0 %v10665_v39  ;;  %v10706_v41 = vld [vmem:[%s13213_s5 + $0x518] sm:$0xff]   ;;  %v10711_v39 = vld [vmem:[%s13213_s5 + $0x5d0] sm:$0xff]   ;;  %v10713_v52 = vld [vmem:[%s13213_s5 + $0x548] sm:$0xff]  }
 0x2c5   :  { %9523 = vmatprep.subr.bf16.mxu1 %v10667_v42  ;;  %v3953_v7 = vpop.f32.mrf.mxu1  ;;  %v10710_v42 = vld [vmem:[%s13213_s5 + $0x510] sm:$0xff]   ;;  %v10715_v23 = vld [vmem:[%s13213_s5 + $0x5c8] sm:$0xff]   ;;  %v10717_v17 = vld [vmem:[%s13213_s5 + $0x540] sm:$0xff]  }
 0x2c6   :  { %v10712_v3 = vld [vmem:[%s13213_s5 + $0x590] sm:$0xff]   ;;  %v10720_v7 = vld [vmem:[%s13213_s5 + $0x580] sm:$0xff]  }
 0x2c7   :  { %9502 = vmatpush3.bf16.msra.mxu0 %v10666_v16  ;;  %v10714_v16 = vld [vmem:[%s13213_s5 + $0x508] sm:$0xff]  }
 0x2c8   :  { %9524 = vmatpush3.bf16.msra.mxu1 %v10668_v29  ;;  %9503 = vmatprep.subr.bf16.mxu0 %v10669_v48  ;;  %v10716_v29 = vld [vmem:[%s13213_s5 + $0x588] sm:$0xff]   ;;  %v10719_v48 = vld [vmem:[%s13213_s5 + $0x5c0] sm:$0xff]  }
 0x2c9   :  { %9525 = vmatprep.subr.bf16.mxu1 %v10671_v50  ;;  %v10718_v50 = vld [vmem:[%s13213_s5 + $0x500] sm:$0xff]  }
 0x2cb   :  { %9504 = vmatpush3.bf16.msra.mxu0 %v10670_v10  ;;  %v10721_v10 = vld [vmem:[%s13213_s5 + $0x678] sm:$0xff]  }
 0x2cc   :  { %9526 = vmatpush3.bf16.msra.mxu1 %v10672_v62  ;;  %9505 = vmatprep.subr.bf16.mxu0 %v10673_v33  ;;  %v10723_v62 = vld [vmem:[%s13213_s5 + $0x6f8] sm:$0xff]  }
 0x2cd   :  { %9527 = vmatprep.subr.bf16.mxu1 %v10675_v13  ;;  %v10722_v33 = vld [vmem:[%s13213_s5 + $0x638] sm:$0xff]  }
 0x2ce   :  { %v10724_v13 = vld [vmem:[%s13213_s5 + $0x6b8] sm:$0xff]  }
 0x2cf   :  { %9506 = vmatpush3.bf16.msra.mxu0 %v10674_v14  ;;  %v10725_v14 = vld [vmem:[%s13213_s5 + $0x670] sm:$0xff]  }
 0x2d0   :  { %9528 = vmatpush3.bf16.msra.mxu1 %v10676_v35  ;;  %9507 = vmatprep.subr.bf16.mxu0 %v10677_v40  ;;  %v10727_v35 = vld [vmem:[%s13213_s5 + $0x6f0] sm:$0xff]  }
 0x2d1   :  { %9529 = vmatprep.subr.bf16.mxu1 %v10679_v54 }
 0x2d3   :  { %9508 = vmatpush3.bf16.msra.mxu0 %v10678_v58  ;;  %v9052_v58 = vld.sshfl [vmem:[#allocation5] sm:$0x33 pattern:$0x76325410] }
 0x2d4   :  { %9530 = vmatpush3.bf16.msra.mxu1 %v10680_v28  ;;  %9509 = vmatprep.subr.bf16.mxu0 %v10681_v60  ;;  %v10726_v60 = vld [vmem:[%s13213_s5 + $0x630] sm:$0xff]  }
 0x2d5   :  { %9531 = vmatprep.subr.bf16.mxu1 %v10683_v0  ;;  %v10728_v0 = vld [vmem:[%s13213_s5 + $0x6b0] sm:$0xff]  }
 0x2d7   :  { %9510 = vmatpush3.bf16.msra.mxu0 %v10682_v51 }
 0x2d8   :  { %9532 = vmatpush3.bf16.msra.mxu1 %v10684_v55  ;;  %9511 = vmatprep.subr.bf16.mxu0 %v10685_v2 }
 0x2d9   :  { %9533 = vmatprep.subr.bf16.mxu1 %v10687_v4  ;;  %v4046_v4 = vcombine.high %v9052_v58, %v9052_v58 }
 0x2db   :  { %9512 = vmatpush3.bf16.msra.mxu0 %v10686_v11 }
 0x2dc   :  { %9534 = vmatpush3.bf16.msra.mxu1 %v10688_v12  ;;  %9541 = vmatprep.subr.bf16.mxu0 %v10689_v63 }
 0x2dd   :  { %9563 = vmatprep.subr.bf16.mxu1 %v10691_v18 }
 0x2de   :  { %6471 = vmatmul.mubr.bf16.vlgmr.msra.gmra.mxu0 %v11112_v45  ;;  %v10699_v45 = vld [vmem:[%s13213_s5 + $0x5e8] sm:$0xff]  }
 0x2df   :  { %6511 = vmatmul.mubr.bf16.vlgmr.msra.gmra.mxu1 %v11116_v47  ;;  %9542 = vmatpush3.bf16.msra.mxu0 %v10690_v26  ;;  %v10698_v47 = vld [vmem:[%s13213_s5 + $0x528] sm:$0xff]  }
 0x2e0   :  { %9564 = vmatpush3.bf16.msra.mxu1 %v10692_v31  ;;  %9543 = vmatprep.subr.bf16.mxu0 %v10693_v21  ;;  %v10730_v26 = vld [vmem:[%s13213_s5 + $0x628] sm:$0xff]  }
 0x2e1   :  { %9565 = vmatprep.subr.bf16.mxu1 %v10695_v19  ;;  %6550 = vmatprep.mubr.bf16.mxu0 %v11118_v57  ;;  %v10703_v57 = vld [vmem:[%s13213_s5 + $0x5e0] sm:$0xff]  }
 0x2e2   :  { %6590 = vmatprep.mubr.bf16.mxu1 %v11120_v59  ;;  %v10702_v59 = vld [vmem:[%s13213_s5 + $0x520] sm:$0xff]  }
 0x2e3   :  { %9544 = vmatpush3.bf16.msra.mxu0 %v10694_v20 }
 0x2e4   :  { %9566 = vmatpush3.bf16.msra.mxu1 %v10696_v22  ;;  %9545 = vmatprep.subr.bf16.mxu0 %v10697_v24  ;;  %v10734_v24 = vld [vmem:[%s13213_s5 + $0x620] sm:$0xff]  }
 0x2e5   :  { %9567 = vmatprep.subr.bf16.mxu1 %v10699_v45  ;;  %v10736_v45 = vld [vmem:[%s13213_s5 + $0x6a0] sm:$0xff]  }
 0x2e7   :  { %9546 = vmatpush3.bf16.msra.mxu0 %v10698_v47  ;;  %v10737_v47 = vld [vmem:[%s13213_s5 + $0x658] sm:$0xff]  }
 0x2e8   :  { %9568 = vmatpush3.bf16.msra.mxu1 %v10700_v25  ;;  %9547 = vmatprep.subr.bf16.mxu0 %v10701_v30  ;;  %v10739_v25 = vld [vmem:[%s13213_s5 + $0x6d8] sm:$0xff]  }
 0x2e9   :  { %9569 = vmatprep.subr.bf16.mxu1 %v10703_v57 }
 0x2eb   :  { %9548 = vmatpush3.bf16.msra.mxu0 %v10702_v59 }
 0x2ec   :  { %9570 = vmatpush3.bf16.msra.mxu1 %v10704_v8  ;;  %9549 = vmatprep.subr.bf16.mxu0 %v10705_v32  ;;  %v10738_v8 = vld [vmem:[%s13213_s5 + $0x618] sm:$0xff]  }
 0x2ed   :  { %9571 = vmatprep.subr.bf16.mxu1 %v10707_v49  ;;  %v10740_v32 = vld [vmem:[%s13213_s5 + $0x698] sm:$0xff]   ;;  %v10741_v49 = vld [vmem:[%s13213_s5 + $0x650] sm:$0xff]  }
 0x2ef   :  { %9550 = vmatpush3.bf16.msra.mxu0 %v10706_v41  ;;  %v10743_v41 = vld [vmem:[%s13213_s5 + $0x6d0] sm:$0xff]  }
 0x2f0   :  { %9572 = vmatpush3.bf16.msra.mxu1 %v10708_v37  ;;  %9551 = vmatprep.subr.bf16.mxu0 %v10709_v9  ;;  %v10742_v37 = vld [vmem:[%s13213_s5 + $0x610] sm:$0xff]  }
 0x2f1   :  { %9573 = vmatprep.subr.bf16.mxu1 %v10711_v39  ;;  %v10744_v9 = vld [vmem:[%s13213_s5 + $0x690] sm:$0xff]   ;;  %v10745_v39 = vld [vmem:[%s13213_s5 + $0x648] sm:$0xff]  }
 0x2f3   :  { %9552 = vmatpush3.bf16.msra.mxu0 %v10710_v42  ;;  %v10747_v42 = vld [vmem:[%s13213_s5 + $0x6c8] sm:$0xff]  }
 0x2f4   :  { %9574 = vmatpush3.bf16.msra.mxu1 %v10712_v3  ;;  %9553 = vmatprep.subr.bf16.mxu0 %v10713_v52  ;;  %v10746_v3 = vld [vmem:[%s13213_s5 + $0x608] sm:$0xff]  }
 0x2f5   :  { %9575 = vmatprep.subr.bf16.mxu1 %v10715_v23  ;;  %v10748_v52 = vld [vmem:[%s13213_s5 + $0x688] sm:$0xff]   ;;  %v10749_v23 = vld [vmem:[%s13213_s5 + $0x640] sm:$0xff]  }
 0x2f7   :  { %9554 = vmatpush3.bf16.msra.mxu0 %v10714_v16  ;;  %v10751_v16 = vld [vmem:[%s13213_s5 + $0x6c0] sm:$0xff]  }
 0x2f8   :  { %9576 = vmatpush3.bf16.msra.mxu1 %v10716_v29  ;;  %9555 = vmatprep.subr.bf16.mxu0 %v10717_v17  ;;  %v10750_v29 = vld [vmem:[%s13213_s5 + $0x600] sm:$0xff]  }
 0x2f9   :  { %9577 = vmatprep.subr.bf16.mxu1 %v10719_v48  ;;  %v10752_v17 = vld [vmem:[%s13213_s5 + $0x680] sm:$0xff]   ;;  %v10753_v48 = vld [vmem:[%s13213_s5 + $0x778] sm:$0xff]  }
 0x2fb   :  { %9556 = vmatpush3.bf16.msra.mxu0 %v10718_v50  ;;  %v10755_v50 = vld [vmem:[%s13213_s5 + $0x7f8] sm:$0xff]  }
 0x2fc   :  { %9578 = vmatpush3.bf16.msra.mxu1 %v10720_v7  ;;  %9585 = vmatprep.subr.bf16.mxu0 %v10721_v10  ;;  %v10754_v7 = vld [vmem:[%s13213_s5 + $0x738] sm:$0xff]  }
 0x2fd   :  { %9607 = vmatprep.subr.bf16.mxu1 %v10723_v62  ;;  %v10756_v10 = vld [vmem:[%s13213_s5 + $0x7b8] sm:$0xff]   ;;  %v10757_v62 = vld [vmem:[%s13213_s5 + $0x770] sm:$0xff]  }
 0x2fe   :  { %v3989_v40 = vpop.f32.mrf.mxu0  ;;  %6551 = vmatmul.mubr.bf16.vlgmr.msra.gmra.mxu0 %v11144_v5  ;;  %v10729_v5 = vld [vmem:[%s13213_s5 + $0x668] sm:$0xff]  }
 0x2ff   :  { %v4030_v54 = vpop.f32.mrf.mxu1  ;;  %6591 = vmatmul.mubr.bf16.vlgmr.msra.gmra.mxu1 %v11148_v6  ;;  %v3990_v28 = vadd.f32 %v3989_v40, %v11650_v56  ;;  %9586 = vmatpush3.bf16.msra.mxu0 %v10722_v33  ;;  %v10731_v6 = vld [vmem:[%s13213_s5 + $0x6e8] sm:$0xff]   ;;  %v10759_v33 = vld [vmem:[%s13213_s5 + $0x7f0] sm:$0xff]  }
 0x300   :  { %9608 = vmatpush3.bf16.msra.mxu1 %v10724_v13  ;;  %v3991_v51 = vpop.f32.mrf.mxu0  ;;  %9587 = vmatprep.subr.bf16.mxu0 %v10725_v14  ;;  %v10760_v40 = vld [vmem:[%s13213_s5 + $0x7b0] sm:$0xff]  }
 0x301   :  { %v4032_v55 = vpop.f32.mrf.mxu1  ;;  %9609 = vmatprep.subr.bf16.mxu1 %v10727_v35  ;;  %v3992_v56 = vadd.f32 %v3991_v51, %v11654_v53  ;;  %v4031_v2 = vadd.f32 %v4030_v54, %v3990_v28  ;;  %6630 = vmatprep.mubr.bf16.mxu0 %v11150_v15  ;;  %v10732_v53 = vld [vmem:[%s13213_s5 + $0x6a8] sm:$0xff]   ;;  %v10733_v15 = vld [vmem:[%s13213_s5 + $0x660] sm:$0xff]   ;;  %v10758_v35 = vld [vmem:[%s13213_s5 + $0x730] sm:$0xff]  }
 0x302   :  { %6670 = vmatprep.mubr.bf16.mxu1 %v11152_v46  ;;  %v3993_v11 = vpop.f32.mrf.mxu0  ;;  %v10735_v46 = vld [vmem:[%s13213_s5 + $0x6e0] sm:$0xff]  }
 0x303   :  { %v4034_v12 = vpop.f32.mrf.mxu1  ;;  %v4049_v63 = vsub.f32 %v4031_v2, %v9052_v58  ;;  %v4033_v18 = vadd.f32 %v4032_v55, %v3992_v56  ;;  %9588 = vmatpush3.bf16.msra.mxu0 %v10726_v60  ;;  %v10768_v11 = vld [vmem:[%s13213_s5 + $0x7a0] sm:$0xff]  }
 0x304   :  { %9610 = vmatpush3.bf16.msra.mxu1 %v10728_v0  ;;  %v3994_v31 = vpop.f32.mrf.mxu0  ;;  %9589 = vmatprep.subr.bf16.mxu0 %v10729_v5  ;;  %v10762_v5 = vld [vmem:[%s13213_s5 + $0x728] sm:$0xff]   ;;  %v10769_v12 = vld [vmem:[%s13213_s5 + $0x758] sm:$0xff]  }
 0x305   :  { %9611 = vmatprep.subr.bf16.mxu1 %v10731_v6  ;;  %v4035_v21 = vpop.f32.mrf.mxu1  ;;  %v4051_v19 = vand.u32 2147483647, %v4049_v63  ;;  %v4050_v20 = vsub.f32 %v4033_v18, %v4046_v4  ;;  %v10764_v6 = vld [vmem:[%s13213_s5 + $0x7a8] sm:$0xff]   ;;  %v10766_v4 = vld [vmem:[%s13213_s5 + $0x720] sm:$0xff]   ;;  %v10771_v63 = vld [vmem:[%s13213_s5 + $0x7d8] sm:$0xff]  }
 0x306   :  { %v10770_v18 = vld [vmem:[%s13213_s5 + $0x718] sm:$0xff]   ;;  %v10775_v31 = vld [vmem:[%s13213_s5 + $0x7d0] sm:$0xff]   ;;  %v10777_v21 = vld [vmem:[%s13213_s5 + $0x748] sm:$0xff]  }
 0x307   :  { %v4052_v22 = vand.u32 2147483647, %v4050_v20  ;;  %9590 = vmatpush3.bf16.msra.mxu0 %v10730_v26  ;;  %v4054_v30 = vsel %vm4053_vm0, %v4051_v19, 0.0  ;;  %v10772_v26 = vld [vmem:[%s13213_s5 + $0x798] sm:$0xff]   ;;  %v10779_v19 = vld [vmem:[%s13213_s5 + $0x7c8] sm:$0xff]  }
 0x308   :  { %9612 = vmatpush3.bf16.msra.mxu1 %v10732_v53  ;;  %9591 = vmatprep.subr.bf16.mxu0 %v10733_v15  ;;  %v10773_v53 = vld [vmem:[%s13213_s5 + $0x750] sm:$0xff]   ;;  %v10778_v20 = vld [vmem:[%s13213_s5 + $0x708] sm:$0xff]  }
 0x309   :  { %9613 = vmatprep.subr.bf16.mxu1 %v10735_v46  ;;  %v4055_v57 = vsel %vm4053_vm0, %v4052_v22, 0.0  ;;  %v10774_v15 = vld [vmem:[%s13213_s5 + $0x710] sm:$0xff]   ;;  %v10780_v22 = vld [vmem:[%s13213_s5 + $0x788] sm:$0xff]  }
 0x30a   :  { %v11882_v59 = vadd.f32 %v4055_v57, %v4054_v30  ;;  %v10776_v46 = vld [vmem:[%s13213_s5 + $0x790] sm:$0xff]   ;;  %v10782_v30 = vld [vmem:[%s13213_s5 + $0x700] sm:$0xff]  }
 0x30b   :  { %9592 = vmatpush3.bf16.msra.mxu0 %v10734_v24  ;;  %v10781_v24 = vld [vmem:[%s13213_s5 + $0x740] sm:$0xff]  }
 0x30c   :  { %9614 = vmatpush3.bf16.msra.mxu1 %v10736_v45  ;;  %9593 = vmatprep.subr.bf16.mxu0 %v10737_v47  ;;  %v10783_v45 = vld [vmem:[%s13213_s5 + $0x7c0] sm:$0xff]   ;;  %v12025_v47 = vld [vmem:[%s13209_s1 + $0x70] sm:$0xff] }
 0x30d   :  { %9615 = vmatprep.subr.bf16.mxu1 %v10739_v25  ;;  %v12030_v25 = vld [vmem:[%s13209_s1 + $0x78] sm:$0xff]  ;;  %v10784_v57 = vld [vmem:[%s13213_s5 + $0x780] sm:$0xff]  }
 0x30f   :  { %9594 = vmatpush3.bf16.msra.mxu0 %v10738_v8  ;;  %v7817_v8 = vpack.c.bf16 %v12030_v25, %v12025_v47 }
 0x310   :  { %9616 = vmatpush3.bf16.msra.mxu1 %v10740_v32  ;;  %9595 = vmatprep.subr.bf16.mxu0 %v10741_v49  ;;  %v12043_v32 = vld [vmem:[%s13209_s1 + $0x60] sm:$0xff]  ;;  %v12048_v49 = vld [vmem:[%s13209_s1 + $0x68] sm:$0xff] }
 0x311   :  { %9617 = vmatprep.subr.bf16.mxu1 %v10743_v41  ;;  %v10785_v41 = vld [vmem:[#allocation10] sm:$0xff]  }
 0x313   :  { %9596 = vmatpush3.bf16.msra.mxu0 %v10742_v37  ;;  %v7816_v37 = vpack.c.bf16 %v12048_v49, %v12043_v32 }
 0x314   :  { %9618 = vmatpush3.bf16.msra.mxu1 %v10744_v9  ;;  %9597 = vmatprep.subr.bf16.mxu0 %v10745_v39  ;;  %v12055_v9 = vld [vmem:[%s13209_s1 + $0x50] sm:$0xff]  ;;  %v12060_v39 = vld [vmem:[%s13209_s1 + $0x58] sm:$0xff] }
 0x315   :  { %9619 = vmatprep.subr.bf16.mxu1 %v10747_v42 }
 0x317   :  { %9598 = vmatpush3.bf16.msra.mxu0 %v10746_v3 }
 0x318   :  { %9620 = vmatpush3.bf16.msra.mxu1 %v10748_v52  ;;  %9599 = vmatprep.subr.bf16.mxu0 %v10749_v23 }
 0x319   :  { %9621 = vmatprep.subr.bf16.mxu1 %v10751_v16  ;;  %v7815_v16 = vpack.c.bf16 %v12060_v39, %v12055_v9 }
 0x31b   :  { %9600 = vmatpush3.bf16.msra.mxu0 %v10750_v29 }
 0x31c   :  { %9622 = vmatpush3.bf16.msra.mxu1 %v10752_v17  ;;  %9629 = vmatprep.subr.bf16.mxu0 %v10753_v48  ;;  %v12069_v48 = vld [vmem:[%s13209_s1 + $0x40] sm:$0xff] }
 0x31d   :  { %9651 = vmatprep.subr.bf16.mxu1 %v10755_v50 }
 0x31e   :  { %v9337_v13 = vpop.f32.mrf.mxu0  ;;  %6631 = vmatmul.mubr.bf16.vlgmr.msra.gmra.mxu0 %v11176_v34  ;;  %v10761_v34 = vld [vmem:[%s13213_s5 + $0x768] sm:$0xff]  }
 0x31f   :  { %v9359_v14 = vpop.f32.mrf.mxu1  ;;  %6671 = vmatmul.mubr.bf16.vlgmr.msra.gmra.mxu1 %v11180_v36  ;;  %9630 = vmatpush3.bf16.msra.mxu0 %v10754_v7  ;;  %v10763_v36 = vld [vmem:[%s13213_s5 + $0x7e8] sm:$0xff]  }
 0x320   :  { %9652 = vmatpush3.bf16.msra.mxu1 %v10756_v10  ;;  %v9338_v54 = vpop.f32.mrf.mxu0  ;;  %9631 = vmatprep.subr.bf16.mxu0 %v10757_v62 }
 0x321   :  { %v9360_v58 = vpop.f32.mrf.mxu1  ;;  %9653 = vmatprep.subr.bf16.mxu1 %v10759_v33  ;;  %v9339_v28 = vadd.f32 %v9338_v54, %v9337_v13  ;;  %6710 = vmatprep.mubr.bf16.mxu0 %v11182_v44  ;;  %v10765_v44 = vld [vmem:[%s13213_s5 + $0x760] sm:$0xff]  }
 0x322   :  { %v9361_v60 = vadd.f32 %v9360_v58, %v9359_v14  ;;  %6750 = vmatprep.mubr.bf16.mxu1 %v11184_v61  ;;  %v9340_v0 = vpop.f32.mrf.mxu0  ;;  %v10767_v61 = vld [vmem:[%s13213_s5 + $0x7e0] sm:$0xff]   ;;  %v12082_v14 = vld [vmem:[%s13209_s1 + $0x30] sm:$0xff]  ;;  %v12099_v58 = vld [vmem:[%s13209_s1 + $0x28] sm:$0xff] }
 0x323   :  { %v9362_v51 = vpop.f32.mrf.mxu1  ;;  %9632 = vmatpush3.bf16.msra.mxu0 %v10758_v35  ;;  %v12087_v35 = vld [vmem:[%s13209_s1 + $0x38] sm:$0xff]  ;;  %v12094_v54 = vld [vmem:[%s13209_s1 + $0x20] sm:$0xff] }
 0x324   :  { %v11960_v55 = vadd.f32 %v9361_v60, %v9339_v28  ;;  %9654 = vmatpush3.bf16.msra.mxu1 %v10760_v40  ;;  %v9341_v56 = vpop.f32.mrf.mxu0  ;;  %9633 = vmatprep.subr.bf16.mxu0 %v10761_v34  ;;  %v7813_v40 = vpack.c.bf16 %v12087_v35, %v12082_v14  ;;  %v7812_v34 = vpack.c.bf16 %v12099_v58, %v12094_v54  ;;  %v12111_v28 = vld [vmem:[%s13209_s1 + $0x18] sm:$0xff]  ;;  %v12118_v0 = vld [vmem:[%s13209_s1] sm:$0xff]  ;;  %v12123_v51 = vld [vmem:[%s13209_s1 + $0x8] sm:$0xff] }
 0x325   :  { %9655 = vmatprep.subr.bf16.mxu1 %v10763_v36  ;;  %v9363_v2 = vpop.f32.mrf.mxu1  ;;  %v12106_v36 = vld [vmem:[%s13209_s1 + $0x10] sm:$0xff]  ;;  %7085 = vrot.lane.b32.xlu0 %v12118_v0, %s10920_s10 }
 0x326   :  { %v7811_v60 = vpack.c.bf16 %v12111_v28, %v12106_v36  ;;  %7089 = vrot.lane.b32.xlu1 %v12106_v36, %s10920_s10 }
 0x327   :  { %9634 = vmatpush3.bf16.msra.mxu0 %v10762_v5  ;;  %v10786_v5 = vld [vmem:[#allocation10 + $0x8] sm:$0xff]  }
 0x328   :  { %9656 = vmatpush3.bf16.msra.mxu1 %v10764_v6  ;;  %9635 = vmatprep.subr.bf16.mxu0 %v10765_v44  ;;  %v10787_v6 = vld [vmem:[#allocation10 + $0x10] sm:$0xff]  }
 0x329   :  { %9657 = vmatprep.subr.bf16.mxu1 %v10767_v61  ;;  %7087 = vrot.lane.b32.xlu0 %v12123_v51, %s10920_s10 }
 0x32a   :  { %7091 = vrot.lane.b32.xlu1 %v12111_v28, %s10920_s10 }
 0x32b   :  { %9636 = vmatpush3.bf16.msra.mxu0 %v10766_v4 }
 0x32c   :  { %9658 = vmatpush3.bf16.msra.mxu1 %v10768_v11  ;;  %9637 = vmatprep.subr.bf16.mxu0 %v10769_v12 }
 0x32d   :  { %9659 = vmatprep.subr.bf16.mxu1 %v10771_v63  ;;  %v10788_v63 = vld [vmem:[#allocation10 + $0x18] sm:$0xff]   ;;  %7093 = vrot.lane.b32.xlu0 %v12094_v54, %s10920_s10 }
 0x32e   :  { %7095 = vrot.lane.b32.xlu1 %v12099_v58, %s10920_s10 }
 0x32f   :  { %9638 = vmatpush3.bf16.msra.mxu0 %v10770_v18 }
 0x330   :  { %9660 = vmatpush3.bf16.msra.mxu1 %v10772_v26  ;;  %9639 = vmatprep.subr.bf16.mxu0 %v10773_v53 }
 0x331   :  { %9661 = vmatprep.subr.bf16.mxu1 %v10775_v31  ;;  %7097 = vrot.lane.b32.xlu0 %v12082_v14, %s10920_s10 }
 0x332   :  { %7099 = vrot.lane.b32.xlu1 %v12087_v35, %s10920_s10 }
 0x333   :  { %9640 = vmatpush3.bf16.msra.mxu0 %v10774_v15 }
 0x334   :  { %9662 = vmatpush3.bf16.msra.mxu1 %v10776_v46  ;;  %9641 = vmatprep.subr.bf16.mxu0 %v10777_v21 }
 0x335   :  { %9663 = vmatprep.subr.bf16.mxu1 %v10779_v19  ;;  %7101 = vrot.lane.b32.xlu0 %v12069_v48, %s10920_s10 }
 0x337   :  { %9642 = vmatpush3.bf16.msra.mxu0 %v10778_v20 }
 0x338   :  { %9664 = vmatpush3.bf16.msra.mxu1 %v10780_v22  ;;  %9643 = vmatprep.subr.bf16.mxu0 %v10781_v24 }
 0x339   :  { %9665 = vmatprep.subr.bf16.mxu1 %v10783_v45  ;;  %7105 = vrot.lane.b32.xlu0 %v12055_v9, %s10920_s10 }
 0x33b   :  { %9644 = vmatpush3.bf16.msra.mxu0 %v10782_v30 }
 0x33c   :  { %9666 = vmatpush3.bf16.msra.mxu1 %v10784_v57  ;;  %9693 = vmatprep.subr.bf16.mxu0 %v7817_v8 }
 0x33d   :  { %7107 = vrot.lane.b32.xlu0 %v12060_v39, %s10920_s10 }
 0x33e   :  { %v9381_v42 = vpop.f32.mrf.mxu0  ;;  %6711 = vmatmul.mubr.bf16.vlgmr.msra.gmra.mxu0 %v11207_v27  ;;  %v12074_v27 = vld [vmem:[%s13209_s1 + $0x48] sm:$0xff] }
 0x33f   :  { %v9403_v3 = vpop.f32.mrf.mxu1  ;;  %6751 = vmatmul.mubr.bf16.vlgmr.msra.gmra.mxu1 %v11211_v1  ;;  %9694 = vmatpush3.bf16.msra.mxu0 %v7817_v8  ;;  %v7814_v62 = vpack.c.bf16 %v12074_v27, %v12069_v48 }
 0x340   :  { %9709 = vmatprep.mubr.bf16.mxu0 %v10785_v41  ;;  %v9382_v52 = vpop.f32.mrf.mxu0  ;;  %9695 = vmatprep.subr.bf16.mxu0 %v7816_v37 }
 0x341   :  { %v9404_v23 = vpop.f32.mrf.mxu1  ;;  %v9383_v29 = vadd.f32 %v9382_v52, %v9381_v42  ;;  %7103 = vrot.lane.b32.xlu1 %v12074_v27, %s10920_s10  ;;  %7109 = vrot.lane.b32.xlu0 %v12043_v32, %s10920_s10  ;;  %v10789_v42 = vld [vmem:[%s13215_s7 + $0x18] sm:$0xff]  }
 0x342   :  { %v9405_v17 = vadd.f32 %v9404_v23, %v9403_v3  ;;  %v9384_v1 = vpop.f32.mrf.mxu0  ;;  %v10790_v3 = vld [vmem:[%s13215_s7 + $0x10] sm:$0xff]   ;;  %9717 = vmatprep.subr.bf16.mxu1 %v10789_v42 }
 0x343   :  { %v9406_v50 = vpop.f32.mrf.mxu1  ;;  %v6233_v7 = vadd.f32 %v9383_v29, %v11960_v55  ;;  %9696 = vmatpush3.bf16.msra.mxu0 %v7816_v37  ;;  %v7810_v55 = vpack.c.bf16 %v12123_v51, %v12118_v0  ;;  %9718 = vmatpush3.bf16.msra.mxu1 %v10789_v42 }
 0x344   :  { %v9385_v10 = vpop.f32.mrf.mxu0  ;;  %9697 = vmatprep.subr.bf16.mxu0 %v7815_v16  ;;  %9719 = vmatprep.subr.bf16.mxu1 %v10790_v3 }
 0x345   :  { %v9407_v33 = vpop.f32.mrf.mxu1  ;;  %v6273_v13 = vadd.f32 %v9405_v17, %v6233_v7  ;;  %7111 = vrot.lane.b32.xlu0 %v12048_v49, %s10920_s10 }
 0x347   :  { %9698 = vmatpush3.bf16.msra.mxu0 %v7815_v16  ;;  %9720 = vmatpush3.bf16.msra.mxu1 %v10790_v3  ;;  %v10791_v16 = vld [vmem:[%s13215_s7 + $0x8] sm:$0xff]  }
 0x348   :  { %9699 = vmatprep.subr.bf16.mxu0 %v7814_v62  ;;  %9721 = vmatprep.subr.bf16.mxu1 %v10791_v16 }
 0x349   :  { %7113 = vrot.lane.b32.xlu0 %v12025_v47, %s10920_s10 }
 0x34b   :  { %9700 = vmatpush3.bf16.msra.mxu0 %v7814_v62  ;;  %9722 = vmatpush3.bf16.msra.mxu1 %v10791_v16  ;;  %v10792_v62 = vld [vmem:[%s13215_s7] sm:$0xff]  }
 0x34c   :  { %9701 = vmatprep.subr.bf16.mxu0 %v7813_v40  ;;  %9723 = vmatprep.subr.bf16.mxu1 %v10792_v62 }
 0x34d   :  { %7115 = vrot.lane.b32.xlu0 %v12030_v25, %s10920_s10 }
 0x34f   :  { %9702 = vmatpush3.bf16.msra.mxu0 %v7813_v40  ;;  %9724 = vmatpush3.bf16.msra.mxu1 %v10792_v62 }
 0x350   :  { %9703 = vmatprep.subr.bf16.mxu0 %v7812_v34 }
 0x353   :  { %9704 = vmatpush3.bf16.msra.mxu0 %v7812_v34 }
 0x354   :  { %9705 = vmatprep.subr.bf16.mxu0 %v7811_v60 }
 0x357   :  { %9706 = vmatpush3.bf16.msra.mxu0 %v7811_v60  ;;  %v7022_v60 = vrot.slane %v12123_v51, 1 }
 0x358   :  { %9707 = vmatprep.subr.bf16.mxu0 %v7810_v55 }
 0x35b   :  { %9708 = vmatpush3.bf16.msra.mxu0 %v7810_v55  ;;  %v7024_v55 = vrot.slane %v12106_v36, 1 }
 0x35e   :  { %v9425_v56 = vpop.f32.mrf.mxu0  ;;  %9710 = vmatmul.mubr.bf16.vlgmr.msra.gmra.mxu0 %v10786_v5  ;;  %v7026_v5 = vrot.slane %v12111_v28, 1 }
 0x35f   :  { %v9447_v44 = vpop.f32.mrf.mxu1  ;;  %9713 = vmatprep.mubr.bf16.mxu0 %v10787_v6  ;;  %v7021_v6 = vrot.slane %v12118_v0, 1 }
 0x360   :  { %v9426_v61 = vpop.f32.mrf.mxu0 }
 0x361   :  { %v9448_v2 = vpop.f32.mrf.mxu1  ;;  %v9427_v4 = vadd.f32 %v9426_v61, %v9425_v56  ;;  %v7025_v56 = vsel %vm7020_vm1, %v7022_v60, %v7024_v55  ;;  %v7028_v61 = vrot.slane %v12094_v54, 1 }
 0x362   :  { %v9449_v11 = vadd.f32 %v9448_v2, %v9447_v44  ;;  %v9428_v12 = vpop.f32.mrf.mxu0  ;;  %v7027_v44 = vsel %vm7020_vm1, %v7024_v55, %v7026_v5  ;;  %v12179_v2 = vsub.f32 %v12123_v51, %v7025_v56 }
 0x363   :  { %v9450_v18 = vpop.f32.mrf.mxu1  ;;  %v6313_v26 = vadd.f32 %v9427_v4, %v6273_v13  ;;  %v7023_v4 = vsel %vm7020_vm1, %v7021_v6, %v7022_v60  ;;  %v12188_v12 = vsub.f32 %v12106_v36, %v7027_v44 }
 0x364   :  { %v9429_v53 = vpop.f32.mrf.mxu0  ;;  %7344 = vrot.lane.b32.xlu1 %v12179_v2, %s10920_s10  ;;  %v7030_v18 = vrot.slane %v12099_v58, 1 }
 0x365   :  { %v9451_v31 = vpop.f32.mrf.mxu1  ;;  %v6353_v15 = vadd.f32 %v9449_v11, %v6313_v26  ;;  %v12183_v11 = vsub.f32 %v12118_v0, %v7023_v4 }
 0x366   :  { %9714 = vmatmul.mubr.bf16.gmra.mxu0 %v10788_v63  ;;  %v7029_v63 = vsel %vm7020_vm1, %v7026_v5, %v7028_v61  ;;  %v7031_v53 = vsel %vm7020_vm1, %v7028_v61, %v7030_v18 }
 0x367   :  { %7342 = vrot.lane.b32.xlu0 %v12183_v11, %s10920_s10  ;;  %v12197_v26 = vsub.f32 %v12111_v28, %v7029_v63  ;;  %v12205_v31 = vsub.f32 %v12094_v54, %v7031_v53 }
 0x368   :  { %7346 = vrot.lane.b32.xlu1 %v12188_v12, %s10920_s10 }
 0x36c   :  { %7348 = vrot.lane.b32.xlu1 %v12197_v26, %s10920_s10 }
 0x370   :  { %7350 = vrot.lane.b32.xlu1 %v12205_v31, %s10920_s10 }
 0x37e   :  { %v9469_v46 = vpop.f32.mrf.mxu0 }
 0x37f   :  { %v9491_v21 = vpop.f32.mrf.mxu1 }
 0x380   :  { %v9470_v19 = vpop.f32.mrf.mxu0 }
 0x381   :  { %v9492_v20 = vpop.f32.mrf.mxu1  ;;  %v9471_v22 = vadd.f32 %v9470_v19, %v9469_v46 }
 0x382   :  { %v9493_v24 = vadd.f32 %v9492_v20, %v9491_v21  ;;  %v9472_v45 = vpop.f32.mrf.mxu0 }
 0x383   :  { %v9494_v30 = vpop.f32.mrf.mxu1  ;;  %v6393_v57 = vadd.f32 %v9471_v22, %v6353_v15 }
 0x384   :  { %v9473_v8 = vpop.f32.mrf.mxu0 }
 0x385   :  { %v9495_v41 = vpop.f32.mrf.mxu1  ;;  %v6433_v37 = vadd.f32 %v9493_v24, %v6393_v57 }
 0x398   :  { %v7090_v3 = vpop.permute.xlu1 %7089 }
 0x39e   :  { %v9513_v52 = vpop.f32.mrf.mxu0 }
 0x39f   :  { %v9535_v23 = vpop.f32.mrf.mxu1 }
 0x3a0   :  { %v9514_v29 = vpop.f32.mrf.mxu0 }
 0x3a1   :  { %v9536_v17 = vpop.f32.mrf.mxu1  ;;  %v9515_v1 = vadd.f32 %v9514_v29, %v9513_v52 }
 0x3a2   :  { %v9537_v50 = vadd.f32 %v9536_v17, %v9535_v23  ;;  %v9516_v7 = vpop.f32.mrf.mxu0  ;;  %v7136_v23 = vsel %vm7133_vm2, %v7090_v3, 0.0 }
 0x3a3   :  { %v9538_v10 = vpop.f32.mrf.mxu1  ;;  %v6473_v33 = vadd.f32 %v9515_v1, %v6433_v37  ;;  %v7086_v37 = vpop.permute.xlu0 %7085  ;;  %v12215_v16 = vsub.f32 %v12106_v36, %v7136_v23 }
 0x3a4   :  { %v9517_v13 = vpop.f32.mrf.mxu0  ;;  %v7134_v42 = vsel %vm7133_vm2, %v7086_v37, 0.0  ;;  %v7092_v1 = vpop.permute.xlu1 %7091 }
 0x3a5   :  { %v9539_v40 = vpop.f32.mrf.mxu1  ;;  %v6513_v34 = vadd.f32 %v9537_v50, %v6473_v33  ;;  %v12211_v52 = vsub.f32 %v12118_v0, %v7134_v42  ;;  %v7137_v0 = vsel %vm7133_vm2, %v7092_v1, 0.0 }
 0x3a6   :  { %v12225_v13 = vsub.f32 %v12111_v28, %v7137_v0 }
 0x3a7   :  { %7182 = vrot.lane.b32.xlu0 %v12211_v52, %s10920_s10  ;;  %v7088_v29 = vpop.permute.xlu0 %7087 }
 0x3a8   :  { %v7135_v17 = vsel %vm7133_vm2, %v7088_v29, 0.0 }
 0x3a9   :  { %v12221_v10 = vsub.f32 %v12123_v51, %v7135_v17 }
 0x3ab   :  { %7186 = vrot.lane.b32.xlu0 %v12215_v16, %s10920_s10  ;;  %7184 = vrot.lane.b32.xlu1 %v12221_v10, %s10920_s10 }
 0x3af   :  { %7188 = vrot.lane.b32.xlu0 %v12225_v13, %s10920_s10 }
 0x3be   :  { %v9557_v15 = vpop.f32.mrf.mxu0 }
 0x3bf   :  { %v9579_v46 = vpop.f32.mrf.mxu1 }
 0x3c0   :  { %v9558_v21 = vpop.f32.mrf.mxu0 }
 0x3c1   :  { %v9580_v19 = vpop.f32.mrf.mxu1  ;;  %v9559_v20 = vadd.f32 %v9558_v21, %v9557_v15 }
 0x3c2   :  { %v9581_v22 = vadd.f32 %v9580_v19, %v9579_v46  ;;  %v9560_v24 = vpop.f32.mrf.mxu0 }
 0x3c3   :  { %v9582_v45 = vpop.f32.mrf.mxu1  ;;  %v6553_v30 = vadd.f32 %v9559_v20, %v6513_v34  ;;  %v7094_v34 = vpop.permute.xlu0 %7093 }
 0x3c4   :  { %v9561_v57 = vpop.f32.mrf.mxu0  ;;  %v7138_v51 = vsel %vm7133_vm2, %v7094_v34, 0.0 }
 0x3c5   :  { %v9583_v8 = vpop.f32.mrf.mxu1  ;;  %v6593_v41 = vadd.f32 %v9581_v22, %v6553_v30  ;;  %v12233_v44 = vsub.f32 %v12094_v54, %v7138_v51 }
 0x3c7   :  { %7190 = vrot.lane.b32.xlu0 %v12233_v44, %s10920_s10  ;;  %v12241_v45 = vpop.permute.xlu0 %7097 }
 0x3cb   :  { %v12243_v30 = vpop.permute.xlu0 %7101 }
 0x3cf   :  { %v12245_v8 = vpop.permute.xlu0 %7105 }
 0x3d3   :  { %v12247_v3 = vpop.permute.xlu0 %7107 }
 0x3d7   :  { %v12251_v0 = vpop.permute.xlu0 %7109 }
 0x3db   :  { %v12257_v34 = vpop.permute.xlu0 %7111 }
 0x3de   :  { %v9601_v50 = vpop.f32.mrf.mxu0 }
 0x3df   :  { %v9623_v7 = vpop.f32.mrf.mxu1 }
 0x3e0   :  { %v9602_v62 = vpop.f32.mrf.mxu0 }
 0x3e1   :  { %v9624_v33 = vpop.f32.mrf.mxu1  ;;  %v9603_v36 = vadd.f32 %v9602_v62, %v9601_v50  ;;  %v7096_v50 = vpop.permute.xlu1 %7095 }
 0x3e2   :  { %v9625_v40 = vadd.f32 %v9624_v33, %v9623_v7  ;;  %v9604_v60 = vpop.f32.mrf.mxu0 }
 0x3e3   :  { %v9626_v55 = vpop.f32.mrf.mxu1  ;;  %v6633_v5 = vadd.f32 %v9603_v36, %v6593_v41 }
 0x3e4   :  { %v9605_v6 = vpop.f32.mrf.mxu0  ;;  %v12261_v55 = vpop.permute.xlu0 %7113 }
 0x3e5   :  { %v9627_v56 = vpop.f32.mrf.mxu1  ;;  %v6673_v28 = vadd.f32 %v9625_v40, %v6633_v5  ;;  %v12253_v40 = vpop.permute.xlu1 %7099  ;;  %v7422_v6 = vrot.slane %v12211_v52, 1 }
 0x3e6   :  { %v7423_v56 = vrot.slane %v12221_v10, 1 }
 0x3e8   :  { %v12263_v5 = vpop.permute.xlu0 %7115 }
 0x3e9   :  { %v12259_v60 = vpop.permute.xlu1 %7103 }
 0x3ed   :  { %v7345_v51 = vpop.permute.xlu1 %7344 }
 0x3fe   :  { %v9645_v61 = vpop.f32.mrf.mxu0 }
 0x3ff   :  { %v9667_v4 = vpop.f32.mrf.mxu1 }
 0x400   :  { %v9646_v63 = vpop.f32.mrf.mxu0 }
 0x401   :  { %v9668_v53 = vpop.f32.mrf.mxu1  ;;  %v9647_v15 = vadd.f32 %v9646_v63, %v9645_v61  ;;  %v7347_v61 = vpop.permute.xlu1 %7346  ;;  %v7278_v63 = vrot.slane %v12183_v11, 1 }
 0x402   :  { %v9669_v46 = vadd.f32 %v9668_v53, %v9667_v4  ;;  %v9648_v21 = vpop.f32.mrf.mxu0  ;;  %v7279_v4 = vrot.slane %v12179_v2, 1  ;;  %v7283_v53 = vrot.slane %v12197_v26, 1 }
 0x403   :  { %v9670_v19 = vpop.f32.mrf.mxu1  ;;  %v6713_v20 = vadd.f32 %v9647_v15, %v6673_v28  ;;  %v7139_v28 = vsel %vm7133_vm2, %v7096_v50, 0.0  ;;  %v7425_v15 = vrot.slane %v12215_v16, 1  ;;  %v7281_v21 = vrot.slane %v12188_v12, 1 }
 0x404   :  { %v9649_v22 = vpop.f32.mrf.mxu0  ;;  %v7343_v19 = vpop.permute.xlu0 %7342  ;;  %v7392_v50 = vsel %vm7133_vm2, %v7347_v61, 0.0 }
 0x405   :  { %v9671_v24 = vpop.f32.mrf.mxu1  ;;  %v12239_v54 = vadd.f32 %v9669_v46, %v6713_v20  ;;  %v7427_v46 = vrot.slane %v12225_v13, 1  ;;  %v12275_v20 = vsub.f32 %v12099_v58, %v7139_v28  ;;  %v7424_v22 = vsel %vm7020_vm1, %v7422_v6, %v7423_v56 }
 0x406   :  { %v7390_v24 = vsel %vm7133_vm2, %v7343_v19, 0.0 }
 0x41e   :  { %v9711_v57 = vpop.f32.mrf.mxu0 }
 0x420   :  { %v7876_v41 = vpop.f32.mrf.mxu0 }
 0x422   :  { %v9712_v37 = vpop.f32.mrf.mxu0 }
 0x423   :  { %v7908_v29 = vpack.c.bf16 %v9712_v37, %v9711_v57  ;;  %v13218_v57 = vrot.slane %v12082_v14, 1  ;;  %v7284_v37 = vsel %vm7020_vm1, %v7281_v21, %v7283_v53 }
 0x424   :  { %v7879_v42 = vpop.f32.mrf.mxu0 }
 0x425   :  { %v7907_v23 = vpack.c.bf16 %v7879_v42, %v7876_v41  ;;  %v7280_v41 = vsel %vm7020_vm1, %v7278_v63, %v7279_v4  ;;  %v7391_v42 = vsel %vm7133_vm2, %v7345_v51, 0.0  ;;  %v7328_v51 = vsub.f32 %v12188_v12, %v7284_v37 }
 0x426   :  { %v9715_v17 = vpop.f32.mrf.mxu0  ;;  %v7326_v6 = vsub.f32 %v12183_v11, %v7280_v41  ;;  %v7033_v61 = vsel %vm7020_vm1, %v7030_v18, %v13218_v57  ;;  %v12302_v63 = vand.u32 127, %v113_v38  ;;  %v7285_v18 = vrot.slane %v12205_v31, 1 }
 0x427   :  { %9725 = vmatprep.mubr.msk.bf16.mxu1 %vm7760_vm3, %v7907_v23  ;;  %v7426_v23 = vsel %vm7020_vm1, %v7423_v56, %v7425_v15  ;;  %v7407_v56 = vsub.f32 %v12179_v2, %v7391_v42  ;;  %v12313_v38 = vsub.f32 %v12099_v58, %v7033_v61 }
 0x428   :  { %v7892_v1 = vpop.f32.mrf.mxu0  ;;  %9726 = vmatmul.mubr.msk.bf16.vlgmr.msra.gmra.mxu1 %vm7760_vm3, %v7908_v29  ;;  %v7428_v29 = vsel %vm7020_vm1, %v7425_v15, %v7427_v46  ;;  %v7471_v28 = vsub.f32 %v12221_v10, %v7426_v23  ;;  %vm7647_vm4 = vcmp.lt.s32.totalorder %v12302_v63, 63  ;;  %vm7486_vm5 = vcmp.lt.s32.totalorder %v12302_v63, 62 }
 0x429   :  { %v7472_v15 = vsub.f32 %v12215_v16, %v7428_v29  ;;  %v7665_v37 = vmul.f32 %v7407_v56, %v7407_v56  ;;  %v7287_v56 = vrot.slane %v12313_v38, 1  ;;  %vm8438_vm10 = vcmp.lt.s32.totalorder %v12302_v63, 31 }
 0x42a   :  { %v9716_v7 = vpop.f32.mrf.mxu0  ;;  %v7681_v42 = vmul.f32 %v7471_v28, %v7471_v28  ;;  %vm8357_vm14 = vcmp.lt.s32.totalorder %v12302_v63, 30 }
 0x42b   :  { %v7910_v62 = vpack.c.bf16 %v9716_v7, %v9715_v17  ;;  %v7282_v17 = vsel %vm7020_vm1, %v7279_v4, %v7281_v21  ;;  %v7470_v7 = vsub.f32 %v12211_v52, %v7424_v22 }
 0x42c   :  { %v7895_v33 = vpop.f32.mrf.mxu0  ;;  %v7327_v4 = vsub.f32 %v12179_v2, %v7282_v17  ;;  %v7567_v2 = vmul.f32 %v7326_v6, %v7326_v6  ;;  %v7682_v17 = vmul.f32 %v7472_v15, %v7472_v15  ;;  %v7697_v28 = vadd.f32 %v7681_v42, %v7665_v37 }
 0x42d   :  { %v7909_v36 = vpack.c.bf16 %v7895_v33, %v7892_v1  ;;  %v7429_v1 = vrot.slane %v12233_v44, 1  ;;  %v7349_v33 = vpop.permute.xlu1 %7348  ;;  %v7680_v21 = vmul.f32 %v7470_v7, %v7470_v7 }
 0x42e   :  { %v7393_v22 = vsel %vm7133_vm2, %v7349_v33, 0.0  ;;  %v7568_v29 = vmul.f32 %v7327_v4, %v7327_v4  ;;  %v7599_v61 = vmul.f32 2.5201614e-06, %v7567_v2  ;;  %v7288_v2 = vsel %vm7020_vm1, %v7285_v18, %v7287_v56 }
 0x42f   :  { %9729 = vmatprep.mubr.msk.bf16.mxu1 %vm7760_vm3, %v7909_v36  ;;  %v13217_v36 = vrot.slane %v12275_v20, 1  ;;  %v7409_v7 = vsub.f32 %v12197_v26, %v7393_v22  ;;  %v7713_v42 = vsel %vm7647_vm4, %v7697_v28, 0.0 }
 0x430   :  { %9730 = vmatmul.mubr.msk.bf16.gmra.mxu1 %vm7760_vm3, %v7910_v62  ;;  %v7406_v62 = vsub.f32 %v12183_v11, %v7390_v24  ;;  %v7408_v11 = vsub.f32 %v12188_v12, %v7392_v50  ;;  %v7430_v24 = vsel %vm7020_vm1, %v7427_v46, %v7429_v1  ;;  %v7569_v12 = vmul.f32 %v7328_v51, %v7328_v51 }
 0x431   :  { %v7432_v41 = vsel %vm7020_vm1, %v7429_v1, %v13217_v36  ;;  %v7351_v23 = vpop.permute.xlu1 %7350  ;;  %v7473_v46 = vsub.f32 %v12225_v13, %v7430_v24  ;;  %v7183_v1 = vpop.permute.xlu0 %7182  ;;  %v7286_v51 = vsel %vm7020_vm1, %v7283_v53, %v7285_v18  ;;  %v7600_v22 = vmul.f32 2.5201614e-06, %v7568_v29 }
 0x432   :  { %v7664_v19 = vmul.f32 %v7406_v62, %v7406_v62  ;;  %v7666_v50 = vmul.f32 %v7408_v11, %v7408_v11  ;;  %v7474_v58 = vsub.f32 %v12233_v44, %v7432_v41  ;;  %v7230_v33 = vsel %vm7133_vm2, %v7183_v1, 0.0 }
 0x433   :  { %v7394_v6 = vsel %vm7133_vm2, %v7351_v23, 0.0  ;;  %v7246_v4 = vsub.f32 %v12211_v52, %v7230_v33  ;;  %v7601_v15 = vmul.f32 2.5201614e-06, %v7569_v12  ;;  %v7329_v53 = vsub.f32 %v12197_v26, %v7286_v51 }
 0x434   :  { %v7696_v62 = vadd.f32 %v7680_v21, %v7664_v19  ;;  %v7698_v11 = vadd.f32 %v7682_v17, %v7666_v50  ;;  %v7667_v21 = vmul.f32 %v7409_v7, %v7409_v7  ;;  %v7683_v19 = vmul.f32 %v7473_v46, %v7473_v46 }
 0x435   :  { %v7487_v41 = vmul.f32 %v7246_v4, %v7246_v4  ;;  %v7410_v1 = vsub.f32 %v12205_v31, %v7394_v6  ;;  %v7187_v23 = vpop.permute.xlu0 %7186  ;;  %v7185_v36 = vpop.permute.xlu1 %7184  ;;  %v7684_v57 = vmul.f32 %v7474_v58, %v7474_v58  ;;  %v7570_v18 = vmul.f32 %v7329_v53, %v7329_v53 }
 0x436   :  { %v7712_v24 = vsel %vm7647_vm4, %v7696_v62, 0.0  ;;  %v7232_v37 = vsel %vm7133_vm2, %v7187_v23, 0.0  ;;  %v7231_v52 = vsel %vm7133_vm2, %v7185_v36, 0.0  ;;  %v7714_v26 = vsel %vm7647_vm4, %v7698_v11, 0.0 }
 0x437   :  { %v7503_v12 = vsel %vm7486_vm5, %v7487_v41, 0.0  ;;  %v7248_v29 = vsub.f32 %v12215_v16, %v7232_v37  ;;  %v7247_v17 = vsub.f32 %v12221_v10, %v7231_v52  ;;  %v7728_v50 = vmul.f32 2.5195263e-06, %v7712_v24 }
 0x438   :  { %v7699_v7 = vadd.f32 %v7683_v19, %v7667_v21  ;;  %v7519_v36 = vmul.f32 2.5201614e-06, %v7503_v12  ;;  %v7668_v46 = vmul.f32 %v7410_v1, %v7410_v1  ;;  %v7729_v6 = vmul.f32 2.5195263e-06, %v7713_v42 }
 0x439   :  { %v7489_v62 = vmul.f32 %v7248_v29, %v7248_v29  ;;  %v7488_v58 = vmul.f32 %v7247_v17, %v7247_v17  ;;  %v7189_v33 = vpop.permute.xlu0 %7188  ;;  %v7330_v4 = vsub.f32 %v12205_v31, %v7288_v2  ;;  %v7730_v16 = vmul.f32 2.5195263e-06, %v7714_v26 }
 0x43a   :  { %v7615_v51 = vadd.f32 %v7599_v61, %v7519_v36  ;;  %v7233_v28 = vsel %vm7133_vm2, %v7189_v33, 0.0  ;;  %v7715_v19 = vsel %vm7647_vm4, %v7699_v7, 0.0  ;;  %v7700_v61 = vadd.f32 %v7684_v57, %v7668_v46 }
 0x43b   :  { %v7505_v10 = vsel %vm7486_vm5, %v7489_v62, 0.0  ;;  %v7504_v11 = vsel %vm7486_vm5, %v7488_v58, 0.0  ;;  %v7249_v21 = vsub.f32 %v12225_v13, %v7233_v28  ;;  %v7602_v23 = vmul.f32 2.5201614e-06, %v7570_v18 }
 0x43c   :  { %v7744_v24 = vadd.f32 %v7728_v50, %v7615_v51  ;;  %v7521_v41 = vmul.f32 2.5201614e-06, %v7505_v10  ;;  %v7520_v1 = vmul.f32 2.5201614e-06, %v7504_v11  ;;  %v7571_v2 = vmul.f32 %v7330_v4, %v7330_v4 }
 0x43d   :  { %v7490_v53 = vmul.f32 %v7249_v21, %v7249_v21  ;;  %v7191_v37 = vpop.permute.xlu0 %7190  ;;  %v7731_v12 = vmul.f32 2.5195263e-06, %v7715_v19  ;;  %v7716_v57 = vsel %vm7647_vm4, %v7700_v61, 0.0  ;;  %v7034_v19 = vrot.slane %v12087_v35, 1 }
 0x43e   :  { %v7617_v31 = vadd.f32 %v7601_v15, %v7521_v41  ;;  %v7616_v52 = vadd.f32 %v7600_v22, %v7520_v1  ;;  %v7234_v42 = vsel %vm7133_vm2, %v7191_v37, 0.0  ;;  %v7761_v17 = vsel %vm7760_vm3, %v7744_v24, 0.0 }
 0x43f   :  { %v7506_v29 = vsel %vm7486_vm5, %v7490_v53, 0.0  ;;  %v7250_v13 = vsub.f32 %v12233_v44, %v7234_v42  ;;  %v7603_v62 = vmul.f32 2.5201614e-06, %v7571_v2  ;;  %v7732_v44 = vmul.f32 2.5195263e-06, %v7716_v57 }
 0x440   :  { %v7746_v26 = vadd.f32 %v7730_v16, %v7617_v31  ;;  %v7745_v50 = vadd.f32 %v7729_v6, %v7616_v52  ;;  %v7522_v7 = vmul.f32 2.5201614e-06, %v7506_v29  ;;  %v13239_v1 = vrot.slane %v12082_v14, 1 }
 0x441   :  { %v7491_v36 = vmul.f32 %v7250_v13, %v7250_v13  ;;  %v7141_v31 = vsel %vm7133_vm2, %v12253_v40, 0.0  ;;  %v7143_v42 = vsel %vm7133_vm2, %v12259_v60, 0.0 }
 0x442   :  { %v7764_v15 = vsel %vm7760_vm3, %v7746_v26, 0.0  ;;  %v7762_v22 = vsel %vm7760_vm3, %v7745_v50, 0.0  ;;  %v7618_v46 = vadd.f32 %v7602_v23, %v7522_v7  ;;  %v7035_v61 = vsel %vm7020_vm1, %v13239_v1, %v7034_v19 }
 0x443   :  { %v7763_v58 = vadd.f32 %v7762_v22, %v7761_v17  ;;  %v7507_v18 = vsel %vm7486_vm5, %v7491_v36, 0.0  ;;  %v7140_v23 = vsel %vm7133_vm2, %v12241_v45, 0.0  ;;  %v12383_v53 = vsub.f32 %v12082_v14, %v7035_v61 }
 0x444   :  { %v7747_v33 = vadd.f32 %v7731_v12, %v7618_v46  ;;  %v7523_v51 = vmul.f32 2.5201614e-06, %v7507_v18  ;;  %v12386_v37 = vsub.f32 %v12082_v14, %v7140_v23  ;;  %v12395_v45 = vsub.f32 %v12087_v35, %v7141_v31 }
 0x445   :  { %v7765_v28 = vadd.f32 %v7764_v15, %v7763_v58  ;;  %v7142_v14 = vsel %vm7133_vm2, %v12243_v30, 0.0  ;;  %v12418_v30 = vsub.f32 %v12074_v27, %v7143_v42  ;;  %v7144_v17 = vsel %vm7133_vm2, %v12245_v8, 0.0 }
 0x446   :  { %v7766_v6 = vsel %vm7760_vm3, %v7747_v33, 0.0  ;;  %v7619_v4 = vadd.f32 %v7603_v62, %v7523_v51  ;;  %v12406_v2 = vsub.f32 %v12069_v48, %v7142_v14  ;;  %v7036_v7 = vrot.slane %v12069_v48, 1 }
 0x447   :  { %v7767_v16 = vadd.f32 %v7766_v6, %v7765_v28  ;;  %v12441_v57 = vsub.f32 %v12055_v9, %v7144_v17  ;;  %v7145_v36 = vsel %vm7133_vm2, %v12247_v3, 0.0  ;;  %v7038_v22 = vrot.slane %v12074_v27, 1 }
 0x448   :  { %v7748_v10 = vadd.f32 %v7732_v44, %v7619_v4  ;;  %v7037_v15 = vsel %vm7020_vm1, %v7034_v19, %v7036_v7  ;;  %v12454_v46 = vsub.f32 %v12060_v39, %v7145_v36  ;;  %v7146_v62 = vsel %vm7133_vm2, %v12251_v0, 0.0 }
 0x449   :  { %v12465_v3 = vsub.f32 %v12087_v35, %v7037_v15  ;;  %v7039_v18 = vsel %vm7020_vm1, %v7036_v7, %v7038_v22  ;;  %v7040_v44 = vrot.slane %v12055_v9, 1  ;;  %v12470_v33 = vsub.f32 %v12043_v32, %v7146_v62 }
 0x44a   :  { %v7768_v11 = vsel %vm7760_vm3, %v7748_v10, 0.0  ;;  %13240 = vst [vmem:[#allocation16_spill] sm:$0xff] %v12454_v46  ;;  %v7147_v0 = vsel %vm7133_vm2, %v12257_v34, 0.0  ;;  %v12479_v51 = vsub.f32 %v12069_v48, %v7039_v18  ;;  %v7148_v6 = vsel %vm7133_vm2, %v12261_v55, 0.0 }
 0x44b   :  { %v12364_v21 = vadd.f32 %v7768_v11, %v7767_v16  ;;  %13241 = vst [vmem:[#allocation17_spill] sm:$0xff] %v12465_v3  ;;  %13242 = vst [vmem:[#allocation18_spill] sm:$0xff] %v12470_v33  ;;  %v7041_v35 = vsel %vm7020_vm1, %v7038_v22, %v7040_v44  ;;  %v12483_v28 = vsub.f32 %v12048_v49, %v7147_v0  ;;  %v7042_v4 = vrot.slane %v12060_v39, 1 }
 0x44c   :  { %13243 = vst [vmem:[#allocation19_spill] sm:$0xff] %v12479_v51  ;;  %v12492_v34 = vsub.f32 %v12074_v27, %v7041_v35  ;;  %v12497_v16 = vsub.f32 %v12025_v47, %v7148_v6  ;;  %v7044_v1 = vrot.slane %v12043_v32, 1  ;;  %v7046_v31 = vrot.slane %v12048_v49, 1 }
 0x44d   :  { %13244 = vst [vmem:[#allocation20_spill] sm:$0xff] %v12483_v28  ;;  %v7043_v55 = vsel %vm7020_vm1, %v7040_v44, %v7042_v4  ;;  %v7050_v17 = vrot.slane %v12030_v25, 1  ;;  %v7289_v35 = vrot.slane %v12383_v53, 1  ;;  %v7433_v6 = vrot.slane %v12386_v37, 1 }
 0x44e   :  { %13245 = vst [vmem:[#allocation21_spill] sm:$0xff] %v12492_v34  ;;  %13246 = vst [vmem:[#allocation22_spill] sm:$0xff] %v12497_v16  ;;  %v12514_v19 = vsub.f32 %v12055_v9, %v7043_v55  ;;  %v7045_v23 = vsel %vm7020_vm1, %v7042_v4, %v7044_v1  ;;  %v7047_v42 = vsel %vm7020_vm1, %v7044_v1, %v7046_v31  ;;  %v7291_v55 = vrot.slane %v12465_v3, 1 }
 0x44f   :  { %v12528_v9 = vsub.f32 %v12060_v39, %v7045_v23  ;;  %v13248_v1 = vrot.slane %v12275_v20, 1 }
 0x4e8   :  { %v12367_v24 = vpop.f32.mrf.mxu1 }
 0x4e9   :  { %8160 = vrot.lane.b32.xlu1 %v12367_v24, %s10920_s10  ;;  %v8127_v48 = vrot.slane %v12367_v24, 1 }
 0x4ea   :  { %v12371_v41 = vpop.f32.mrf.mxu1 }
 0x4eb   :  { %8156 = vrot.lane.b32.xlu0 %v12371_v41, %s10920_s10  ;;  %v8124_v29 = vrot.slane %v12371_v41, 1 }
 0x4ec   :  { %v12397_v52 = vpop.f32.mrf.mxu1 }
 0x4ed   :  { %7352 = vrot.lane.b32.xlu1 %v12313_v38, %s10920_s10  ;;  %v8129_v11 = vrot.slane %v12397_v52, 1 }
 0x4ee   :  { %v12408_v40 = vpop.f32.mrf.mxu1 }
 0x4ef   :  { %7192 = vrot.lane.b32.xlu0 %v12275_v20, %s10920_s10  ;;  %v8125_v12 = vrot.slane %v12408_v40, 1  ;;  %v8130_v61 = vsel %vm7020_vm1, %v8127_v48, %v8129_v11 }
 0x4f0   :  { %v12423_v13 = vpop.f32.mrf.mxu1  ;;  %v12523_v14 = vsub.f32 %v12367_v24, %v8130_v61  ;;  %v7434_v61 = vsel %vm7020_vm1, %v13248_v1, %v7433_v6 }
 0x4f1   :  { %7354 = vrot.lane.b32.xlu1 %v12383_v53, %s10920_s10  ;;  %v8126_v60 = vsel %vm7020_vm1, %v8124_v29, %v8125_v12  ;;  %v8128_v10 = vsel %vm7020_vm1, %v8125_v12, %v8127_v48  ;;  %v7048_v12 = vrot.slane %v12025_v47, 1  ;;  %v12535_v29 = vsub.f32 %v12043_v32, %v7047_v42 }
 0x4f2   :  { %v12432_v26 = vpop.f32.mrf.mxu1  ;;  %v12437_v50 = vsub.f32 %v12371_v41, %v8126_v60  ;;  %v12506_v27 = vsub.f32 %v12408_v40, %v8128_v10  ;;  %v8135_v18 = vrot.slane %v12423_v13, 1  ;;  %v7435_v48 = vrot.slane %v12395_v45, 1 }
 0x4f3   :  { %7194 = vrot.lane.b32.xlu0 %v12386_v37, %s10920_s10  ;;  %v7049_v60 = vsel %vm7020_vm1, %v7046_v31, %v7048_v12  ;;  %v7051_v7 = vsel %vm7020_vm1, %v7048_v12, %v7050_v17  ;;  %v8131_v36 = vrot.slane %v12432_v26, 1  ;;  %v7290_v10 = vsel %vm7020_vm1, %v7287_v56, %v7289_v35 }
 0x4f4   :  { %v12447_v8 = vpop.f32.mrf.mxu1  ;;  %v12542_v39 = vsub.f32 %v12048_v49, %v7049_v60  ;;  %v12551_v32 = vsub.f32 %v12025_v47, %v7051_v7  ;;  %v7331_v12 = vsub.f32 %v12313_v38, %v7290_v10  ;;  %v7475_v60 = vsub.f32 %v12275_v20, %v7434_v61 }
 0x4f5   :  { %8162 = vrot.lane.b32.xlu1 %v12397_v52, %s10920_s10  ;;  %v8132_v22 = vsel %vm7020_vm1, %v8129_v11, %v8131_v36  ;;  %v7436_v56 = vsel %vm7020_vm1, %v7433_v6, %v7435_v48 }
 0x4f6   :  { %v12460_v58 = vpop.f32.mrf.mxu1  ;;  %v12558_v49 = vsub.f32 %v12397_v52, %v8132_v22  ;;  %v7476_v10 = vsub.f32 %v12386_v37, %v7436_v56  ;;  %v7685_v6 = vmul.f32 %v7475_v60, %v7475_v60 }
 0x4f7   :  { %7196 = vrot.lane.b32.xlu0 %v12395_v45, %s10920_s10  ;;  %v8133_v15 = vrot.slane %v12460_v58, 1 }
 0x4f8   :  { %13247 = vst [vmem:[#allocation23_spill] sm:$0xff] %v12558_v49 }
 0x4f9   :  { %8158 = vrot.lane.b32.xlu1 %v12408_v40, %s10920_s10  ;;  %v8134_v62 = vsel %vm7020_vm1, %v8131_v36, %v8133_v15  ;;  %v8136_v44 = vsel %vm7020_vm1, %v8133_v15, %v8135_v18 }
 0x4fa   :  { %v12565_v47 = vsub.f32 %v12432_v26, %v8134_v62  ;;  %v12573_v0 = vsub.f32 %v12460_v58, %v8136_v44  ;;  %v7572_v44 = vmul.f32 %v7331_v12, %v7331_v12 }
 0x4fb   :  { %7198 = vrot.lane.b32.xlu0 %v12406_v2, %s10920_s10 }
 0x4fd   :  { %8168 = vrot.lane.b32.xlu1 %v12423_v13, %s10920_s10 }
 0x4ff   :  { %7200 = vrot.lane.b32.xlu0 %v12418_v30, %s10920_s10 }
 0x501   :  { %8164 = vrot.lane.b32.xlu1 %v12432_v26, %s10920_s10 }
 0x503   :  { %8285 = vrot.lane.b32.xlu0 %v12437_v50, %s10920_s10 }
 0x505   :  { %8170 = vrot.lane.b32.xlu1 %v12447_v8, %s10920_s10 }
 0x507   :  { %7202 = vrot.lane.b32.xlu0 %v12441_v57, %s10920_s10 }
 0x509   :  { %8166 = vrot.lane.b32.xlu1 %v12460_v58, %s10920_s10 }
 0x50b   :  { %7204 = vrot.lane.b32.xlu0 %v12454_v46, %s10920_s10 }
 0x50d   :  { %7356 = vrot.lane.b32.xlu1 %v12465_v3, %s10920_s10 }
 0x50f   :  { %7206 = vrot.lane.b32.xlu0 %v12470_v33, %s10920_s10 }
 0x511   :  { %7358 = vrot.lane.b32.xlu1 %v12479_v51, %s10920_s10 }
 0x513   :  { %7208 = vrot.lane.b32.xlu0 %v12483_v28, %s10920_s10 }
 0x515   :  { %7360 = vrot.lane.b32.xlu1 %v12492_v34, %s10920_s10 }
 0x517   :  { %7210 = vrot.lane.b32.xlu0 %v12497_v16, %s10920_s10 }
 0x519   :  { %8287 = vrot.lane.b32.xlu1 %v12506_v27, %s10920_s10 }
 0x51d   :  { %7362 = vrot.lane.b32.xlu1 %v12514_v19, %s10920_s10 }
 0x521   :  { %8289 = vrot.lane.b32.xlu1 %v12523_v14, %s10920_s10 }
 0x525   :  { %7364 = vrot.lane.b32.xlu1 %v12528_v9, %s10920_s10 }
 0x529   :  { %7366 = vrot.lane.b32.xlu1 %v12535_v29, %s10920_s10 }
 0x52d   :  { %7368 = vrot.lane.b32.xlu1 %v12542_v39, %s10920_s10 }
 0x531   :  { %7370 = vrot.lane.b32.xlu1 %v12551_v32, %s10920_s10 }
 0x535   :  { %8291 = vrot.lane.b32.xlu1 %v12558_v49, %s10920_s10 }
 0x539   :  { %8293 = vrot.lane.b32.xlu1 %v12565_v47, %s10920_s10 }
 0x53d   :  { %8295 = vrot.lane.b32.xlu1 %v12573_v0, %s10920_s10 }
 0x55b   :  { %v8161_v4 = vpop.permute.xlu1 %8160 }
 0x55c   :  { %v8183_v11 = vsel %vm8180_vm6, %v8161_v4, 0.0 }
 0x55d   :  { %v12589_v23 = vsub.f32 %v12367_v24, %v8183_v11  ;;  %v8157_v31 = vpop.permute.xlu0 %8156  ;;  %v7292_v24 = vsel %vm7020_vm1, %v7289_v35, %v7291_v55 }
 0x55e   :  { %v8181_v42 = vsel %vm8180_vm6, %v8157_v31, 0.0  ;;  %v7332_v11 = vsub.f32 %v12383_v53, %v7292_v24 }
 0x55f   :  { %v7353_v7 = vpop.permute.xlu1 %7352  ;;  %8209 = vrot.lane.b32.xlu0 %v12589_v23, %s10920_s10  ;;  %v12604_v15 = vsub.f32 %v12371_v41, %v8181_v42 }
 0x560   :  { %v7395_v36 = vsel %vm7133_vm2, %v7353_v7, 0.0  ;;  %v7604_v7 = vmul.f32 2.5201614e-06, %v7572_v44  ;;  %v7573_v56 = vmul.f32 %v7332_v11, %v7332_v11 }
 0x561   :  { %v7411_v22 = vsub.f32 %v12313_v38, %v7395_v36  ;;  %v7193_v62 = vpop.permute.xlu0 %7192  ;;  %v7686_v36 = vmul.f32 %v7476_v10, %v7476_v10 }
 0x562   :  { %v7235_v4 = vsel %vm7133_vm2, %v7193_v62, 0.0 }
 0x563   :  { %v7669_v1 = vmul.f32 %v7411_v22, %v7411_v22  ;;  %v7251_v61 = vsub.f32 %v12275_v20, %v7235_v4  ;;  %v7355_v35 = vpop.permute.xlu1 %7354  ;;  %8205 = vrot.lane.b32.xlu0 %v12604_v15, %s10920_s10 }
 0x564   :  { %v7396_v41 = vsel %vm7133_vm2, %v7355_v35, 0.0 }
 0x565   :  { %v7701_v31 = vadd.f32 %v7685_v6, %v7669_v1  ;;  %v7492_v38 = vmul.f32 %v7251_v61, %v7251_v61  ;;  %v7412_v42 = vsub.f32 %v12383_v53, %v7396_v41  ;;  %v7195_v12 = vpop.permute.xlu0 %7194  ;;  %v7149_v53 = vsel %vm7133_vm2, %v12263_v5, 0.0 }
 0x566   :  { %v7236_v24 = vsel %vm7133_vm2, %v7195_v12, 0.0  ;;  %v8137_v61 = vrot.slane %v12447_v8, 1 }
 0x567   :  { %v7717_v60 = vsel %vm7647_vm4, %v7701_v31, 0.0  ;;  %v7508_v20 = vsel %vm7486_vm5, %v7492_v38, 0.0  ;;  %v7670_v22 = vmul.f32 %v7412_v42, %v7412_v42  ;;  %v7252_v62 = vsub.f32 %v12386_v37, %v7236_v24  ;;  %v8163_v4 = vpop.permute.xlu1 %8162 }
 0x568   :  { %v7524_v6 = vmul.f32 2.5201614e-06, %v7508_v20  ;;  %v8184_v1 = vsel %vm8180_vm6, %v8163_v4, 0.0  ;;  %v7733_v35 = vmul.f32 2.5195263e-06, %v7717_v60 }
 0x569   :  { %v7702_v44 = vadd.f32 %v7686_v36, %v7670_v22  ;;  %v7493_v10 = vmul.f32 %v7252_v62, %v7252_v62  ;;  %v12625_v11 = vsub.f32 %v12397_v52, %v8184_v1  ;;  %v7605_v31 = vmul.f32 2.5201614e-06, %v7573_v56  ;;  %v10793_v36 = vld [vmem:[%s13209_s1 + $0x78] sm:$0xff] }
 0x56a   :  { %v7620_v41 = vadd.f32 %v7604_v7, %v7524_v6  ;;  %v12638_v7 = vsub.f32 %v10793_v36, %v7149_v53  ;;  %v8138_v22 = vsel %vm7020_vm1, %v8135_v18, %v8137_v61  ;;  %v7068_v1 = vsel %vm7020_vm1, %v7050_v17, 0.0 }
 0x56b   :  { %v7718_v37 = vsel %vm7647_vm4, %v7702_v44, 0.0  ;;  %v7509_v38 = vsel %vm7486_vm5, %v7493_v10, 0.0  ;;  %v8159_v42 = vpop.permute.xlu1 %8158  ;;  %8211 = vrot.lane.b32.xlu0 %v12625_v11, %s10920_s10  ;;  %v12660_v18 = vsub.f32 %v12423_v13, %v8138_v22  ;;  %v12669_v25 = vsub.f32 %v10793_v36, %v7068_v1 }
 0x56c   :  { %v7749_v5 = vadd.f32 %v7733_v35, %v7620_v41  ;;  %v7525_v12 = vmul.f32 2.5201614e-06, %v7509_v38  ;;  %v8182_v52 = vsel %vm8180_vm6, %v8159_v42, 0.0  ;;  %13249 = vst [vmem:[#allocation24_spill] sm:$0xff] %v12638_v7  ;;  %v7734_v60 = vmul.f32 2.5195263e-06, %v7718_v37 }
 0x56d   :  { %v12641_v56 = vsub.f32 %v12408_v40, %v8182_v52  ;;  %13251 = vst [vmem:[#allocation26_spill] sm:$0xff] %v12660_v18  ;;  %13253 = vst [vmem:[#allocation28_spill] sm:$0xff] %v12669_v25  ;;  %v7439_v52 = vrot.slane %v12418_v30, 1  ;;  %v7441_v36 = vrot.slane %v12441_v57, 1  ;;  %v7445_v1 = vrot.slane %v12470_v33, 1 }
 0x56e   :  { %v7770_v24 = vsel %vm7760_vm3, %v7749_v5, 0.0  ;;  %v7621_v20 = vadd.f32 %v7605_v31, %v7525_v12  ;;  %v6758_v5 = vld [vmem:[#allocation7] sm:$0x3]  ;;  %v7437_v12 = vrot.slane %v12406_v2, 1 }
 0x56f   :  { %v7771_v62 = vadd.f32 %v7770_v24, %v12364_v21  ;;  %7212 = vrot.lane.b32.xlu0 %v12638_v7, %s10920_s10  ;;  %v8169_v4 = vpop.permute.xlu1 %8168  ;;  %8207 = vrot.lane.b32.xlu1 %v12641_v56, %s10920_s10  ;;  %v6759_v24 = vsub.f32 %v12239_v54, %v6758_v5 }
 0x570   :  { %v7750_v6 = vadd.f32 %v7734_v60, %v7621_v20  ;;  %v8187_v40 = vsel %vm8180_vm6, %v8169_v4, 0.0  ;;  %v7440_v60 = vsel %vm7020_vm1, %v7437_v12, %v7439_v52  ;;  %v12710_v4 = vadd.s32 24, %v10983_v43 }
 0x571   :  { %v12657_v53 = vsub.f32 %v12423_v13, %v8187_v40  ;;  %v8147_v13 = vsel %vm7020_vm1, %v8137_v61, 0.0  ;;  %v12714_v40 = vadd.s32 56, %v10983_v43  ;;  %v7478_v54 = vsub.f32 %v12406_v2, %v7440_v60 }
 0x572   :  { %v7772_v21 = vsel %vm7760_vm3, %v7750_v6, 0.0  ;;  %v12681_v31 = vsub.f32 %v12447_v8, %v8147_v13  ;;  %13256 = vst [vmem:[#allocation31_spill] sm:$0xff] %v12710_v4  ;;  %v7293_v6 = vrot.slane %v12479_v51, 1  ;;  %v7451_v13 = vrot.slane %v12638_v7, 1 }
 0x573   :  { %13250 = vst [vmem:[#allocation25_spill] sm:$0xff] %v12657_v53  ;;  %v12663_v44 = vadd.f32 %v7772_v21, %v7771_v62  ;;  %8217 = vrot.lane.b32.xlu0 %v12657_v53, %s10920_s10  ;;  %v8165_v10 = vpop.permute.xlu1 %8164  ;;  %8297 = vrot.lane.b32.xlu1 %v12660_v18, %s10920_s10  ;;  %v6760_v62 = vand.u32 2147483647, %v6759_v24  ;;  %13257 = vst [vmem:[#allocation32_spill] sm:$0xff] %v12714_v40  ;;  %v7447_v21 = vrot.slane %v12483_v28, 1  ;;  %v7295_v60 = vrot.slane %v12492_v34, 1 }
 0x574   :  { %v8185_v17 = vsel %vm8180_vm6, %v8165_v10, 0.0  ;;  %13254 = vst [vmem:[#allocation29_spill] sm:$0xff] %v12681_v31  ;;  %v12719_v10 = vpop.permute.xlu0 %7196  ;;  %v7294_v5 = vsel %vm7020_vm1, %v7291_v55, %v7293_v6 }
 0x575   :  { %13252 = vst [vmem:[#allocation27_spill] sm:$0xff] %v12663_v44  ;;  %v12673_v35 = vsub.f32 %v12432_v26, %v8185_v17  ;;  %v7449_v17 = vrot.slane %v12497_v16, 1 }
 0x577   :  { %8213 = vrot.lane.b32.xlu0 %v12673_v35, %s10920_s10  ;;  %v8171_v41 = vpop.permute.xlu1 %8170  ;;  %7372 = vrot.lane.b32.xlu1 %v12669_v25, %s10920_s10  ;;  %v7450_v55 = vsel %vm7020_vm1, %v7447_v21, %v7449_v17 }
 0x578   :  { %v8188_v61 = vsel %vm8180_vm6, %v8171_v41, 0.0 }
 0x579   :  { %v12693_v42 = vsub.f32 %v12447_v8, %v8188_v61  ;;  %v7438_v8 = vsel %vm7020_vm1, %v7435_v48, %v7437_v12  ;;  %v7442_v48 = vsel %vm7020_vm1, %v7439_v52, %v7441_v36  ;;  %v12730_v12 = vmul.f32 %v7478_v54, %v7478_v54 }
 0x57a   :  { %v7477_v41 = vsub.f32 %v12395_v45, %v7438_v8  ;;  %v7479_v52 = vsub.f32 %v12418_v30, %v7442_v48  ;;  %v7297_v8 = vrot.slane %v12514_v19, 1  ;;  %v7452_v54 = vsel %vm7020_vm1, %v7449_v17, %v7451_v13 }
 0x57b   :  { %v8167_v37 = vpop.permute.xlu1 %8166  ;;  %8299 = vrot.lane.b32.xlu1 %v12681_v31, %s10920_s10  ;;  %13258 = vst [vmem:[#allocation33_spill] sm:$0xff] %v12730_v12  ;;  %v8254_v48 = vrot.slane %v12506_v27, 1  ;;  %v7333_v12 = vsub.f32 %v12465_v3, %v7294_v5  ;;  %v8260_v17 = vrot.slane %v12565_v47, 1  ;;  %v8258_v5 = vrot.slane %v12558_v49, 1 }
 0x57c   :  { %v8186_v38 = vsel %vm8180_vm6, %v8167_v37, 0.0  ;;  %v12740_v61 = vmul.f32 %v7477_v41, %v7477_v41  ;;  %v12753_v41 = vmul.f32 %v7479_v52, %v7479_v52  ;;  %v7483_v52 = vsub.f32 %v12483_v28, %v7450_v55 }
 0x57d   :  { %v12687_v26 = vsub.f32 %v12460_v58, %v8186_v38  ;;  %v7443_v58 = vrot.slane %v12454_v46, 1  ;;  %v6762_v38 = vsel %vm6761_vm7, %v6760_v62, 0.0  ;;  %v7448_v62 = vsel %vm7020_vm1, %v7445_v1, %v7447_v21 }
 0x57e   :  { %13260 = vst [vmem:[#allocation35_spill] sm:$0xff] %v12740_v61  ;;  %13262 = vst [vmem:[#allocation37_spill] sm:$0xff] %v12753_v41  ;;  %v7482_v21 = vsub.f32 %v12470_v33, %v7448_v62  ;;  %v7301_v61 = vrot.slane %v12535_v29, 1  ;;  %v7484_v41 = vsub.f32 %v12497_v16, %v7452_v54  ;;  %v7469_v33 = vsel %vm7020_vm1, %v7451_v13, 0.0 }
 0x57f   :  { %13255 = vst [vmem:[#allocation30_spill] sm:$0xff] %v12687_v26  ;;  %8215 = vrot.lane.b32.xlu0 %v12687_v26, %s10920_s10  ;;  %v12703_v20 = vpop.permute.xlu1 %7356  ;;  %v7444_v22 = vsel %vm7020_vm1, %v7441_v36, %v7443_v58  ;;  %v12749_v26 = vpop.permute.xlu0 %7198  ;;  %v7298_v36 = vsel %vm7020_vm1, %v7295_v60, %v7297_v8  ;;  %v8264_v13 = vrot.slane %v12660_v18, 1  ;;  %vm8495_vm7 = vcmask 261120  }
 0x580   :  { %v7480_v37 = vsub.f32 %v12441_v57, %v7444_v22  ;;  %v7446_v22 = vsel %vm7020_vm1, %v7443_v58, %v7445_v1  ;;  %v8253_v58 = vrot.slane %v12437_v50, 1  ;;  %v7299_v1 = vrot.slane %v12528_v9, 1 }
 0x581   :  { %v7335_v55 = vsub.f32 %v12492_v34, %v7298_v36  ;;  %v8262_v36 = vrot.slane %v12573_v0, 1  ;;  %v7485_v34 = vsub.f32 %v12638_v7, %v7469_v33 }
 0x582   :  { %v12742_v44 = vmul.f32 %v7480_v37, %v7480_v37  ;;  %v7481_v37 = vsub.f32 %v12454_v46, %v7446_v22  ;;  %v8256_v22 = vrot.slane %v12523_v14, 1  ;;  %v7300_v54 = vsel %vm7020_vm1, %v7297_v8, %v7299_v1 }
 0x583   :  { %8219 = vrot.lane.b32.xlu0 %v12693_v42, %s10920_s10  ;;  %v12732_v24 = vpop.permute.xlu1 %7358  ;;  %v12781_v28 = vpop.permute.xlu0 %7200  ;;  %v7302_v8 = vsel %vm7020_vm1, %v7299_v1, %v7301_v61  ;;  %v7576_v53 = vmul.f32 %v7335_v55, %v7335_v55  ;;  %v8263_v62 = vsel %vm7020_vm1, %v8260_v17, %v8262_v36 }
 0x584   :  { %13259 = vst [vmem:[#allocation34_spill] sm:$0xff] %v12732_v24  ;;  %13261 = vst [vmem:[#allocation36_spill] sm:$0xff] %v12742_v44  ;;  %v7296_v44 = vsel %vm7020_vm1, %v7293_v6, %v7295_v60  ;;  %v7574_v6 = vmul.f32 %v7333_v12, %v7333_v12  ;;  %v8255_v60 = vsel %vm7020_vm1, %v8253_v58, %v8254_v48 }
 0x585   :  { %v7334_v46 = vsub.f32 %v12479_v51, %v7296_v44  ;;  %v8257_v16 = vsel %vm7020_vm1, %v8254_v48, %v8256_v22  ;;  %v8259_v12 = vsel %vm7020_vm1, %v8256_v22, %v8258_v5  ;;  %v8261_v44 = vsel %vm7020_vm1, %v8258_v5, %v8260_v17 }
 0x586   :  { %v8277_v48 = vsub.f32 %v12437_v50, %v8255_v60  ;;  %v7336_v22 = vsub.f32 %v12514_v19, %v7300_v54  ;;  %v12797_v51 = vmul.f32 %v7481_v37, %v7481_v37  ;;  %v8279_v1 = vsub.f32 %v12523_v14, %v8259_v12 }
 0x587   :  { %v12762_v24 = vpop.permute.xlu1 %7360  ;;  %v8280_v60 = vsub.f32 %v12558_v49, %v8261_v44  ;;  %v7337_v33 = vsub.f32 %v12528_v9, %v7302_v8  ;;  %v12809_v54 = vmul.f32 %v7483_v52, %v7483_v52  ;;  %v8286_v7 = vpop.permute.xlu0 %8285  ;;  %v7303_v44 = vrot.slane %v12542_v39, 1 }
 0x588   :  { %13263 = vst [vmem:[#allocation38_spill] sm:$0xff] %v12762_v24  ;;  %v7575_v24 = vmul.f32 %v7334_v46, %v7334_v46  ;;  %v7577_v12 = vmul.f32 %v7336_v22, %v7336_v22  ;;  %v8400_v52 = vmul.f32 %v8279_v1, %v8279_v1  ;;  %v8281_v17 = vsub.f32 %v12565_v47, %v8263_v62 }
 0x589   :  { %13270 = vst [vmem:[#allocation39_spill] sm:$0xff] %v12809_v54  ;;  %v8401_v8 = vmul.f32 %v8280_v60, %v8280_v60  ;;  %v7307_v22 = vrot.slane %v12669_v25, 1  ;;  %v7237_v1 = vsel %vm7133_vm2, %v12719_v10, 0.0  ;;  %v7304_v60 = vsel %vm7020_vm1, %v7301_v61, %v7303_v44 }
 0x58a   :  { %v12820_v49 = vmul.f32 2.5201614e-06, %v7575_v24  ;;  %v8402_v10 = vmul.f32 %v8281_v17, %v8281_v17  ;;  %v7253_v61 = vsub.f32 %v12395_v45, %v7237_v1  ;;  %v8330_v17 = vrot.slane %v12625_v11, 1 }
 0x58b   :  { %v12804_v3 = vpop.permute.xlu1 %8287  ;;  %v7203_v62 = vpop.permute.xlu0 %7202  ;;  %v7239_v45 = vsel %vm7133_vm2, %v12781_v28, 0.0  ;;  %v8309_v1 = vsel %vm8180_vm6, %v8286_v7, 0.0 }
 0x58c   :  { %v7255_v28 = vsub.f32 %v12418_v30, %v7239_v45 }
 0x59f   :  { %6763 = vadd.xlane.f32.xlu1 %v6762_v38  ;;  %v13264_v38 = vand.u32 63, %v12714_v40 }
 0x5a1   :  { %vm12769_vm8 = vcmp.lt.s32.totalorder %v13264_v38, 62  ;;  %v8266_v38 = vrot.slane %v12681_v31, 1 }
 0x5a2   :  { %4057 = vadd.xlane.f32.xlu0 %v11882_v59  ;;  %v13267_v59 = vand.u32 31, %v12710_v4  ;;  %v8278_v4 = vsub.f32 %v12506_v27, %v8257_v16  ;;  %v7590_v5 = vsel %vm12769_vm8, %v7574_v6, 0.0  ;;  %v8398_v16 = vmul.f32 %v8277_v48, %v8277_v48 }
 0x5a3   :  { %v8267_v37 = vsel %vm7020_vm1, %v8264_v13, %v8266_v38  ;;  %v12815_v6 = vmul.f32 %v7485_v34, %v7485_v34  ;;  %v12817_v46 = vmul.f32 2.5201614e-06, %v7590_v5  ;;  %v7578_v48 = vmul.f32 %v7337_v33, %v7337_v33 }
 0x5a4   :  { %vm12786_vm9 = vcmp.lt.s32.totalorder %v13267_v59, 30  ;;  %v12799_v59 = vmul.f32 %v7482_v21, %v7482_v21  ;;  %v12812_v21 = vmul.f32 %v7484_v41, %v7484_v41  ;;  %v8399_v55 = vmul.f32 %v8278_v4, %v8278_v4 }
 0x5a5   :  { %13271 = vst [vmem:[#allocation40_spill] sm:$0xff] %v12815_v6  ;;  %v8283_v54 = vsub.f32 %v12660_v18, %v8267_v37  ;;  %v12823_v41 = vmul.f32 2.5201614e-06, %v7576_v53  ;;  %v8265_v34 = vsel %vm7020_vm1, %v8262_v36, %v8264_v13  ;;  %v7305_v5 = vrot.slane %v12551_v32, 1  ;;  %v12829_v6 = vpop.permute.xlu1 %7362 }
 0x5a6   :  { %v12831_v4 = vmul.f32 1.0416667e-05, %v8398_v16  ;;  %v8276_v24 = vsel %vm7020_vm1, %v8266_v38, 0.0  ;;  %v12836_v53 = vmul.f32 2.5201614e-06, %v7577_v12  ;;  %v8409_v36 = vsel %vm12786_vm9, %v8401_v8, 0.0 }
 0x5a7   :  { %v12839_v33 = vmul.f32 1.0416667e-05, %v8399_v55  ;;  %v12841_v13 = vmul.f32 1.0416667e-05, %v8400_v52  ;;  %v8404_v37 = vmul.f32 %v8283_v54, %v8283_v54  ;;  %v8282_v16 = vsub.f32 %v12573_v0, %v8265_v34 }
 0x5a8   :  { %13272 = vst [vmem:[#allocation41_spill] sm:$0xff] %v12831_v4  ;;  %v7238_v38 = vsel %vm7133_vm2, %v12749_v26, 0.0  ;;  %v12848_v18 = vmul.f32 2.5201614e-06, %v7578_v48  ;;  %v8284_v12 = vsub.f32 %v12681_v31, %v8276_v24  ;;  %v7338_v55 = vsub.f32 %v12535_v29, %v7304_v60 }
 0x5a9   :  { %13273 = vst [vmem:[#allocation42_spill] sm:$0xff] %v12839_v33  ;;  %13274 = vst [vmem:[#allocation43_spill] sm:$0xff] %v12841_v13  ;;  %v7306_v52 = vsel %vm7020_vm1, %v7303_v44, %v7305_v5  ;;  %v7308_v58 = vsel %vm7020_vm1, %v7305_v5, %v7307_v22  ;;  %v8326_v54 = vrot.slane %v12641_v56, 1  ;;  %v12856_v8 = vmul.f32 1.0416667e-05, %v8409_v36  ;;  %v12866_v24 = vpop.permute.xlu1 %8289 }
 0x5aa   :  { %v12859_v26 = vadd.s32 120, %v10983_v43  ;;  %v7325_v48 = vsel %vm7020_vm1, %v7307_v22, 0.0  ;;  %v7254_v34 = vsub.f32 %v12406_v2, %v7238_v38  ;;  %v8403_v44 = vmul.f32 %v8282_v16, %v8282_v16  ;;  %v7205_v16 = vpop.permute.xlu0 %7204 }
 0x5ab   :  { %13275 = vst [vmem:[#allocation44_spill] sm:$0xff] %v12856_v8  ;;  %v8325_v5 = vrot.slane %v12604_v15, 1  ;;  %v7339_v60 = vsub.f32 %v12542_v39, %v7306_v52  ;;  %v7340_v43 = vsub.f32 %v12551_v32, %v7308_v58  ;;  %v8328_v22 = vrot.slane %v12589_v23, 1 }
 0x5ac   :  { %v7494_v36 = vmul.f32 %v7253_v61, %v7253_v61  ;;  %v7341_v8 = vsub.f32 %v12669_v25, %v7325_v48  ;;  %v12874_v2 = vmul.f32 1.0416667e-05, %v8404_v37  ;;  %v7579_v31 = vmul.f32 %v7338_v55, %v7338_v55 }
 0x5ad   :  { %v8327_v38 = vsel %vm7020_vm1, %v8325_v5, %v8326_v54  ;;  %v7495_v7 = vmul.f32 %v7254_v34, %v7254_v34  ;;  %v8317_v52 = vsub.f32 %v12437_v50, %v8309_v1  ;;  %v8331_v58 = vsel %vm7020_vm1, %v8328_v22, %v8330_v17  ;;  %v7365_v50 = vpop.permute.xlu1 %7364 }
 0x5ae   :  { %13276 = vst [vmem:[#allocation45_spill] sm:$0xff] %v12874_v2  ;;  %v12881_v33 = vmul.f32 1.0416667e-05, %v8402_v10  ;;  %v7580_v61 = vmul.f32 %v7339_v60, %v7339_v60  ;;  %v7581_v37 = vmul.f32 %v7340_v43, %v7340_v43  ;;  %v12884_v48 = vmul.f32 1.0416667e-05, %v8403_v44  ;;  %v13288_v2 = vld [vmem:[#allocation34_spill] sm:$0xff] }
 0x5af   :  { %v12886_v30 = vmul.f32 %v8284_v12, %v8284_v12  ;;  %v7510_v55 = vsel %vm7486_vm5, %v7494_v36, 0.0  ;;  %v8349_v45 = vsub.f32 %v12604_v15, %v8327_v38  ;;  %v7240_v34 = vsel %vm7133_vm2, %v7203_v62, 0.0 }
 0x5b0   :  { %13277 = vst [vmem:[#allocation46_spill] sm:$0xff] %v12881_v33  ;;  %13278 = vst [vmem:[#allocation47_spill] sm:$0xff] %v12884_v48  ;;  %v7582_v5 = vmul.f32 %v7341_v8, %v7341_v8  ;;  %v7496_v1 = vmul.f32 %v7255_v28, %v7255_v28  ;;  %v12892_v10 = vmul.f32 2.5201614e-06, %v7579_v31  ;;  %v8351_v13 = vsub.f32 %v12589_v23, %v8331_v58  ;;  %v7207_v58 = vpop.permute.xlu0 %7206 }
 0x5b1   :  { %13279 = vst [vmem:[#allocation48_spill] sm:$0xff] %v12886_v30  ;;  %v13280_v60 = vand.u32 63, %v12859_v26  ;;  %v7511_v12 = vsel %vm7486_vm5, %v7495_v7, 0.0  ;;  %v8447_v36 = vmul.f32 %v8317_v52, %v8317_v52  ;;  %v8329_v62 = vsel %vm7020_vm1, %v8326_v54, %v8328_v22  ;;  %v7367_v33 = vpop.permute.xlu1 %7366  ;;  %v13301_v30 = vld [vmem:[#allocation33_spill] sm:$0xff] }
 0x5b2   :  { %v7526_v8 = vmul.f32 2.5201614e-06, %v7510_v55  ;;  %v8338_v31 = vrot.slane %v12693_v42, 1  ;;  %v7256_v28 = vsub.f32 %v12441_v57, %v7240_v34  ;;  %v7397_v38 = vsel %vm7133_vm2, %v12703_v20, 0.0  ;;  %v13286_v57 = vld [vmem:[#allocation25_spill] sm:$0xff] }
 0x5b3   :  { %vm12897_vm11 = vcmp.lt.s32.totalorder %v13280_v60, 62  ;;  %v8455_v60 = vmul.f32 %v8349_v45, %v8349_v45  ;;  %v13283_v48 = vand.u32 63, %v12714_v40  ;;  %v12915_v7 = vmul.f32 2.5201614e-06, %v7580_v61 }
 0x5b4   :  { %v12917_v52 = vmul.f32 2.5201614e-06, %v7581_v37  ;;  %v7598_v54 = vsel %vm12897_vm11, %v7582_v5, 0.0  ;;  %v7527_v22 = vmul.f32 2.5201614e-06, %v7511_v12  ;;  %v8336_v55 = vrot.slane %v13286_v57, 1 }
 0x5b5   :  { %vm12911_vm12 = vcmp.lt.s32.totalorder %v13283_v48, 63  ;;  %v7512_v20 = vsel %vm7486_vm5, %v7496_v1, 0.0  ;;  %v8350_v45 = vsub.f32 %v12641_v56, %v8329_v62  ;;  %v8463_v34 = vadd.f32 %v8455_v60, %v8447_v36  ;;  %v13287_v48 = vld [vmem:[#allocation17_spill] sm:$0xff]  ;;  %v7369_v25 = vpop.permute.xlu1 %7368 }
 0x5b6   :  { %v7413_v43 = vsub.f32 %v13287_v48, %v7397_v38  ;;  %v7398_v61 = vsel %vm7133_vm2, %v13288_v2, 0.0  ;;  %v13289_v37 = vrot.slane %v12673_v35, 1  ;;  %v12932_v5 = vadd.f32 %v12817_v46, %v7526_v8  ;;  %v13290_v38 = vld [vmem:[#allocation38_spill] sm:$0xff]  ;;  %v13292_v46 = vld [vmem:[#allocation19_spill] sm:$0xff]  ;;  %vm12977_vm13 = vmand %vm12911_vm12, %vm7647_vm4 }
 0x5b7   :  { %v7497_v12 = vmul.f32 %v7256_v28, %v7256_v28  ;;  %v12934_v40 = vmul.f32 %v8351_v13, %v8351_v13  ;;  %v8339_v1 = vsel %vm7020_vm1, %v8336_v55, %v8338_v31  ;;  %v7528_v62 = vmul.f32 2.5201614e-06, %v7512_v20  ;;  %v7209_v28 = vpop.permute.xlu0 %7208 }
 0x5b8   :  { %v8333_v44 = vsel %vm7020_vm1, %v8330_v17, %v13289_v37  ;;  %v7241_v36 = vsel %vm7133_vm2, %v7205_v16, 0.0  ;;  %v7399_v60 = vsel %vm7133_vm2, %v13290_v38, 0.0  ;;  %v12940_v2 = vmul.f32 2.5201614e-06, %v7598_v54 }
 0x5b9   :  { %v12943_v48 = vadd.f32 %v12820_v49, %v7527_v22  ;;  %v7242_v17 = vsel %vm7133_vm2, %v7207_v58, 0.0  ;;  %v7414_v8 = vsub.f32 %v13292_v46, %v7398_v61  ;;  %v8352_v13 = vsub.f32 %v12625_v11, %v8333_v44  ;;  %v13293_v49 = vld [vmem:[#allocation16_spill] sm:$0xff]  ;;  %v13295_v46 = vld [vmem:[#allocation30_spill] sm:$0xff] }
 0x5ba   :  { %13291 = vst [vmem:[#allocation17_spill] sm:$0xff] %v12940_v2  ;;  %v8471_v20 = vsel %vm8438_vm10, %v8463_v34, 0.0  ;;  %v7671_v37 = vmul.f32 %v7413_v43, %v7413_v43  ;;  %v12950_v16 = vmul.f32 %v8350_v45, %v8350_v45  ;;  %v8355_v38 = vsub.f32 %v13286_v57, %v8339_v1  ;;  %v13294_v2 = vld [vmem:[#allocation21_spill] sm:$0xff]  ;;  %v13296_v43 = vld [vmem:[#allocation18_spill] sm:$0xff] }
 0x5bb   :  { %v7513_v54 = vsel %vm7486_vm5, %v7497_v12, 0.0  ;;  %v7257_v22 = vsub.f32 %v13293_v49, %v7241_v36  ;;  %v7415_v58 = vsub.f32 %v13294_v2, %v7399_v60  ;;  %v7400_v61 = vsel %vm7133_vm2, %v12829_v6, 0.0  ;;  %v13297_v2 = vld [vmem:[#allocation35_spill] sm:$0xff] }
 0x5bc   :  { %v12960_v44 = vadd.f32 %v12823_v41, %v7528_v62  ;;  %v8334_v34 = vrot.slane %v13295_v46, 1  ;;  %v7258_v45 = vsub.f32 %v13296_v43, %v7242_v17  ;;  %v8348_v1 = vsel %vm7020_vm1, %v8338_v31, 0.0  ;;  %v13304_v31 = vld [vmem:[#allocation22_spill] sm:$0xff] }
 0x5bd   :  { %v12965_v57 = vmul.f32 1.0405827e-05, %v8471_v20  ;;  %v7672_v12 = vmul.f32 %v7414_v8, %v7414_v8  ;;  %v7401_v36 = vsel %vm7133_vm2, %v7365_v50, 0.0  ;;  %v12968_v49 = vmul.f32 %v8352_v13, %v8352_v13  ;;  %v7211_v50 = vpop.permute.xlu0 %7210 }
 0x5be   :  { %v7529_v60 = vmul.f32 2.5201614e-06, %v7513_v54  ;;  %v7703_v6 = vadd.f32 %v13297_v2, %v7671_v37  ;;  %v7416_v41 = vsub.f32 %v12514_v19, %v7400_v61  ;;  %v7402_v62 = vsel %vm7133_vm2, %v7367_v33, 0.0 }
 0x5bf   :  { %v7498_v4 = vmul.f32 %v7257_v22, %v7257_v22  ;;  %v7673_v17 = vmul.f32 %v7415_v58, %v7415_v58  ;;  %v12981_v8 = vmul.f32 %v8355_v38, %v8355_v38  ;;  %v8356_v13 = vsub.f32 %v12693_v42, %v8348_v1  ;;  %v7371_v1 = vpop.permute.xlu1 %7370 }
 0x5c0   :  { %v7499_v20 = vmul.f32 %v7258_v45, %v7258_v45  ;;  %v7417_v19 = vsub.f32 %v12528_v9, %v7401_v36  ;;  %v7403_v33 = vsel %vm7133_vm2, %v7369_v25, 0.0  ;;  %v13300_v37 = vrot.slane %v12673_v35, 1  ;;  %v13302_v36 = vld [vmem:[#allocation37_spill] sm:$0xff] }
 0x5c1   :  { %v7704_v22 = vadd.f32 %v13301_v30, %v7672_v12  ;;  %v7243_v61 = vsel %vm7133_vm2, %v7209_v28, 0.0  ;;  %v7418_v58 = vsub.f32 %v12535_v29, %v7402_v62  ;;  %v8337_v38 = vsel %vm7020_vm1, %v8334_v34, %v8336_v55 }
 0x5c2   :  { %v8335_v54 = vsel %vm7020_vm1, %v13300_v37, %v8334_v34  ;;  %v12994_v43 = vadd.f32 %v12836_v53, %v7529_v60  ;;  %v7719_v9 = vsel %vm12977_vm13, %v7703_v6, 0.0  ;;  %v7244_v25 = vsel %vm7133_vm2, %v7211_v50, 0.0  ;;  %v13303_v34 = vld [vmem:[#allocation20_spill] sm:$0xff] }
 0x5c3   :  { %v7674_v45 = vmul.f32 %v7416_v41, %v7416_v41  ;;  %v7705_v2 = vadd.f32 %v13302_v36, %v7673_v17  ;;  %v8310_v12 = vsel %vm8180_vm6, %v12804_v3, 0.0  ;;  %v7419_v28 = vsub.f32 %v12542_v39, %v7403_v33  ;;  %v13305_v50 = vld [vmem:[#allocation36_spill] sm:$0xff] }
 0x5c4   :  { %v8353_v29 = vsub.f32 %v12673_v35, %v8335_v54  ;;  %v7514_v53 = vsel %vm7486_vm5, %v7498_v4, 0.0  ;;  %v7515_v55 = vsel %vm7486_vm5, %v7499_v20, 0.0  ;;  %v7259_v60 = vsub.f32 %v13303_v34, %v7243_v61 }
 0x5c5   :  { %v7675_v6 = vmul.f32 %v7417_v19, %v7417_v19  ;;  %v7735_v41 = vmul.f32 2.5195263e-06, %v7719_v9  ;;  %v7720_v62 = vsel %vm7647_vm4, %v7704_v22, 0.0  ;;  %v7260_v17 = vsub.f32 %v13304_v31, %v7244_v25 }
 0x5c6   :  { %v7676_v3 = vmul.f32 %v7418_v58, %v7418_v58  ;;  %v8318_v39 = vsub.f32 %v12506_v27, %v8310_v12  ;;  %v7706_v33 = vadd.f32 %v13305_v50, %v7674_v45  ;;  %v8354_v37 = vsub.f32 %v13295_v46, %v8337_v38  ;;  %v8292_v27 = vpop.permute.xlu1 %8291 }
 0x5c7   :  { %v13015_v4 = vmul.f32 %v8356_v13, %v8356_v13  ;;  %v7530_v54 = vmul.f32 2.5201614e-06, %v7514_v53  ;;  %v7531_v20 = vmul.f32 2.5201614e-06, %v7515_v55  ;;  %v7721_v19 = vsel %vm7647_vm4, %v7705_v2, 0.0  ;;  %v13306_v55 = vld [vmem:[#allocation39_spill] sm:$0xff] }
 0x5c8   :  { %v7677_v30 = vmul.f32 %v7419_v28, %v7419_v28  ;;  %v7736_v61 = vmul.f32 2.5195263e-06, %v7720_v62  ;;  %v7500_v9 = vmul.f32 %v7259_v60, %v7259_v60  ;;  %v8311_v22 = vsel %vm8180_vm6, %v12866_v24, 0.0 }
 0x5c9   :  { %v7707_v58 = vadd.f32 %v12797_v51, %v7675_v6  ;;  %v7751_v45 = vadd.f32 %v7735_v41, %v12932_v5  ;;  %v7501_v38 = vmul.f32 %v7260_v17, %v7260_v17  ;;  %v7708_v13 = vadd.f32 %v12799_v59, %v7676_v3 }
 0x5ca   :  { %v13024_v36 = vmul.f32 %v8353_v29, %v8353_v29  ;;  %v7737_v12 = vmul.f32 2.5195263e-06, %v7721_v19  ;;  %v8448_v53 = vmul.f32 %v8318_v39, %v8318_v39  ;;  %v7722_v2 = vsel %vm7647_vm4, %v7706_v33, 0.0  ;;  %v8294_v3 = vpop.permute.xlu1 %8293 }
 0x5cb   :  { %v7404_v28 = vsel %vm7133_vm2, %v7371_v1, 0.0  ;;  %v7626_v24 = vadd.f32 %v12848_v18, %v7530_v54  ;;  %v8319_v51 = vsub.f32 %v12523_v14, %v8311_v22  ;;  %v7709_v34 = vadd.f32 %v13306_v55, %v7677_v30 }
 0x5cc   :  { %v13032_v60 = vmul.f32 %v8354_v37, %v8354_v37  ;;  %v7627_v5 = vadd.f32 %v12892_v10, %v7531_v20  ;;  %v7752_v59 = vadd.f32 %v7736_v61, %v12943_v48  ;;  %v7516_v29 = vsel %vm7486_vm5, %v7500_v9, 0.0  ;;  %v13307_v9 = vld [vmem:[#allocation31_spill] sm:$0xff] }
 0x5cd   :  { %v7723_v6 = vsel %vm7647_vm4, %v7707_v58, 0.0  ;;  %v7738_v1 = vmul.f32 2.5195263e-06, %v7722_v2  ;;  %v7724_v18 = vsel %vm7647_vm4, %v7708_v13, 0.0  ;;  %v7420_v14 = vsub.f32 %v12551_v32, %v7404_v28 }
 0x5ce   :  { %v7774_v31 = vsel %vm7760_vm3, %v7751_v45, 0.0  ;;  %v7753_v10 = vadd.f32 %v7737_v12, %v12960_v44  ;;  %v7517_v48 = vsel %vm7486_vm5, %v7501_v38, 0.0  ;;  %v8464_v17 = vadd.f32 %v12950_v16, %v8448_v53  ;;  %v13311_v45 = vld [vmem:[#allocation27_spill] sm:$0xff] }
 0x5cf   :  { %v7532_v39 = vmul.f32 2.5201614e-06, %v7516_v29  ;;  %v8449_v50 = vmul.f32 %v8319_v51, %v8319_v51  ;;  %v7739_v33 = vmul.f32 2.5195263e-06, %v7723_v6  ;;  %v7725_v37 = vsel %vm7647_vm4, %v7709_v34, 0.0  ;;  %v13312_v53 = vld [vmem:[#allocation23_spill] sm:$0xff]  ;;  %v8296_v34 = vpop.permute.xlu1 %8295 }
 0x5d0   :  { %v7740_v32 = vmul.f32 2.5195263e-06, %v7724_v18  ;;  %v8312_v54 = vsel %vm8180_vm6, %v8292_v27, 0.0  ;;  %v7776_v19 = vsel %vm7760_vm3, %v7752_v59, 0.0  ;;  %v7533_v30 = vmul.f32 2.5201614e-06, %v7517_v48 }
 0x5d1   :  { %v8210_v25 = vpop.permute.xlu0 %8209  ;;  %v7754_v16 = vadd.f32 %v7738_v1, %v12994_v43  ;;  %v7678_v61 = vmul.f32 %v7420_v14, %v7420_v14  ;;  %v13308_v22 = vand.u32 31, %v13307_v9  ;;  %v7775_v38 = vadd.f32 %v7774_v31, %v13311_v45 }
 0x5d2   :  { %v8231_v20 = vsel %vm8180_vm6, %v8210_v25, 0.0  ;;  %v7778_v27 = vsel %vm7760_vm3, %v7753_v10, 0.0  ;;  %v8472_v25 = vsel %vm8438_vm10, %v8464_v17, 0.0  ;;  %v8465_v13 = vadd.f32 %v12934_v40, %v8449_v50 }
 0x5d3   :  { %vm13059_vm15 = vcmp.lt.s32.totalorder %v13308_v22, 31  ;;  %v7755_v12 = vadd.f32 %v7739_v33, %v7626_v24  ;;  %v8320_v43 = vsub.f32 %v13312_v53, %v8312_v54  ;;  %v8239_v2 = vsub.f32 %v12589_v23, %v8231_v20 }
 0x5d4   :  { %v7777_v28 = vadd.f32 %v7776_v19, %v7775_v38  ;;  %v7628_v51 = vadd.f32 %v12915_v7, %v7532_v39  ;;  %v7756_v55 = vadd.f32 %v7740_v32, %v7627_v5  ;;  %v7629_v6 = vadd.f32 %v12917_v52, %v7533_v30  ;;  %vm13105_vm1 = vmand %vm13059_vm15, %vm8438_vm10 }
 0x5d5   :  { %v8206_v41 = vpop.permute.xlu0 %8205  ;;  %v7710_v1 = vadd.f32 %v12812_v21, %v7678_v61  ;;  %v8313_v40 = vsel %vm8180_vm6, %v8294_v3, 0.0  ;;  %v8480_v18 = vmul.f32 1.0405827e-05, %v8472_v25  ;;  %v8473_v7 = vsel %vm8438_vm10, %v8465_v13, 0.0 }
 0x5d6   :  { %v8229_v62 = vsel %vm8180_vm6, %v8206_v41, 0.0  ;;  %v7780_v41 = vsel %vm7760_vm3, %v7754_v16, 0.0  ;;  %v7779_v24 = vadd.f32 %v7778_v27, %v7777_v28  ;;  %v7782_v5 = vsel %vm7760_vm3, %v7755_v12, 0.0  ;;  %v13313_v16 = vld [vmem:[#allocation24_spill] sm:$0xff] }
 0x5d7   :  { %v8237_v44 = vsub.f32 %v12604_v15, %v8229_v62  ;;  %v7741_v15 = vmul.f32 2.5195263e-06, %v7725_v37  ;;  %v8450_v62 = vmul.f32 %v8320_v43, %v8320_v43  ;;  %v8360_v31 = vmul.f32 %v8239_v2, %v8239_v2 }
 0x5d8   :  { %v7781_v10 = vadd.f32 %v7780_v41, %v7779_v24  ;;  %v8321_v52 = vsub.f32 %v12565_v47, %v8313_v40  ;;  %v7784_v3 = vsel %vm7760_vm3, %v7756_v55, 0.0  ;;  %v7726_v39 = vsel %vm7647_vm4, %v7710_v1, 0.0  ;;  %v13321_v1 = vld [vmem:[#allocation26_spill] sm:$0xff] }
 0x5d9   :  { %v8358_v59 = vmul.f32 %v8237_v44, %v8237_v44  ;;  %v7757_v14 = vadd.f32 %v7741_v15, %v7628_v51  ;;  %v8314_v32 = vsel %vm8180_vm6, %v8296_v34, 0.0  ;;  %v8466_v44 = vadd.f32 %v12968_v49, %v8450_v62  ;;  %v13319_v51 = vld [vmem:[#allocation41_spill] sm:$0xff]  ;;  %v13322_v62 = vld [vmem:[#allocation42_spill] sm:$0xff] }
 0x5da   :  { %v7783_v54 = vadd.f32 %v7782_v5, %v7781_v10  ;;  %v8368_v19 = vsel %vm8357_vm14, %v8360_v31, 0.0  ;;  %v7742_v22 = vmul.f32 2.5195263e-06, %v7726_v39  ;;  %v8451_v49 = vmul.f32 %v8321_v52, %v8321_v52 }
 0x5db   :  { %v8366_v21 = vsel %vm8357_vm14, %v8358_v59, 0.0  ;;  %v7786_v20 = vsel %vm7760_vm3, %v7757_v14, 0.0  ;;  %v8481_v53 = vmul.f32 1.0405827e-05, %v8473_v7  ;;  %v8376_v43 = vmul.f32 1.0416667e-05, %v8368_v19 }
 0x5dc   :  { %v8374_v30 = vmul.f32 1.0416667e-05, %v8366_v21  ;;  %v7785_v25 = vadd.f32 %v7784_v3, %v7783_v54  ;;  %v8474_v28 = vsel %vm13105_vm1, %v8466_v44, 0.0  ;;  %v13323_v21 = vld [vmem:[#allocation43_spill] sm:$0xff] }
 0x5dd   :  { %v8212_v29 = vpop.permute.xlu0 %8211  ;;  %v8482_v52 = vmul.f32 1.0405827e-05, %v8474_v28 }
 0x5de   :  { %v8232_v23 = vsel %vm8180_vm6, %v8212_v29, 0.0  ;;  %v7787_v2 = vadd.f32 %v7786_v20, %v7785_v25  ;;  %v8422_v55 = vadd.f32 %v13319_v51, %v8374_v30  ;;  %v13320_v29 = vld [vmem:[#allocation25_spill] sm:$0xff]  ;;  %v13325_v20 = vld [vmem:[#allocation32_spill] sm:$0xff] }
 0x5df   :  { %v8240_v50 = vsub.f32 %v12625_v11, %v8232_v23  ;;  %v13314_v11 = vand.u32 63, %v12859_v26  ;;  %v8322_v26 = vsub.f32 %v12573_v0, %v8314_v32  ;;  %v8467_v0 = vadd.f32 %v13024_v36, %v8451_v49  ;;  %v13334_v25 = vld [vmem:[#allocation40_spill] sm:$0xff] }
 0x5e0   :  { %v7758_v23 = vadd.f32 %v7742_v22, %v7629_v6  ;;  %v8487_v3 = vadd.f32 %v12965_v57, %v8422_v55  ;;  %v13326_v44 = vand.u32 31, %v13325_v20 }
 0x5e1   :  { %v7213_v48 = vpop.permute.xlu0 %7212  ;;  %v8208_v17 = vpop.permute.xlu1 %8207  ;;  %vm13097_vm0 = vcmp.lt.s32.totalorder %v13314_v11, 63  ;;  %v8361_v15 = vmul.f32 %v8240_v50, %v8240_v50  ;;  %v8452_v7 = vmul.f32 %v8322_v26, %v8322_v26  ;;  %v13324_v50 = vld [vmem:[#allocation28_spill] sm:$0xff]  ;;  %v8475_v57 = vsel %vm8438_vm10, %v8467_v0, 0.0 }
 0x5e2   :  { %v7245_v33 = vsel %vm7133_vm2, %v7213_v48, 0.0  ;;  %v8230_v37 = vsel %vm8180_vm6, %v8208_v17, 0.0  ;;  %v8424_v48 = vadd.f32 %v13323_v21, %v8376_v43  ;;  %vm13133_vm8 = vcmp.lt.s32.totalorder %v13326_v44, 31  ;;  %v13336_v43 = vld [vmem:[#allocation44_spill] sm:$0xff] }
 0x5e3   :  { %v8238_v47 = vsub.f32 %v12641_v56, %v8230_v37  ;;  %v7261_v61 = vsub.f32 %v13313_v16, %v7245_v33  ;;  %v8369_v5 = vsel %vm8357_vm14, %v8361_v15, 0.0  ;;  %v8468_v30 = vadd.f32 %v13032_v60, %v8452_v7  ;;  %v13335_v15 = vld [vmem:[#allocation29_spill] sm:$0xff] }
 0x5e4   :  { %v8377_v37 = vmul.f32 1.0416667e-05, %v8369_v5  ;;  %v7788_v11 = vsel %vm7760_vm3, %v7758_v23, 0.0 }
 0x5e5   :  { %v8359_v45 = vmul.f32 %v8238_v47, %v8238_v47  ;;  %v8218_v38 = vpop.permute.xlu0 %8217  ;;  %v8298_v27 = vpop.permute.xlu1 %8297  ;;  %v7502_v34 = vmul.f32 %v7261_v61, %v7261_v61  ;;  %v8476_v23 = vsel %vm8438_vm10, %v8468_v30, 0.0  ;;  %v7789_v7 = vadd.f32 %v7788_v11, %v7787_v2 }
 0x5e6   :  { %v8235_v13 = vsel %vm8180_vm6, %v8218_v38, 0.0  ;;  %v8315_v12 = vsel %vm8180_vm6, %v8298_v27, 0.0  ;;  %v8489_v38 = vadd.f32 %v8481_v53, %v8424_v48  ;;  %v8484_v20 = vmul.f32 1.0405827e-05, %v8476_v23 }
 0x5e7   :  { %v8367_v58 = vsel %vm8357_vm14, %v8359_v45, 0.0  ;;  %v8243_v41 = vsub.f32 %v13320_v29, %v8235_v13  ;;  %v8323_v40 = vsub.f32 %v13321_v1, %v8315_v12  ;;  %v7518_v6 = vsel %vm7486_vm5, %v7502_v34, 0.0  ;;  %vm13154_vm5 = vmand %vm13097_vm0, %vm7647_vm4  ;;  %v13337_v34 = vld [vmem:[#allocation46_spill] sm:$0xff]  ;;  %v13338_v29 = vld [vmem:[#allocation17_spill] sm:$0xff] }
 0x5e8   :  { %v8375_v59 = vmul.f32 1.0416667e-05, %v8367_v58  ;;  %v7534_v22 = vmul.f32 2.5201614e-06, %v7518_v6  ;;  %v8496_v12 = vsel %vm8495_vm7, %v8487_v3, 0.0  ;;  %v8425_v58 = vadd.f32 %v13336_v43, %v8377_v37  ;;  %vm13188_vm4 = vmand %vm13133_vm8, %vm8438_vm10 }
 0x5e9   :  { %v8214_v24 = vpop.permute.xlu0 %8213  ;;  %v7373_v14 = vpop.permute.xlu1 %7372  ;;  %v8364_v32 = vmul.f32 %v8243_v41, %v8243_v41  ;;  %v8453_v47 = vmul.f32 %v8323_v40, %v8323_v40  ;;  %v8499_v5 = vsel %vm8495_vm7, %v8489_v38, 0.0 }
 0x5ea   :  { %v8423_v31 = vadd.f32 %v13322_v62, %v8375_v59  ;;  %v8233_v10 = vsel %vm8180_vm6, %v8214_v24, 0.0  ;;  %v7405_v17 = vsel %vm7133_vm2, %v7373_v14, 0.0  ;;  %v7630_v41 = vadd.f32 %v13338_v29, %v7534_v22 }
 0x5eb   :  { %v8241_v36 = vsub.f32 %v12673_v35, %v8233_v10  ;;  %v7421_v33 = vsub.f32 %v13324_v50, %v7405_v17  ;;  %v8372_v28 = vsel %vm8357_vm14, %v8364_v32, 0.0  ;;  %v8469_v9 = vadd.f32 %v12981_v8, %v8453_v47  ;;  %v13339_v50 = vld [vmem:[#allocation45_spill] sm:$0xff]  ;;  %v13342_v47 = vld [vmem:[#allocation48_spill] sm:$0xff] }
 0x5ec   :  { %v8488_v39 = vadd.f32 %v8480_v18, %v8423_v31  ;;  %v13329_v18 = vmov %v13326_v44  ;;  %v8483_v14 = vmul.f32 1.0405827e-05, %v8475_v57  ;;  %v8380_v8 = vmul.f32 1.0416667e-05, %v8372_v28 }
 0x5ed   :  { %v8362_v54 = vmul.f32 %v8241_v36, %v8241_v36  ;;  %v8300_v35 = vpop.permute.xlu1 %8299  ;;  %v7679_v16 = vmul.f32 %v7421_v33, %v7421_v33  ;;  %vm13142_vm2 = vcmp.lt.s32.totalorder %v13329_v18, 30  ;;  %v8477_v62 = vsel %vm8438_vm10, %v8469_v9, 0.0 }
 0x5ee   :  { %v8497_v56 = vsel %vm8495_vm7, %v8488_v39, 0.0  ;;  %v8316_v45 = vsel %vm8180_vm6, %v8300_v35, 0.0  ;;  %v8490_v48 = vadd.f32 %v8482_v52, %v8425_v58  ;;  %v8428_v33 = vadd.f32 %v13339_v50, %v8380_v8  ;;  %v13343_v35 = vld [vmem:[#allocation47_spill] sm:$0xff] }
 0x5ef   :  { %v8370_v49 = vsel %vm8357_vm14, %v8362_v54, 0.0  ;;  %v7711_v26 = vadd.f32 %v13334_v25, %v7679_v16  ;;  %v8324_v13 = vsub.f32 %v13335_v15, %v8316_v45  ;;  %v8498_v55 = vadd.f32 %v8497_v56, %v8496_v12 }
 0x5f0   :  { %v8378_v27 = vmul.f32 1.0416667e-05, %v8370_v49  ;;  %v8485_v37 = vmul.f32 1.0405827e-05, %v8477_v62  ;;  %v8413_v54 = vsel %vm13142_vm2, %v13342_v47, 0.0  ;;  %v8501_v44 = vsel %vm8495_vm7, %v8490_v48, 0.0 }
 0x5f1   :  { %v8216_v51 = vpop.permute.xlu0 %8215  ;;  %v7727_v53 = vsel %vm13154_vm5, %v7711_v26, 0.0  ;;  %v8454_v40 = vmul.f32 %v8324_v13, %v8324_v13  ;;  %v8500_v3 = vadd.f32 %v8499_v5, %v8498_v55  ;;  %v8421_v22 = vmul.f32 1.0416667e-05, %v8413_v54 }
 0x5f2   :  { %v8426_v59 = vadd.f32 %v13337_v34, %v8378_v27  ;;  %v8234_v0 = vsel %vm8180_vm6, %v8216_v51, 0.0  ;;  %v7743_v1 = vmul.f32 2.5195263e-06, %v7727_v53  ;;  %v8493_v56 = vadd.f32 %v8485_v37, %v8428_v33 }
 0x5f3   :  { %v8242_v24 = vsub.f32 %v13295_v46, %v8234_v0  ;;  %v8470_v46 = vadd.f32 %v13015_v4, %v8454_v40  ;;  %v8502_v18 = vadd.f32 %v8501_v44, %v8500_v3 }
 0x5f4   :  { %v7759_v21 = vadd.f32 %v7743_v1, %v7630_v41  ;;  %v8491_v36 = vadd.f32 %v8483_v14, %v8426_v59  ;;  %v8507_v26 = vsel %vm8495_vm7, %v8493_v56, 0.0 }
 0x5f5   :  { %v8363_v31 = vmul.f32 %v8242_v24, %v8242_v24  ;;  %v8220_v10 = vpop.permute.xlu0 %8219  ;;  %v8478_v19 = vsel %vm13188_vm4, %v8470_v46, 0.0 }
 0x5f6   :  { %v8236_v17 = vsel %vm8180_vm6, %v8220_v10, 0.0  ;;  %v7790_v39 = vsel %vm7760_vm3, %v7759_v21, 0.0  ;;  %v8503_v30 = vsel %vm8495_vm7, %v8491_v36, 0.0  ;;  %v8486_v60 = vmul.f32 1.0405827e-05, %v8478_v19 }
 0x5f7   :  { %v8371_v6 = vsel %vm8357_vm14, %v8363_v31, 0.0  ;;  %v8244_v2 = vsub.f32 %v12693_v42, %v8236_v17  ;;  %v7791_v4 = vadd.f32 %v7790_v39, %v7789_v7  ;;  %v8504_v49 = vadd.f32 %v8503_v30, %v8502_v18 }
 0x5f8   :  { %v8379_v32 = vmul.f32 1.0416667e-05, %v8371_v6 }
 0x5f9   :  { %v8365_v42 = vmul.f32 %v8244_v2, %v8244_v2  ;;  %7792 = vadd.xlane.f32.xlu0 %v7791_v4 }
 0x5fa   :  { %v8427_v57 = vadd.f32 %v13343_v35, %v8379_v32 }
 0x5fb   :  { %v8373_v16 = vsel %vm8357_vm14, %v8365_v42, 0.0 }
 0x5fc   :  { %v8492_v11 = vadd.f32 %v8484_v20, %v8427_v57  ;;  %v8381_v61 = vmul.f32 1.0416667e-05, %v8373_v16 }
 0x5fe   :  { %v8429_v45 = vadd.f32 %v8421_v22, %v8381_v61  ;;  %v8505_v38 = vsel %vm8495_vm7, %v8492_v11, 0.0 }
 0x5ff   :  { %v8506_v27 = vadd.f32 %v8505_v38, %v8504_v49 }
 0x600   :  { %v8494_v25 = vadd.f32 %v8486_v60, %v8429_v45 }
 0x601   :  { %v8508_v15 = vadd.f32 %v8507_v26, %v8506_v27 }
 0x602   :  { %v8509_v13 = vsel %vm8495_vm7, %v8494_v25, 0.0 }
 0x603   :  { %v8510_v12 = vadd.f32 %v8509_v13, %v8508_v15 }
 0x605   :  { %8511 = vadd.xlane.f32.xlu0 %v8510_v12 }
 0x628   :  { %v6764_v63 = vpop.xlane.xlu1 %6763 }
 0x629   :  { %v6765_v43 = vrot.slane %v6764_v63, 4 }
 0x62b   :  { %v6766_v58 = vadd.f32 %v6765_v43, %v6764_v63  ;;  %v4058_v28 = vpop.xlane.xlu0 %4057 }
 0x62c   :  { %v4059_v9 = vrot.slane %v4058_v28, 4 }
 0x62d   :  { %v6767_v51 = vrot.slane %v6766_v58, 2 }
 0x62e   :  { %v4060_v55 = vadd.f32 %v4059_v9, %v4058_v28 }
 0x62f   :  { %v6768_v34 = vadd.f32 %v6767_v51, %v6766_v58 }
 0x630   :  { %v4061_v59 = vrot.slane %v4060_v55, 2 }
 0x631   :  { %v6769_v0 = vrot.slane %v6768_v34, 1 }
 0x632   :  { %v4062_v53 = vadd.f32 %v4061_v59, %v4060_v55 }
 0x633   :  { %v6770_v1 = vadd.f32 %v6769_v0, %v6768_v34 }
 0x634   :  { %v4063_v29 = vrot.slane %v4062_v53, 1 }
 0x636   :  { %v4064_v41 = vadd.f32 %v4063_v29, %v4062_v53 }
 0x638   :  { %9733 = vpush %v4064_v41 }
 0x639   :  { %9735 = vpush %v6770_v1 }
 0x669   :  { %s9734_s1 = spop %9733 }
 0x66a   :  { %s9736_s19 = spop %9735  ;;  %s4068_s21 = smul.f32 0.001953125, %s9734_s1 }
 0x66b   :  { %s6772_s20 = smul.f32 0.5, %s9736_s19 }
 0x66d   :  { %s6775_s2 = smul.f32 0.0078125, %s6772_s20 }
 0x66f   :  { %s6776_s23 = sadd.f32 %s6775_s2, %s4068_s21 }
 0x682   :  { %v7793_v40 = vpop.xlane.xlu0 %7792 }
 0x683   :  { %v7794_v24 = vrot.slane %v7793_v40, 4 }
 0x685   :  { %v7795_v14 = vadd.f32 %v7794_v24, %v7793_v40 }
 0x687   :  { %v7796_v23 = vrot.slane %v7795_v14, 2 }
 0x689   :  { %v7797_v8 = vadd.f32 %v7796_v23, %v7795_v14 }
 0x68b   :  { %v7798_v7 = vrot.slane %v7797_v8, 1 }
 0x68d   :  { %v7799_v62 = vadd.f32 %v7798_v7, %v7797_v8 }
 0x68e   :  { %v8512_v5 = vpop.xlane.xlu0 %8511 }
 0x68f   :  { %v8513_v31 = vrot.slane %v8512_v5, 4  ;;  %9737 = vpush %v7799_v62 }
 0x691   :  { %v8514_v10 = vadd.f32 %v8513_v31, %v8512_v5 }
 0x693   :  { %v8515_v21 = vrot.slane %v8514_v10, 2 }
 0x695   :  { %v8516_v48 = vadd.f32 %v8515_v21, %v8514_v10 }
 0x697   :  { %v8517_v36 = vrot.slane %v8516_v48, 1 }
 0x699   :  { %v8518_v17 = vadd.f32 %v8517_v36, %v8516_v48 }
 0x69b   :  { %9739 = vpush %v8518_v17 }
 0x6c0   :  { %s9738_s22 = spop %9737 }
 0x6c1   :  { %s7801_s24 = sadd.f32 %s9738_s22, %s6776_s23 }
 0x6cc   :  { %s9740_s4 = spop %9739 }
 0x6cd   :  { %s8520_s25 = smul.f32 0.5, %s9740_s4 }
 0x6cf   :  { %s8521_s26 = sadd.f32 %s8520_s25, %s7801_s24 }
 0x6d1   :  { %8523 = sst [smem:[#allocation11]] %s8521_s26 }
 0x6d2   :  { %8531 = dma.smem_to_hbm %s10921_s27, 16, %s13216_s8, [#allocation4]  }
 0x6d3   :  { %10908 = dma.done.wait [#allocation4], 16  }
 0x6d4   :  { %10909 = vsyncadd [#allocation4], 4294967280 }
 0x6d5   :  { %8535 = sfence }
 0x6d6   :  { %8536 = vsyncpa [#allocation3], 1 }
 0x6d7   :  { %8537 = vsyncpa [#allocation6], 1 }
 0x6d8   :  { %8538 = vsyncpa [#allocation9], 1 }
 0x6d9   :  { %8539 = vsyncpa [#allocation4], 1 }

</bundles_post_ra>
